<compile_context>
chip_gen: v7x
topology: tpu7x:2x2x1
jax: 0.10.0
libtpu: 0.0.40
codegen_flags: <defaults>
</compile_context>

<pallas_src>
import functools

import jax
import jax.numpy as jnp
from jax.experimental import pallas as pl
from jax.experimental.pallas import tpu as pltpu

CONV_CFG = ((8, 4), (4, 2), (3, 1))       # (kernel, stride) of the Nature-CNN trunk
CONV_CHANNELS = (32, 64, 64)
HIDDEN = 256
CP = 128                                   # channel padding -> lane-dense everywhere


def _conv_dims(h, w):
    assert h % 4 == 0 and w % 4 == 0, "spatial dims must be multiples of 4"
    oh1, ow1 = h // 4 - 1, w // 4 - 1                 # conv1: k=8, s=4
    assert oh1 % 2 == 0 and ow1 % 2 == 0, "conv1 output must be even (conv2 re-block)"
    oh2, ow2 = oh1 // 2 - 1, ow1 // 2 - 1             # conv2: k=4, s=2
    oh3, ow3 = oh2 - 2, ow2 - 2                       # conv3: k=3, s=1
    assert oh3 >= 1 and ow3 >= 1, "input too small for the conv trunk"
    return oh1, ow1, oh2, ow2, oh3, ow3


# --------------------------------------------------------------------------
# the fused kernel: conv1 -> conv2 -> conv3 -> dueling head, one batch item
# per grid step; all weights resident in VMEM, all patches gathered in VMEM.
# --------------------------------------------------------------------------
def _rainbow_kernel(x_ref, w1_ref, b1_ref, w2_ref, b2_ref, w3_ref, b3_ref,
                    wh1_ref, bh1_ref, wh2_ref, bh2_ref, q_ref,
                    p1_s, a1_s, p2_s, a2_s, p3_s, f_s, *, dims, n_actions):
    oh1, ow1, oh2, ow2, oh3, ow3 = dims
    w1s = ow1 // 2

    # ---- conv1: 2x2 windows over the stride-4 re-blocked input, one MXU dot ----
    for kp in range(2):
        for kq in range(2):
            c0 = (kp * 2 + kq) * CP
            for i in range(oh1):
                p1_s[i * ow1:(i + 1) * ow1, c0:c0 + CP] = \
                    x_ref[0, kp + i, kq:kq + ow1, :]
    a1 = jnp.dot(p1_s[...].astype(jnp.bfloat16), w1_ref[...],
                 preferred_element_type=jnp.float32)
    a1 = jnp.maximum(a1 + b1_ref[...], 0.0)                        # [oh1*ow1, 128]

    # ---- re-block conv1 activation by 2 (conv2 becomes a 2x2 stride-1 conv) ----
    # TODO(synk): 64 single-row VMEM copies; a packed store layout could cut this.
    for i1 in range(oh1):
        u, r = i1 // 2, i1 % 2
        for j1 in range(ow1):
            v, t = j1 // 2, j1 % 2
            dst = u * w1s + v
            a1_s[dst:dst + 1, (r * 2 + t) * CP:(r * 2 + t + 1) * CP] = \
                a1[i1 * ow1 + j1:i1 * ow1 + j1 + 1, :]

    # ---- conv2: 2x2 windows over the re-blocked activation, one MXU dot --------
    for kp in range(2):
        for kq in range(2):
            c0 = (kp * 2 + kq) * (4 * CP)
            for i in range(oh2):
                src = (i + kp) * w1s + kq
                p2_s[i * ow2:(i + 1) * ow2, c0:c0 + 4 * CP] = a1_s[src:src + ow2, :]
    a2 = jnp.dot(p2_s[...].astype(jnp.bfloat16), w2_ref[...],
                 preferred_element_type=jnp.float32)
    a2_s[...] = jnp.maximum(a2 + b2_ref[...], 0.0)                 # [oh2*ow2, 128]

    # ---- conv3: 3x3 stride-1 windows, one MXU dot -------------------------------
    for kp in range(3):
        for kq in range(3):
            c0 = (kp * 3 + kq) * CP
            for i in range(oh3):
                src = (i + kp) * ow2 + kq
                p3_s[i * ow3:(i + 1) * ow3, c0:c0 + CP] = a2_s[src:src + ow3, :]
    a3 = jnp.dot(p3_s[...].astype(jnp.bfloat16), w3_ref[...],
                 preferred_element_type=jnp.float32)
    a3 = jnp.maximum(a3 + b3_ref[...], 0.0)                        # [oh3*ow3, 128]

    # ---- flatten (NHWC order) into one lane-dense feature row -------------------
    for s in range(oh3 * ow3):
        f_s[0:1, s * CP:(s + 1) * CP] = a3[s:s + 1, :]

    # ---- fused dueling head: two wide dots --------------------------------------
    h = jnp.dot(f_s[...].astype(jnp.bfloat16), wh1_ref[...],
                preferred_element_type=jnp.float32)
    h = jnp.maximum(h + bh1_ref[...], 0.0)                         # [1, 512]
    o = jnp.dot(h.astype(jnp.bfloat16), wh2_ref[...],
                preferred_element_type=jnp.float32) + bh2_ref[...]  # [1, 128]
    value = o[:, n_actions:n_actions + 1]
    adv_sum = jnp.sum(o, axis=1, keepdims=True) - value            # padded lanes == 0
    q = value + o - adv_sum * (1.0 / n_actions)
    q_ref[...] = jnp.broadcast_to(q, (1, 8, CP)).astype(q_ref.dtype)


def _wspec(a):
    return pl.BlockSpec(a.shape, lambda b: (0, 0))


# --------------------------------------------------------------------------
# forward pass: one jit, one pallas_call
# --------------------------------------------------------------------------
@functools.partial(jax.jit, static_argnames=("n_actions",))
def rainbow_forward(x_nchw, prep, *, n_actions):
    B, cin, H, W = x_nchw.shape
    dims = _conv_dims(H, W)
    oh1, ow1, oh2, ow2, oh3, ow3 = dims
    gh, gw = H // 4, W // 4
    s3 = oh3 * ow3
    assert 16 * cin <= CP and n_actions + 1 <= CP

    # stride-4 space-to-depth of the raw input (the only XLA-side data prep).
    xh = jnp.transpose(x_nchw, (0, 2, 3, 1)).astype(jnp.float32)          # NHWC
    xb = xh.reshape(B, gh, 4, gw, 4, cin).transpose(0, 1, 3, 2, 4, 5)
    xs2d = jnp.pad(xb.reshape(B, gh, gw, 16 * cin),
                   ((0, 0), (0, 0), (0, 0), (0, CP - 16 * cin)))

    kernel = functools.partial(_rainbow_kernel, dims=dims, n_actions=n_actions)
    q_pad = pl.pallas_call(
        kernel,
        out_shape=jax.ShapeDtypeStruct((B, 8, CP), jnp.float32),
        grid_spec=pltpu.PrefetchScalarGridSpec(
            num_scalar_prefetch=0,
            grid=(B,),
            in_specs=[pl.BlockSpec((1, gh, gw, CP), lambda b: (b, 0, 0, 0)),
                      _wspec(prep["W1"]), _wspec(prep["B1"]),
                      _wspec(prep["W2"]), _wspec(prep["B2"]),
                      _wspec(prep["W3"]), _wspec(prep["B3"]),
                      _wspec(prep["WH1"]), _wspec(prep["BH1"]),
                      _wspec(prep["WH2"]), _wspec(prep["BH2"])],
            out_specs=pl.BlockSpec((1, 8, CP), lambda b: (b, 0, 0)),
            scratch_shapes=[
                pltpu.VMEM((oh1 * ow1, 4 * CP), jnp.float32),             # conv1 patches
                pltpu.VMEM(((oh1 // 2) * (ow1 // 2), 4 * CP), jnp.float32),  # act1 s2d
                pltpu.VMEM((oh2 * ow2, 16 * CP), jnp.float32),            # conv2 patches
                pltpu.VMEM((oh2 * ow2, CP), jnp.float32),                 # act2
                pltpu.VMEM((s3, 9 * CP), jnp.float32),                    # conv3 patches
                pltpu.VMEM((1, s3 * CP), jnp.float32),                    # features
            ],
        ),
        compiler_params=pltpu.CompilerParams(
            dimension_semantics=("parallel",)),   # v7x: both TCs when B >= 2
    )(xs2d, prep["W1"], prep["B1"], prep["W2"], prep["B2"],
      prep["W3"], prep["B3"], prep["WH1"], prep["BH1"],
      prep["WH2"], prep["BH2"])
    return q_pad[:, 0, :n_actions]


# --------------------------------------------------------------------------
# parameters: raw (reference) weights + prepared (padded / re-ordered) weights
# --------------------------------------------------------------------------
def _noisy_linear_eff(key, fan_in, fan_out, sigma0=0.5):
    k1, k2, k3, k4 = jax.random.split(key, 4)
    bound = 1.0 / (fan_in ** 0.5)
    w_mu = jax.random.uniform(k1, (fan_in, fan_out), jnp.float32, -bound, bound)
    b_mu = jax.random.uniform(k2, (fan_out,), jnp.float32, -bound, bound)
    w_sigma = jnp.full((fan_in, fan_out), sigma0 / (fan_in ** 0.5), jnp.float32)
    b_sigma = jnp.full((fan_out,), sigma0 / (fan_in ** 0.5), jnp.float32)
    f = lambda z: jnp.sign(z) * jnp.sqrt(jnp.abs(z))
    eps_in = f(jax.random.normal(k3, (fan_in,), jnp.float32))
    eps_out = f(jax.random.normal(k4, (fan_out,), jnp.float32))
    return w_mu + w_sigma * jnp.outer(eps_in, eps_out), b_mu + b_sigma * eps_out


def init_raw_params(key, in_shape, n_actions):
    c, hh, ww = in_shape
    _, _, _, _, oh3, ow3 = _conv_dims(hh, ww)
    size = CONV_CHANNELS[-1] * oh3 * ow3
    ks = jax.random.split(key, 12)
    conv_w, conv_b = [], []
    cin, i = c, 0
    for cout, (ksz, _) in zip(CONV_CHANNELS, CONV_CFG):
        fan_in = ksz * ksz * cin
        w = jax.random.normal(ks[i], (ksz, ksz, cin, cout), jnp.float32) \
            * (2.0 / fan_in) ** 0.5
        b = jax.random.uniform(ks[i + 1], (cout,), jnp.float32, -0.05, 0.05)
        conv_w.append(w); conv_b.append(b)
        cin = cout; i += 2
    wa1, ba1 = _noisy_linear_eff(ks[i], size, HIDDEN)
    wa2, ba2 = _noisy_linear_eff(ks[i + 1], HIDDEN, n_actions)
    b1 = 1.0 / (size ** 0.5)
    wv1 = jax.random.uniform(ks[i + 2], (size, HIDDEN), jnp.float32, -b1, b1)
    bv1 = jax.random.uniform(ks[i + 3], (HIDDEN,), jnp.float32, -b1, b1)
    b2 = 1.0 / (HIDDEN ** 0.5)
    wv2 = jax.random.uniform(ks[i + 4], (HIDDEN, 1), jnp.float32, -b2, b2)
    bv2 = jax.random.uniform(ks[i + 5], (1,), jnp.float32, -b2, b2)
    return dict(conv_w=conv_w, conv_b=conv_b, wa1=wa1, ba1=ba1, wa2=wa2, ba2=ba2,
                wv1=wv1, bv1=bv1, wv2=wv2, bv2=bv2)


def prepare_params(raw, in_shape, n_actions):
    """Re-order / zero-pad / bf16-cast everything once, outside the jit."""
    cin, hh, ww = in_shape
    _, _, _, _, oh3, ow3 = _conv_dims(hh, ww)
    s3 = oh3 * ow3

    def padc(a, n):
        return jnp.pad(a, [(0, 0)] * (a.ndim - 1) + [(0, n - a.shape[-1])])

    # conv1: rows (p, q, r, t, c) per 2x2 re-block window, padded to 128 per block.
    w1 = raw["conv_w"][0] * (1.0 / 255.0)                       # fold x/255
    w1 = w1.reshape(2, 4, 2, 4, cin, 32).transpose(0, 2, 1, 3, 4, 5)
    w1 = w1.reshape(4, 16 * cin, 32)
    w1 = jnp.pad(w1, ((0, 0), (0, CP - 16 * cin), (0, 0))).reshape(4 * CP, 32)
    W1 = padc(w1, CP).astype(jnp.bfloat16)                      # [512, 128]
    B1 = padc(raw["conv_b"][0].reshape(1, -1), CP).astype(jnp.float32)

    # conv2: input channels padded to 128, re-blocked by 2 -> rows (p, q, r, t, ch).
    w2 = jnp.pad(raw["conv_w"][1], ((0, 0), (0, 0), (0, CP - 32), (0, 0)))
    w2 = w2.reshape(2, 2, 2, 2, CP, 64).transpose(0, 2, 1, 3, 4, 5).reshape(16 * CP, 64)
    W2 = padc(w2, CP).astype(jnp.bfloat16)                      # [2048, 128]
    B2 = padc(raw["conv_b"][1].reshape(1, -1), CP).astype(jnp.float32)

    # conv3: rows (p, q, ch).
    w3 = jnp.pad(raw["conv_w"][2], ((0, 0), (0, 0), (0, CP - 64), (0, 0)))
    W3 = padc(w3.reshape(9 * CP, 64), CP).astype(jnp.bfloat16)  # [1152, 128]
    B3 = padc(raw["conv_b"][2].reshape(1, -1), CP).astype(jnp.float32)

    # fused head: hidden = [advantage(256) | value(256)]; output lane n_actions
    # carries the value stream; all padded lanes/rows are exactly zero.
    def pad_rows(w):
        return jnp.pad(w.reshape(s3, 64, HIDDEN),
                       ((0, 0), (0, CP - 64), (0, 0))).reshape(s3 * CP, HIDDEN)

    WH1 = jnp.concatenate([pad_rows(raw["wa1"]), pad_rows(raw["wv1"])],
                          axis=1).astype(jnp.bfloat16)          # [s3*128, 512]
    BH1 = jnp.concatenate([raw["ba1"], raw["bv1"]]).reshape(1, 2 * HIDDEN
                                                            ).astype(jnp.float32)
    WH2 = jnp.zeros((2 * HIDDEN, CP), jnp.float32)
    WH2 = WH2.at[:HIDDEN, :n_actions].set(raw["wa2"])
    WH2 = WH2.at[HIDDEN:, n_actions].set(raw["wv2"][:, 0]).astype(jnp.bfloat16)
    BH2 = jnp.zeros((1, CP), jnp.float32)
    BH2 = BH2.at[0, :n_actions].set(raw["ba2"]).at[0, n_actions].set(raw["bv2"][0])
    return dict(W1=W1, B1=B1, W2=W2, B2=B2, W3=W3, B3=B3,
                WH1=WH1, BH1=BH1, WH2=WH2, BH2=BH2)


# --------------------------------------------------------------------------
# pure-JAX f32 reference (independent of all kernel-side layout choices)
# --------------------------------------------------------------------------
def reference_forward(x_nchw, raw, n_actions):
    h = jnp.transpose(x_nchw, (0, 2, 3, 1)).astype(jnp.float32) / 255.0
    for w, b, (_, s) in zip(raw["conv_w"], raw["conv_b"], CONV_CFG):
        h = jax.lax.conv_general_dilated(
            h, w, window_strides=(s, s), padding="VALID",
            dimension_numbers=("NHWC", "HWIO", "NHWC")) + b
        h = jnp.maximum(h, 0.0)
    feat = h.reshape(h.shape[0], -1)
    ha = jnp.maximum(feat @ raw["wa1"] + raw["ba1"], 0.0)
    adv = ha @ raw["wa2"] + raw["ba2"]
    hv = jnp.maximum(feat @ raw["wv1"] + raw["bv1"], 0.0)
    val = hv @ raw["wv2"] + raw["bv2"]
    return val + adv - adv.mean(axis=1, keepdims=True)


# --------------------------------------------------------------------------
if __name__ == "__main__":
    key = jax.random.PRNGKey(0)
    in_shape = (4, 36, 36)      # smallest spatial size the trunk supports (conv3 out 1x1)
    n_actions = 6
    batch = 2

    k_params, k_x = jax.random.split(key)
    raw = init_raw_params(k_params, in_shape, n_actions)
    prep = prepare_params(raw, in_shape, n_actions)
    x = jax.random.uniform(k_x, (batch,) + in_shape, jnp.float32, 0.0, 255.0)

    q = rainbow_forward(x, prep, n_actions=n_actions)
    q = jax.block_until_ready(q)

    q_ref = reference_forward(x, raw, n_actions)
    err = float(jnp.max(jnp.abs(q.astype(jnp.float32) - q_ref)))
    scale = max(1.0, float(jnp.max(jnp.abs(q_ref))))
    assert q.shape == (batch, n_actions), q.shape
    assert err < 5e-2 * scale, f"max abs err {err} (scale {scale})"
    print("KERNEL_OK")
</pallas_src>

<mosaic_0001>
module attributes {stable_mosaic.version = 11 : i64} {
  func.func @_rainbow_kernel(%arg0: i32, %arg1: memref<1x9x9x128xf32, #tpu.memory_space<vmem>>, %arg2: memref<512x128xbf16, #tpu.memory_space<vmem>>, %arg3: memref<1x128xf32, #tpu.memory_space<vmem>>, %arg4: memref<2048x128xbf16, #tpu.memory_space<vmem>>, %arg5: memref<1x128xf32, #tpu.memory_space<vmem>>, %arg6: memref<1152x128xbf16, #tpu.memory_space<vmem>>, %arg7: memref<1x128xf32, #tpu.memory_space<vmem>>, %arg8: memref<128x512xbf16, #tpu.memory_space<vmem>>, %arg9: memref<1x512xf32, #tpu.memory_space<vmem>>, %arg10: memref<512x128xbf16, #tpu.memory_space<vmem>>, %arg11: memref<1x128xf32, #tpu.memory_space<vmem>>, %arg12: memref<1x8x128xf32, #tpu.memory_space<vmem>>, %arg13: memref<64x512xf32, #tpu.memory_space<vmem>>, %arg14: memref<16x512xf32, #tpu.memory_space<vmem>>, %arg15: memref<9x2048xf32, #tpu.memory_space<vmem>>, %arg16: memref<9x128xf32, #tpu.memory_space<vmem>>, %arg17: memref<1x1152xf32, #tpu.memory_space<vmem>>, %arg18: memref<1x128xf32, #tpu.memory_space<vmem>>) attributes {dimension_semantics = [#tpu.dimension_semantics<parallel>], iteration_bounds = array<i64: 2>, scalar_prefetch = 0 : i64, scratch_operands = 6 : i64, tpu.core_type = #tpu.core_type<tc>, window_params = [{transform_indices = @transform_0, window_bounds = array<i64: 1, 9, 9, 128>}, {pipeline_mode = #tpu.pipeline_mode<synchronous>, transform_indices = @transform_1, window_bounds = array<i64: 512, 128>}, {pipeline_mode = #tpu.pipeline_mode<synchronous>, transform_indices = @transform_2, window_bounds = array<i64: 1, 128>}, {pipeline_mode = #tpu.pipeline_mode<synchronous>, transform_indices = @transform_3, window_bounds = array<i64: 2048, 128>}, {pipeline_mode = #tpu.pipeline_mode<synchronous>, transform_indices = @transform_4, window_bounds = array<i64: 1, 128>}, {pipeline_mode = #tpu.pipeline_mode<synchronous>, transform_indices = @transform_5, window_bounds = array<i64: 1152, 128>}, {pipeline_mode = #tpu.pipeline_mode<synchronous>, transform_indices = @transform_6, window_bounds = array<i64: 1, 128>}, {pipeline_mode = #tpu.pipeline_mode<synchronous>, transform_indices = @transform_7, window_bounds = array<i64: 128, 512>}, {pipeline_mode = #tpu.pipeline_mode<synchronous>, transform_indices = @transform_8, window_bounds = array<i64: 1, 512>}, {pipeline_mode = #tpu.pipeline_mode<synchronous>, transform_indices = @transform_9, window_bounds = array<i64: 512, 128>}, {pipeline_mode = #tpu.pipeline_mode<synchronous>, transform_indices = @transform_10, window_bounds = array<i64: 1, 128>}, {transform_indices = @transform_11, window_bounds = array<i64: 1, 8, 128>}]} {
    %c0 = arith.constant 0 : index
    %c0_0 = arith.constant 0 : index
    %c0_1 = arith.constant 0 : index
    %c0_2 = arith.constant 0 : index
    %0 = vector.load %arg1[%c0, %c0_0, %c0_1, %c0_2] : memref<1x9x9x128xf32, #tpu.memory_space<vmem>>, vector<1x1x8x128xf32>
    %1 = vector.shape_cast %0 : vector<1x1x8x128xf32> to vector<8x128xf32>
    %c0_3 = arith.constant 0 : index
    %c0_4 = arith.constant 0 : index
    %2 = vector.load %arg13[%c0_3, %c0_4] : memref<64x512xf32, #tpu.memory_space<vmem>>, vector<8x128xf32>
    tpu.vector_store %arg13[%c0_3, %c0_4], %1 {strides = array<i32>} : memref<64x512xf32, #tpu.memory_space<vmem>>, vector<8x128xf32>,
    %c0_5 = arith.constant 0 : index
    %c1 = arith.constant 1 : index
    %c0_6 = arith.constant 0 : index
    %c0_7 = arith.constant 0 : index
    %3 = vector.load %arg1[%c0_5, %c1, %c0_6, %c0_7] : memref<1x9x9x128xf32, #tpu.memory_space<vmem>>, vector<1x1x8x128xf32>
    %4 = vector.shape_cast %3 : vector<1x1x8x128xf32> to vector<8x128xf32>
    %c8 = arith.constant 8 : index
    %c0_8 = arith.constant 0 : index
    %5 = vector.load %arg13[%c8, %c0_8] : memref<64x512xf32, #tpu.memory_space<vmem>>, vector<8x128xf32>
    tpu.vector_store %arg13[%c8, %c0_8], %4 {strides = array<i32>} : memref<64x512xf32, #tpu.memory_space<vmem>>, vector<8x128xf32>,
    %c0_9 = arith.constant 0 : index
    %c2 = arith.constant 2 : index
    %c0_10 = arith.constant 0 : index
    %c0_11 = arith.constant 0 : index
    %6 = vector.load %arg1[%c0_9, %c2, %c0_10, %c0_11] : memref<1x9x9x128xf32, #tpu.memory_space<vmem>>, vector<1x1x8x128xf32>
    %7 = vector.shape_cast %6 : vector<1x1x8x128xf32> to vector<8x128xf32>
    %c16 = arith.constant 16 : index
    %c0_12 = arith.constant 0 : index
    %8 = vector.load %arg13[%c16, %c0_12] : memref<64x512xf32, #tpu.memory_space<vmem>>, vector<8x128xf32>
    tpu.vector_store %arg13[%c16, %c0_12], %7 {strides = array<i32>} : memref<64x512xf32, #tpu.memory_space<vmem>>, vector<8x128xf32>,
    %c0_13 = arith.constant 0 : index
    %c3 = arith.constant 3 : index
    %c0_14 = arith.constant 0 : index
    %c0_15 = arith.constant 0 : index
    %9 = vector.load %arg1[%c0_13, %c3, %c0_14, %c0_15] : memref<1x9x9x128xf32, #tpu.memory_space<vmem>>, vector<1x1x8x128xf32>
    %10 = vector.shape_cast %9 : vector<1x1x8x128xf32> to vector<8x128xf32>
    %c24 = arith.constant 24 : index
    %c0_16 = arith.constant 0 : index
    %11 = vector.load %arg13[%c24, %c0_16] : memref<64x512xf32, #tpu.memory_space<vmem>>, vector<8x128xf32>
    tpu.vector_store %arg13[%c24, %c0_16], %10 {strides = array<i32>} : memref<64x512xf32, #tpu.memory_space<vmem>>, vector<8x128xf32>,
    %c0_17 = arith.constant 0 : index
    %c4 = arith.constant 4 : index
    %c0_18 = arith.constant 0 : index
    %c0_19 = arith.constant 0 : index
    %12 = vector.load %arg1[%c0_17, %c4, %c0_18, %c0_19] : memref<1x9x9x128xf32, #tpu.memory_space<vmem>>, vector<1x1x8x128xf32>
    %13 = vector.shape_cast %12 : vector<1x1x8x128xf32> to vector<8x128xf32>
    %c32 = arith.constant 32 : index
    %c0_20 = arith.constant 0 : index
    %14 = vector.load %arg13[%c32, %c0_20] : memref<64x512xf32, #tpu.memory_space<vmem>>, vector<8x128xf32>
    tpu.vector_store %arg13[%c32, %c0_20], %13 {strides = array<i32>} : memref<64x512xf32, #tpu.memory_space<vmem>>, vector<8x128xf32>,
    %c0_21 = arith.constant 0 : index
    %c5 = arith.constant 5 : index
    %c0_22 = arith.constant 0 : index
    %c0_23 = arith.constant 0 : index
    %15 = vector.load %arg1[%c0_21, %c5, %c0_22, %c0_23] : memref<1x9x9x128xf32, #tpu.memory_space<vmem>>, vector<1x1x8x128xf32>
    %16 = vector.shape_cast %15 : vector<1x1x8x128xf32> to vector<8x128xf32>
    %c40 = arith.constant 40 : index
    %c0_24 = arith.constant 0 : index
    %17 = vector.load %arg13[%c40, %c0_24] : memref<64x512xf32, #tpu.memory_space<vmem>>, vector<8x128xf32>
    tpu.vector_store %arg13[%c40, %c0_24], %16 {strides = array<i32>} : memref<64x512xf32, #tpu.memory_space<vmem>>, vector<8x128xf32>,
    %c0_25 = arith.constant 0 : index
    %c6 = arith.constant 6 : index
    %c0_26 = arith.constant 0 : index
    %c0_27 = arith.constant 0 : index
    %18 = vector.load %arg1[%c0_25, %c6, %c0_26, %c0_27] : memref<1x9x9x128xf32, #tpu.memory_space<vmem>>, vector<1x1x8x128xf32>
    %19 = vector.shape_cast %18 : vector<1x1x8x128xf32> to vector<8x128xf32>
    %c48 = arith.constant 48 : index
    %c0_28 = arith.constant 0 : index
    %20 = vector.load %arg13[%c48, %c0_28] : memref<64x512xf32, #tpu.memory_space<vmem>>, vector<8x128xf32>
    tpu.vector_store %arg13[%c48, %c0_28], %19 {strides = array<i32>} : memref<64x512xf32, #tpu.memory_space<vmem>>, vector<8x128xf32>,
    %c0_29 = arith.constant 0 : index
    %c7 = arith.constant 7 : index
    %c0_30 = arith.constant 0 : index
    %c0_31 = arith.constant 0 : index
    %21 = vector.load %arg1[%c0_29, %c7, %c0_30, %c0_31] : memref<1x9x9x128xf32, #tpu.memory_space<vmem>>, vector<1x1x8x128xf32>
    %22 = vector.shape_cast %21 : vector<1x1x8x128xf32> to vector<8x128xf32>
    %c56 = arith.constant 56 : index
    %c0_32 = arith.constant 0 : index
    %23 = vector.load %arg13[%c56, %c0_32] : memref<64x512xf32, #tpu.memory_space<vmem>>, vector<8x128xf32>
    tpu.vector_store %arg13[%c56, %c0_32], %22 {strides = array<i32>} : memref<64x512xf32, #tpu.memory_space<vmem>>, vector<8x128xf32>,
    %c0_33 = arith.constant 0 : index
    %c0_34 = arith.constant 0 : index
    %c1_35 = arith.constant 1 : index
    %c0_36 = arith.constant 0 : index
    %24 = vector.load %arg1[%c0_33, %c0_34, %c1_35, %c0_36] : memref<1x9x9x128xf32, #tpu.memory_space<vmem>>, vector<1x1x8x128xf32>
    %25 = vector.shape_cast %24 : vector<1x1x8x128xf32> to vector<8x128xf32>
    %c0_37 = arith.constant 0 : index
    %c128 = arith.constant 128 : index
    %26 = vector.load %arg13[%c0_37, %c128] : memref<64x512xf32, #tpu.memory_space<vmem>>, vector<8x128xf32>
    tpu.vector_store %arg13[%c0_37, %c128], %25 {strides = array<i32>} : memref<64x512xf32, #tpu.memory_space<vmem>>, vector<8x128xf32>,
    %c0_38 = arith.constant 0 : index
    %c1_39 = arith.constant 1 : index
    %c1_40 = arith.constant 1 : index
    %c0_41 = arith.constant 0 : index
    %27 = vector.load %arg1[%c0_38, %c1_39, %c1_40, %c0_41] : memref<1x9x9x128xf32, #tpu.memory_space<vmem>>, vector<1x1x8x128xf32>
    %28 = vector.shape_cast %27 : vector<1x1x8x128xf32> to vector<8x128xf32>
    %c8_42 = arith.constant 8 : index
    %c128_43 = arith.constant 128 : index
    %29 = vector.load %arg13[%c8_42, %c128_43] : memref<64x512xf32, #tpu.memory_space<vmem>>, vector<8x128xf32>
    tpu.vector_store %arg13[%c8_42, %c128_43], %28 {strides = array<i32>} : memref<64x512xf32, #tpu.memory_space<vmem>>, vector<8x128xf32>,
    %c0_44 = arith.constant 0 : index
    %c2_45 = arith.constant 2 : index
    %c1_46 = arith.constant 1 : index
    %c0_47 = arith.constant 0 : index
    %30 = vector.load %arg1[%c0_44, %c2_45, %c1_46, %c0_47] : memref<1x9x9x128xf32, #tpu.memory_space<vmem>>, vector<1x1x8x128xf32>
    %31 = vector.shape_cast %30 : vector<1x1x8x128xf32> to vector<8x128xf32>
    %c16_48 = arith.constant 16 : index
    %c128_49 = arith.constant 128 : index
    %32 = vector.load %arg13[%c16_48, %c128_49] : memref<64x512xf32, #tpu.memory_space<vmem>>, vector<8x128xf32>
    tpu.vector_store %arg13[%c16_48, %c128_49], %31 {strides = array<i32>} : memref<64x512xf32, #tpu.memory_space<vmem>>, vector<8x128xf32>,
    %c0_50 = arith.constant 0 : index
    %c3_51 = arith.constant 3 : index
    %c1_52 = arith.constant 1 : index
    %c0_53 = arith.constant 0 : index
    %33 = vector.load %arg1[%c0_50, %c3_51, %c1_52, %c0_53] : memref<1x9x9x128xf32, #tpu.memory_space<vmem>>, vector<1x1x8x128xf32>
    %34 = vector.shape_cast %33 : vector<1x1x8x128xf32> to vector<8x128xf32>
    %c24_54 = arith.constant 24 : index
    %c128_55 = arith.constant 128 : index
    %35 = vector.load %arg13[%c24_54, %c128_55] : memref<64x512xf32, #tpu.memory_space<vmem>>, vector<8x128xf32>
    tpu.vector_store %arg13[%c24_54, %c128_55], %34 {strides = array<i32>} : memref<64x512xf32, #tpu.memory_space<vmem>>, vector<8x128xf32>,
    %c0_56 = arith.constant 0 : index
    %c4_57 = arith.constant 4 : index
    %c1_58 = arith.constant 1 : index
    %c0_59 = arith.constant 0 : index
    %36 = vector.load %arg1[%c0_56, %c4_57, %c1_58, %c0_59] : memref<1x9x9x128xf32, #tpu.memory_space<vmem>>, vector<1x1x8x128xf32>
    %37 = vector.shape_cast %36 : vector<1x1x8x128xf32> to vector<8x128xf32>
    %c32_60 = arith.constant 32 : index
    %c128_61 = arith.constant 128 : index
    %38 = vector.load %arg13[%c32_60, %c128_61] : memref<64x512xf32, #tpu.memory_space<vmem>>, vector<8x128xf32>
    tpu.vector_store %arg13[%c32_60, %c128_61], %37 {strides = array<i32>} : memref<64x512xf32, #tpu.memory_space<vmem>>, vector<8x128xf32>,
    %c0_62 = arith.constant 0 : index
    %c5_63 = arith.constant 5 : index
    %c1_64 = arith.constant 1 : index
    %c0_65 = arith.constant 0 : index
    %39 = vector.load %arg1[%c0_62, %c5_63, %c1_64, %c0_65] : memref<1x9x9x128xf32, #tpu.memory_space<vmem>>, vector<1x1x8x128xf32>
    %40 = vector.shape_cast %39 : vector<1x1x8x128xf32> to vector<8x128xf32>
    %c40_66 = arith.constant 40 : index
    %c128_67 = arith.constant 128 : index
    %41 = vector.load %arg13[%c40_66, %c128_67] : memref<64x512xf32, #tpu.memory_space<vmem>>, vector<8x128xf32>
    tpu.vector_store %arg13[%c40_66, %c128_67], %40 {strides = array<i32>} : memref<64x512xf32, #tpu.memory_space<vmem>>, vector<8x128xf32>,
    %c0_68 = arith.constant 0 : index
    %c6_69 = arith.constant 6 : index
    %c1_70 = arith.constant 1 : index
    %c0_71 = arith.constant 0 : index
    %42 = vector.load %arg1[%c0_68, %c6_69, %c1_70, %c0_71] : memref<1x9x9x128xf32, #tpu.memory_space<vmem>>, vector<1x1x8x128xf32>
    %43 = vector.shape_cast %42 : vector<1x1x8x128xf32> to vector<8x128xf32>
    %c48_72 = arith.constant 48 : index
    %c128_73 = arith.constant 128 : index
    %44 = vector.load %arg13[%c48_72, %c128_73] : memref<64x512xf32, #tpu.memory_space<vmem>>, vector<8x128xf32>
    tpu.vector_store %arg13[%c48_72, %c128_73], %43 {strides = array<i32>} : memref<64x512xf32, #tpu.memory_space<vmem>>, vector<8x128xf32>,
    %c0_74 = arith.constant 0 : index
    %c7_75 = arith.constant 7 : index
    %c1_76 = arith.constant 1 : index
    %c0_77 = arith.constant 0 : index
    %45 = vector.load %arg1[%c0_74, %c7_75, %c1_76, %c0_77] : memref<1x9x9x128xf32, #tpu.memory_space<vmem>>, vector<1x1x8x128xf32>
    %46 = vector.shape_cast %45 : vector<1x1x8x128xf32> to vector<8x128xf32>
    %c56_78 = arith.constant 56 : index
    %c128_79 = arith.constant 128 : index
    %47 = vector.load %arg13[%c56_78, %c128_79] : memref<64x512xf32, #tpu.memory_space<vmem>>, vector<8x128xf32>
    tpu.vector_store %arg13[%c56_78, %c128_79], %46 {strides = array<i32>} : memref<64x512xf32, #tpu.memory_space<vmem>>, vector<8x128xf32>,
    %c0_80 = arith.constant 0 : index
    %c1_81 = arith.constant 1 : index
    %c0_82 = arith.constant 0 : index
    %c0_83 = arith.constant 0 : index
    %48 = vector.load %arg1[%c0_80, %c1_81, %c0_82, %c0_83] : memref<1x9x9x128xf32, #tpu.memory_space<vmem>>, vector<1x1x8x128xf32>
    %49 = vector.shape_cast %48 : vector<1x1x8x128xf32> to vector<8x128xf32>
    %c0_84 = arith.constant 0 : index
    %c256 = arith.constant 256 : index
    %50 = vector.load %arg13[%c0_84, %c256] : memref<64x512xf32, #tpu.memory_space<vmem>>, vector<8x128xf32>
    tpu.vector_store %arg13[%c0_84, %c256], %49 {strides = array<i32>} : memref<64x512xf32, #tpu.memory_space<vmem>>, vector<8x128xf32>,
    %c0_85 = arith.constant 0 : index
    %c2_86 = arith.constant 2 : index
    %c0_87 = arith.constant 0 : index
    %c0_88 = arith.constant 0 : index
    %51 = vector.load %arg1[%c0_85, %c2_86, %c0_87, %c0_88] : memref<1x9x9x128xf32, #tpu.memory_space<vmem>>, vector<1x1x8x128xf32>
    %52 = vector.shape_cast %51 : vector<1x1x8x128xf32> to vector<8x128xf32>
    %c8_89 = arith.constant 8 : index
    %c256_90 = arith.constant 256 : index
    %53 = vector.load %arg13[%c8_89, %c256_90] : memref<64x512xf32, #tpu.memory_space<vmem>>, vector<8x128xf32>
    tpu.vector_store %arg13[%c8_89, %c256_90], %52 {strides = array<i32>} : memref<64x512xf32, #tpu.memory_space<vmem>>, vector<8x128xf32>,
    %c0_91 = arith.constant 0 : index
    %c3_92 = arith.constant 3 : index
    %c0_93 = arith.constant 0 : index
    %c0_94 = arith.constant 0 : index
    %54 = vector.load %arg1[%c0_91, %c3_92, %c0_93, %c0_94] : memref<1x9x9x128xf32, #tpu.memory_space<vmem>>, vector<1x1x8x128xf32>
    %55 = vector.shape_cast %54 : vector<1x1x8x128xf32> to vector<8x128xf32>
    %c16_95 = arith.constant 16 : index
    %c256_96 = arith.constant 256 : index
    %56 = vector.load %arg13[%c16_95, %c256_96] : memref<64x512xf32, #tpu.memory_space<vmem>>, vector<8x128xf32>
    tpu.vector_store %arg13[%c16_95, %c256_96], %55 {strides = array<i32>} : memref<64x512xf32, #tpu.memory_space<vmem>>, vector<8x128xf32>,
    %c0_97 = arith.constant 0 : index
    %c4_98 = arith.constant 4 : index
    %c0_99 = arith.constant 0 : index
    %c0_100 = arith.constant 0 : index
    %57 = vector.load %arg1[%c0_97, %c4_98, %c0_99, %c0_100] : memref<1x9x9x128xf32, #tpu.memory_space<vmem>>, vector<1x1x8x128xf32>
    %58 = vector.shape_cast %57 : vector<1x1x8x128xf32> to vector<8x128xf32>
    %c24_101 = arith.constant 24 : index
    %c256_102 = arith.constant 256 : index
    %59 = vector.load %arg13[%c24_101, %c256_102] : memref<64x512xf32, #tpu.memory_space<vmem>>, vector<8x128xf32>
    tpu.vector_store %arg13[%c24_101, %c256_102], %58 {strides = array<i32>} : memref<64x512xf32, #tpu.memory_space<vmem>>, vector<8x128xf32>,
    %c0_103 = arith.constant 0 : index
    %c5_104 = arith.constant 5 : index
    %c0_105 = arith.constant 0 : index
    %c0_106 = arith.constant 0 : index
    %60 = vector.load %arg1[%c0_103, %c5_104, %c0_105, %c0_106] : memref<1x9x9x128xf32, #tpu.memory_space<vmem>>, vector<1x1x8x128xf32>
    %61 = vector.shape_cast %60 : vector<1x1x8x128xf32> to vector<8x128xf32>
    %c32_107 = arith.constant 32 : index
    %c256_108 = arith.constant 256 : index
    %62 = vector.load %arg13[%c32_107, %c256_108] : memref<64x512xf32, #tpu.memory_space<vmem>>, vector<8x128xf32>
    tpu.vector_store %arg13[%c32_107, %c256_108], %61 {strides = array<i32>} : memref<64x512xf32, #tpu.memory_space<vmem>>, vector<8x128xf32>,
    %c0_109 = arith.constant 0 : index
    %c6_110 = arith.constant 6 : index
    %c0_111 = arith.constant 0 : index
    %c0_112 = arith.constant 0 : index
    %63 = vector.load %arg1[%c0_109, %c6_110, %c0_111, %c0_112] : memref<1x9x9x128xf32, #tpu.memory_space<vmem>>, vector<1x1x8x128xf32>
    %64 = vector.shape_cast %63 : vector<1x1x8x128xf32> to vector<8x128xf32>
    %c40_113 = arith.constant 40 : index
    %c256_114 = arith.constant 256 : index
    %65 = vector.load %arg13[%c40_113, %c256_114] : memref<64x512xf32, #tpu.memory_space<vmem>>, vector<8x128xf32>
    tpu.vector_store %arg13[%c40_113, %c256_114], %64 {strides = array<i32>} : memref<64x512xf32, #tpu.memory_space<vmem>>, vector<8x128xf32>,
    %c0_115 = arith.constant 0 : index
    %c7_116 = arith.constant 7 : index
    %c0_117 = arith.constant 0 : index
    %c0_118 = arith.constant 0 : index
    %66 = vector.load %arg1[%c0_115, %c7_116, %c0_117, %c0_118] : memref<1x9x9x128xf32, #tpu.memory_space<vmem>>, vector<1x1x8x128xf32>
    %67 = vector.shape_cast %66 : vector<1x1x8x128xf32> to vector<8x128xf32>
    %c48_119 = arith.constant 48 : index
    %c256_120 = arith.constant 256 : index
    %68 = vector.load %arg13[%c48_119, %c256_120] : memref<64x512xf32, #tpu.memory_space<vmem>>, vector<8x128xf32>
    tpu.vector_store %arg13[%c48_119, %c256_120], %67 {strides = array<i32>} : memref<64x512xf32, #tpu.memory_space<vmem>>, vector<8x128xf32>,
    %c0_121 = arith.constant 0 : index
    %c8_122 = arith.constant 8 : index
    %c0_123 = arith.constant 0 : index
    %c0_124 = arith.constant 0 : index
    %69 = vector.load %arg1[%c0_121, %c8_122, %c0_123, %c0_124] : memref<1x9x9x128xf32, #tpu.memory_space<vmem>>, vector<1x1x8x128xf32>
    %70 = vector.shape_cast %69 : vector<1x1x8x128xf32> to vector<8x128xf32>
    %c56_125 = arith.constant 56 : index
    %c256_126 = arith.constant 256 : index
    %71 = vector.load %arg13[%c56_125, %c256_126] : memref<64x512xf32, #tpu.memory_space<vmem>>, vector<8x128xf32>
    tpu.vector_store %arg13[%c56_125, %c256_126], %70 {strides = array<i32>} : memref<64x512xf32, #tpu.memory_space<vmem>>, vector<8x128xf32>,
    %c0_127 = arith.constant 0 : index
    %c1_128 = arith.constant 1 : index
    %c1_129 = arith.constant 1 : index
    %c0_130 = arith.constant 0 : index
    %72 = vector.load %arg1[%c0_127, %c1_128, %c1_129, %c0_130] : memref<1x9x9x128xf32, #tpu.memory_space<vmem>>, vector<1x1x8x128xf32>
    %73 = vector.shape_cast %72 : vector<1x1x8x128xf32> to vector<8x128xf32>
    %c0_131 = arith.constant 0 : index
    %c384 = arith.constant 384 : index
    %74 = vector.load %arg13[%c0_131, %c384] : memref<64x512xf32, #tpu.memory_space<vmem>>, vector<8x128xf32>
    tpu.vector_store %arg13[%c0_131, %c384], %73 {strides = array<i32>} : memref<64x512xf32, #tpu.memory_space<vmem>>, vector<8x128xf32>,
    %c0_132 = arith.constant 0 : index
    %c2_133 = arith.constant 2 : index
    %c1_134 = arith.constant 1 : index
    %c0_135 = arith.constant 0 : index
    %75 = vector.load %arg1[%c0_132, %c2_133, %c1_134, %c0_135] : memref<1x9x9x128xf32, #tpu.memory_space<vmem>>, vector<1x1x8x128xf32>
    %76 = vector.shape_cast %75 : vector<1x1x8x128xf32> to vector<8x128xf32>
    %c8_136 = arith.constant 8 : index
    %c384_137 = arith.constant 384 : index
    %77 = vector.load %arg13[%c8_136, %c384_137] : memref<64x512xf32, #tpu.memory_space<vmem>>, vector<8x128xf32>
    tpu.vector_store %arg13[%c8_136, %c384_137], %76 {strides = array<i32>} : memref<64x512xf32, #tpu.memory_space<vmem>>, vector<8x128xf32>,
    %c0_138 = arith.constant 0 : index
    %c3_139 = arith.constant 3 : index
    %c1_140 = arith.constant 1 : index
    %c0_141 = arith.constant 0 : index
    %78 = vector.load %arg1[%c0_138, %c3_139, %c1_140, %c0_141] : memref<1x9x9x128xf32, #tpu.memory_space<vmem>>, vector<1x1x8x128xf32>
    %79 = vector.shape_cast %78 : vector<1x1x8x128xf32> to vector<8x128xf32>
    %c16_142 = arith.constant 16 : index
    %c384_143 = arith.constant 384 : index
    %80 = vector.load %arg13[%c16_142, %c384_143] : memref<64x512xf32, #tpu.memory_space<vmem>>, vector<8x128xf32>
    tpu.vector_store %arg13[%c16_142, %c384_143], %79 {strides = array<i32>} : memref<64x512xf32, #tpu.memory_space<vmem>>, vector<8x128xf32>,
    %c0_144 = arith.constant 0 : index
    %c4_145 = arith.constant 4 : index
    %c1_146 = arith.constant 1 : index
    %c0_147 = arith.constant 0 : index
    %81 = vector.load %arg1[%c0_144, %c4_145, %c1_146, %c0_147] : memref<1x9x9x128xf32, #tpu.memory_space<vmem>>, vector<1x1x8x128xf32>
    %82 = vector.shape_cast %81 : vector<1x1x8x128xf32> to vector<8x128xf32>
    %c24_148 = arith.constant 24 : index
    %c384_149 = arith.constant 384 : index
    %83 = vector.load %arg13[%c24_148, %c384_149] : memref<64x512xf32, #tpu.memory_space<vmem>>, vector<8x128xf32>
    tpu.vector_store %arg13[%c24_148, %c384_149], %82 {strides = array<i32>} : memref<64x512xf32, #tpu.memory_space<vmem>>, vector<8x128xf32>,
    %c0_150 = arith.constant 0 : index
    %c5_151 = arith.constant 5 : index
    %c1_152 = arith.constant 1 : index
    %c0_153 = arith.constant 0 : index
    %84 = vector.load %arg1[%c0_150, %c5_151, %c1_152, %c0_153] : memref<1x9x9x128xf32, #tpu.memory_space<vmem>>, vector<1x1x8x128xf32>
    %85 = vector.shape_cast %84 : vector<1x1x8x128xf32> to vector<8x128xf32>
    %c32_154 = arith.constant 32 : index
    %c384_155 = arith.constant 384 : index
    %86 = vector.load %arg13[%c32_154, %c384_155] : memref<64x512xf32, #tpu.memory_space<vmem>>, vector<8x128xf32>
    tpu.vector_store %arg13[%c32_154, %c384_155], %85 {strides = array<i32>} : memref<64x512xf32, #tpu.memory_space<vmem>>, vector<8x128xf32>,
    %c0_156 = arith.constant 0 : index
    %c6_157 = arith.constant 6 : index
    %c1_158 = arith.constant 1 : index
    %c0_159 = arith.constant 0 : index
    %87 = vector.load %arg1[%c0_156, %c6_157, %c1_158, %c0_159] : memref<1x9x9x128xf32, #tpu.memory_space<vmem>>, vector<1x1x8x128xf32>
    %88 = vector.shape_cast %87 : vector<1x1x8x128xf32> to vector<8x128xf32>
    %c40_160 = arith.constant 40 : index
    %c384_161 = arith.constant 384 : index
    %89 = vector.load %arg13[%c40_160, %c384_161] : memref<64x512xf32, #tpu.memory_space<vmem>>, vector<8x128xf32>
    tpu.vector_store %arg13[%c40_160, %c384_161], %88 {strides = array<i32>} : memref<64x512xf32, #tpu.memory_space<vmem>>, vector<8x128xf32>,
    %c0_162 = arith.constant 0 : index
    %c7_163 = arith.constant 7 : index
    %c1_164 = arith.constant 1 : index
    %c0_165 = arith.constant 0 : index
    %90 = vector.load %arg1[%c0_162, %c7_163, %c1_164, %c0_165] : memref<1x9x9x128xf32, #tpu.memory_space<vmem>>, vector<1x1x8x128xf32>
    %91 = vector.shape_cast %90 : vector<1x1x8x128xf32> to vector<8x128xf32>
    %c48_166 = arith.constant 48 : index
    %c384_167 = arith.constant 384 : index
    %92 = vector.load %arg13[%c48_166, %c384_167] : memref<64x512xf32, #tpu.memory_space<vmem>>, vector<8x128xf32>
    tpu.vector_store %arg13[%c48_166, %c384_167], %91 {strides = array<i32>} : memref<64x512xf32, #tpu.memory_space<vmem>>, vector<8x128xf32>,
    %c0_168 = arith.constant 0 : index
    %c8_169 = arith.constant 8 : index
    %c1_170 = arith.constant 1 : index
    %c0_171 = arith.constant 0 : index
    %93 = vector.load %arg1[%c0_168, %c8_169, %c1_170, %c0_171] : memref<1x9x9x128xf32, #tpu.memory_space<vmem>>, vector<1x1x8x128xf32>
    %94 = vector.shape_cast %93 : vector<1x1x8x128xf32> to vector<8x128xf32>
    %c56_172 = arith.constant 56 : index
    %c384_173 = arith.constant 384 : index
    %95 = vector.load %arg13[%c56_172, %c384_173] : memref<64x512xf32, #tpu.memory_space<vmem>>, vector<8x128xf32>
    tpu.vector_store %arg13[%c56_172, %c384_173], %94 {strides = array<i32>} : memref<64x512xf32, #tpu.memory_space<vmem>>, vector<8x128xf32>,
    %c0_174 = arith.constant 0 : index
    %c0_175 = arith.constant 0 : index
    %96 = vector.load %arg13[%c0_174, %c0_175] : memref<64x512xf32, #tpu.memory_space<vmem>>, vector<64x512xf32>
    %97 = arith.truncf %96 : vector<64x512xf32> to vector<64x512xbf16>
    %c0_176 = arith.constant 0 : index
    %c0_177 = arith.constant 0 : index
    %98 = vector.load %arg2[%c0_176, %c0_177] : memref<512x128xbf16, #tpu.memory_space<vmem>>, vector<512x128xbf16>
    %cst = arith.constant dense<0.000000e+00> : vector<64x128xf32>
    %99 = tpu.matmul %97, %98, %cst {dimension_numbers = #tpu.dot_dimension_numbers<[1], [0], [0], [1], [0, 0, 1, 1], [], []>} : vector<64x512xbf16>, vector<512x128xbf16>, vector<64x128xf32> -> vector<64x128xf32>
    %c0_178 = arith.constant 0 : index
    %c0_179 = arith.constant 0 : index
    %100 = vector.load %arg3[%c0_178, %c0_179] : memref<1x128xf32, #tpu.memory_space<vmem>>, vector<1x128xf32>
    %101 = vector.broadcast %100 : vector<1x128xf32> to vector<64x128xf32>
    %102 = arith.addf %99, %101 : vector<64x128xf32>
    %cst_180 = arith.constant 0.000000e+00 : f32
    %103 = vector.broadcast %cst_180 : f32 to vector<64x128xf32>
    %104 = arith.maximumf %102, %103 : vector<64x128xf32>
    %105 = vector.extract_strided_slice %104 {offsets = [0, 0], sizes = [1, 128], strides = [1, 1]} : vector<64x128xf32> to vector<1x128xf32>
    %c0_181 = arith.constant 0 : index
    %c0_182 = arith.constant 0 : index
    %106 = vector.load %arg14[%c0_181, %c0_182] : memref<16x512xf32, #tpu.memory_space<vmem>>, vector<1x128xf32>
    tpu.vector_store %arg14[%c0_181, %c0_182], %105 {strides = array<i32>} : memref<16x512xf32, #tpu.memory_space<vmem>>, vector<1x128xf32>,
    %107 = vector.extract_strided_slice %104 {offsets = [1, 0], sizes = [1, 128], strides = [1, 1]} : vector<64x128xf32> to vector<1x128xf32>
    %c0_183 = arith.constant 0 : index
    %c128_184 = arith.constant 128 : index
    %108 = vector.load %arg14[%c0_183, %c128_184] : memref<16x512xf32, #tpu.memory_space<vmem>>, vector<1x128xf32>
    tpu.vector_store %arg14[%c0_183, %c128_184], %107 {strides = array<i32>} : memref<16x512xf32, #tpu.memory_space<vmem>>, vector<1x128xf32>,
    %109 = vector.extract_strided_slice %104 {offsets = [2, 0], sizes = [1, 128], strides = [1, 1]} : vector<64x128xf32> to vector<1x128xf32>
    %c1_185 = arith.constant 1 : index
    %c0_186 = arith.constant 0 : index
    %110 = vector.load %arg14[%c1_185, %c0_186] : memref<16x512xf32, #tpu.memory_space<vmem>>, vector<1x128xf32>
    tpu.vector_store %arg14[%c1_185, %c0_186], %109 {strides = array<i32>} : memref<16x512xf32, #tpu.memory_space<vmem>>, vector<1x128xf32>,
    %111 = vector.extract_strided_slice %104 {offsets = [3, 0], sizes = [1, 128], strides = [1, 1]} : vector<64x128xf32> to vector<1x128xf32>
    %c1_187 = arith.constant 1 : index
    %c128_188 = arith.constant 128 : index
    %112 = vector.load %arg14[%c1_187, %c128_188] : memref<16x512xf32, #tpu.memory_space<vmem>>, vector<1x128xf32>
    tpu.vector_store %arg14[%c1_187, %c128_188], %111 {strides = array<i32>} : memref<16x512xf32, #tpu.memory_space<vmem>>, vector<1x128xf32>,
    %113 = vector.extract_strided_slice %104 {offsets = [4, 0], sizes = [1, 128], strides = [1, 1]} : vector<64x128xf32> to vector<1x128xf32>
    %c2_189 = arith.constant 2 : index
    %c0_190 = arith.constant 0 : index
    %114 = vector.load %arg14[%c2_189, %c0_190] : memref<16x512xf32, #tpu.memory_space<vmem>>, vector<1x128xf32>
    tpu.vector_store %arg14[%c2_189, %c0_190], %113 {strides = array<i32>} : memref<16x512xf32, #tpu.memory_space<vmem>>, vector<1x128xf32>,
    %115 = vector.extract_strided_slice %104 {offsets = [5, 0], sizes = [1, 128], strides = [1, 1]} : vector<64x128xf32> to vector<1x128xf32>
    %c2_191 = arith.constant 2 : index
    %c128_192 = arith.constant 128 : index
    %116 = vector.load %arg14[%c2_191, %c128_192] : memref<16x512xf32, #tpu.memory_space<vmem>>, vector<1x128xf32>
    tpu.vector_store %arg14[%c2_191, %c128_192], %115 {strides = array<i32>} : memref<16x512xf32, #tpu.memory_space<vmem>>, vector<1x128xf32>,
    %117 = vector.extract_strided_slice %104 {offsets = [6, 0], sizes = [1, 128], strides = [1, 1]} : vector<64x128xf32> to vector<1x128xf32>
    %c3_193 = arith.constant 3 : index
    %c0_194 = arith.constant 0 : index
    %118 = vector.load %arg14[%c3_193, %c0_194] : memref<16x512xf32, #tpu.memory_space<vmem>>, vector<1x128xf32>
    tpu.vector_store %arg14[%c3_193, %c0_194], %117 {strides = array<i32>} : memref<16x512xf32, #tpu.memory_space<vmem>>, vector<1x128xf32>,
    %119 = vector.extract_strided_slice %104 {offsets = [7, 0], sizes = [1, 128], strides = [1, 1]} : vector<64x128xf32> to vector<1x128xf32>
    %c3_195 = arith.constant 3 : index
    %c128_196 = arith.constant 128 : index
    %120 = vector.load %arg14[%c3_195, %c128_196] : memref<16x512xf32, #tpu.memory_space<vmem>>, vector<1x128xf32>
    tpu.vector_store %arg14[%c3_195, %c128_196], %119 {strides = array<i32>} : memref<16x512xf32, #tpu.memory_space<vmem>>, vector<1x128xf32>,
    %121 = vector.extract_strided_slice %104 {offsets = [8, 0], sizes = [1, 128], strides = [1, 1]} : vector<64x128xf32> to vector<1x128xf32>
    %c0_197 = arith.constant 0 : index
    %c256_198 = arith.constant 256 : index
    %122 = vector.load %arg14[%c0_197, %c256_198] : memref<16x512xf32, #tpu.memory_space<vmem>>, vector<1x128xf32>
    tpu.vector_store %arg14[%c0_197, %c256_198], %121 {strides = array<i32>} : memref<16x512xf32, #tpu.memory_space<vmem>>, vector<1x128xf32>,
    %123 = vector.extract_strided_slice %104 {offsets = [9, 0], sizes = [1, 128], strides = [1, 1]} : vector<64x128xf32> to vector<1x128xf32>
    %c0_199 = arith.constant 0 : index
    %c384_200 = arith.constant 384 : index
    %124 = vector.load %arg14[%c0_199, %c384_200] : memref<16x512xf32, #tpu.memory_space<vmem>>, vector<1x128xf32>
    tpu.vector_store %arg14[%c0_199, %c384_200], %123 {strides = array<i32>} : memref<16x512xf32, #tpu.memory_space<vmem>>, vector<1x128xf32>,
    %125 = vector.extract_strided_slice %104 {offsets = [10, 0], sizes = [1, 128], strides = [1, 1]} : vector<64x128xf32> to vector<1x128xf32>
    %c1_201 = arith.constant 1 : index
    %c256_202 = arith.constant 256 : index
    %126 = vector.load %arg14[%c1_201, %c256_202] : memref<16x512xf32, #tpu.memory_space<vmem>>, vector<1x128xf32>
    tpu.vector_store %arg14[%c1_201, %c256_202], %125 {strides = array<i32>} : memref<16x512xf32, #tpu.memory_space<vmem>>, vector<1x128xf32>,
    %127 = vector.extract_strided_slice %104 {offsets = [11, 0], sizes = [1, 128], strides = [1, 1]} : vector<64x128xf32> to vector<1x128xf32>
    %c1_203 = arith.constant 1 : index
    %c384_204 = arith.constant 384 : index
    %128 = vector.load %arg14[%c1_203, %c384_204] : memref<16x512xf32, #tpu.memory_space<vmem>>, vector<1x128xf32>
    tpu.vector_store %arg14[%c1_203, %c384_204], %127 {strides = array<i32>} : memref<16x512xf32, #tpu.memory_space<vmem>>, vector<1x128xf32>,
    %129 = vector.extract_strided_slice %104 {offsets = [12, 0], sizes = [1, 128], strides = [1, 1]} : vector<64x128xf32> to vector<1x128xf32>
    %c2_205 = arith.constant 2 : index
    %c256_206 = arith.constant 256 : index
    %130 = vector.load %arg14[%c2_205, %c256_206] : memref<16x512xf32, #tpu.memory_space<vmem>>, vector<1x128xf32>
    tpu.vector_store %arg14[%c2_205, %c256_206], %129 {strides = array<i32>} : memref<16x512xf32, #tpu.memory_space<vmem>>, vector<1x128xf32>,
    %131 = vector.extract_strided_slice %104 {offsets = [13, 0], sizes = [1, 128], strides = [1, 1]} : vector<64x128xf32> to vector<1x128xf32>
    %c2_207 = arith.constant 2 : index
    %c384_208 = arith.constant 384 : index
    %132 = vector.load %arg14[%c2_207, %c384_208] : memref<16x512xf32, #tpu.memory_space<vmem>>, vector<1x128xf32>
    tpu.vector_store %arg14[%c2_207, %c384_208], %131 {strides = array<i32>} : memref<16x512xf32, #tpu.memory_space<vmem>>, vector<1x128xf32>,
    %133 = vector.extract_strided_slice %104 {offsets = [14, 0], sizes = [1, 128], strides = [1, 1]} : vector<64x128xf32> to vector<1x128xf32>
    %c3_209 = arith.constant 3 : index
    %c256_210 = arith.constant 256 : index
    %134 = vector.load %arg14[%c3_209, %c256_210] : memref<16x512xf32, #tpu.memory_space<vmem>>, vector<1x128xf32>
    tpu.vector_store %arg14[%c3_209, %c256_210], %133 {strides = array<i32>} : memref<16x512xf32, #tpu.memory_space<vmem>>, vector<1x128xf32>,
    %135 = vector.extract_strided_slice %104 {offsets = [15, 0], sizes = [1, 128], strides = [1, 1]} : vector<64x128xf32> to vector<1x128xf32>
    %c3_211 = arith.constant 3 : index
    %c384_212 = arith.constant 384 : index
    %136 = vector.load %arg14[%c3_211, %c384_212] : memref<16x512xf32, #tpu.memory_space<vmem>>, vector<1x128xf32>
    tpu.vector_store %arg14[%c3_211, %c384_212], %135 {strides = array<i32>} : memref<16x512xf32, #tpu.memory_space<vmem>>, vector<1x128xf32>,
    %137 = vector.extract_strided_slice %104 {offsets = [16, 0], sizes = [1, 128], strides = [1, 1]} : vector<64x128xf32> to vector<1x128xf32>
    %c4_213 = arith.constant 4 : index
    %c0_214 = arith.constant 0 : index
    %138 = vector.load %arg14[%c4_213, %c0_214] : memref<16x512xf32, #tpu.memory_space<vmem>>, vector<1x128xf32>
    tpu.vector_store %arg14[%c4_213, %c0_214], %137 {strides = array<i32>} : memref<16x512xf32, #tpu.memory_space<vmem>>, vector<1x128xf32>,
    %139 = vector.extract_strided_slice %104 {offsets = [17, 0], sizes = [1, 128], strides = [1, 1]} : vector<64x128xf32> to vector<1x128xf32>
    %c4_215 = arith.constant 4 : index
    %c128_216 = arith.constant 128 : index
    %140 = vector.load %arg14[%c4_215, %c128_216] : memref<16x512xf32, #tpu.memory_space<vmem>>, vector<1x128xf32>
    tpu.vector_store %arg14[%c4_215, %c128_216], %139 {strides = array<i32>} : memref<16x512xf32, #tpu.memory_space<vmem>>, vector<1x128xf32>,
    %141 = vector.extract_strided_slice %104 {offsets = [18, 0], sizes = [1, 128], strides = [1, 1]} : vector<64x128xf32> to vector<1x128xf32>
    %c5_217 = arith.constant 5 : index
    %c0_218 = arith.constant 0 : index
    %142 = vector.load %arg14[%c5_217, %c0_218] : memref<16x512xf32, #tpu.memory_space<vmem>>, vector<1x128xf32>
    tpu.vector_store %arg14[%c5_217, %c0_218], %141 {strides = array<i32>} : memref<16x512xf32, #tpu.memory_space<vmem>>, vector<1x128xf32>,
    %143 = vector.extract_strided_slice %104 {offsets = [19, 0], sizes = [1, 128], strides = [1, 1]} : vector<64x128xf32> to vector<1x128xf32>
    %c5_219 = arith.constant 5 : index
    %c128_220 = arith.constant 128 : index
    %144 = vector.load %arg14[%c5_219, %c128_220] : memref<16x512xf32, #tpu.memory_space<vmem>>, vector<1x128xf32>
    tpu.vector_store %arg14[%c5_219, %c128_220], %143 {strides = array<i32>} : memref<16x512xf32, #tpu.memory_space<vmem>>, vector<1x128xf32>,
    %145 = vector.extract_strided_slice %104 {offsets = [20, 0], sizes = [1, 128], strides = [1, 1]} : vector<64x128xf32> to vector<1x128xf32>
    %c6_221 = arith.constant 6 : index
    %c0_222 = arith.constant 0 : index
    %146 = vector.load %arg14[%c6_221, %c0_222] : memref<16x512xf32, #tpu.memory_space<vmem>>, vector<1x128xf32>
    tpu.vector_store %arg14[%c6_221, %c0_222], %145 {strides = array<i32>} : memref<16x512xf32, #tpu.memory_space<vmem>>, vector<1x128xf32>,
    %147 = vector.extract_strided_slice %104 {offsets = [21, 0], sizes = [1, 128], strides = [1, 1]} : vector<64x128xf32> to vector<1x128xf32>
    %c6_223 = arith.constant 6 : index
    %c128_224 = arith.constant 128 : index
    %148 = vector.load %arg14[%c6_223, %c128_224] : memref<16x512xf32, #tpu.memory_space<vmem>>, vector<1x128xf32>
    tpu.vector_store %arg14[%c6_223, %c128_224], %147 {strides = array<i32>} : memref<16x512xf32, #tpu.memory_space<vmem>>, vector<1x128xf32>,
    %149 = vector.extract_strided_slice %104 {offsets = [22, 0], sizes = [1, 128], strides = [1, 1]} : vector<64x128xf32> to vector<1x128xf32>
    %c7_225 = arith.constant 7 : index
    %c0_226 = arith.constant 0 : index
    %150 = vector.load %arg14[%c7_225, %c0_226] : memref<16x512xf32, #tpu.memory_space<vmem>>, vector<1x128xf32>
    tpu.vector_store %arg14[%c7_225, %c0_226], %149 {strides = array<i32>} : memref<16x512xf32, #tpu.memory_space<vmem>>, vector<1x128xf32>,
    %151 = vector.extract_strided_slice %104 {offsets = [23, 0], sizes = [1, 128], strides = [1, 1]} : vector<64x128xf32> to vector<1x128xf32>
    %c7_227 = arith.constant 7 : index
    %c128_228 = arith.constant 128 : index
    %152 = vector.load %arg14[%c7_227, %c128_228] : memref<16x512xf32, #tpu.memory_space<vmem>>, vector<1x128xf32>
    tpu.vector_store %arg14[%c7_227, %c128_228], %151 {strides = array<i32>} : memref<16x512xf32, #tpu.memory_space<vmem>>, vector<1x128xf32>,
    %153 = vector.extract_strided_slice %104 {offsets = [24, 0], sizes = [1, 128], strides = [1, 1]} : vector<64x128xf32> to vector<1x128xf32>
    %c4_229 = arith.constant 4 : index
    %c256_230 = arith.constant 256 : index
    %154 = vector.load %arg14[%c4_229, %c256_230] : memref<16x512xf32, #tpu.memory_space<vmem>>, vector<1x128xf32>
    tpu.vector_store %arg14[%c4_229, %c256_230], %153 {strides = array<i32>} : memref<16x512xf32, #tpu.memory_space<vmem>>, vector<1x128xf32>,
    %155 = vector.extract_strided_slice %104 {offsets = [25, 0], sizes = [1, 128], strides = [1, 1]} : vector<64x128xf32> to vector<1x128xf32>
    %c4_231 = arith.constant 4 : index
    %c384_232 = arith.constant 384 : index
    %156 = vector.load %arg14[%c4_231, %c384_232] : memref<16x512xf32, #tpu.memory_space<vmem>>, vector<1x128xf32>
    tpu.vector_store %arg14[%c4_231, %c384_232], %155 {strides = array<i32>} : memref<16x512xf32, #tpu.memory_space<vmem>>, vector<1x128xf32>,
    %157 = vector.extract_strided_slice %104 {offsets = [26, 0], sizes = [1, 128], strides = [1, 1]} : vector<64x128xf32> to vector<1x128xf32>
    %c5_233 = arith.constant 5 : index
    %c256_234 = arith.constant 256 : index
    %158 = vector.load %arg14[%c5_233, %c256_234] : memref<16x512xf32, #tpu.memory_space<vmem>>, vector<1x128xf32>
    tpu.vector_store %arg14[%c5_233, %c256_234], %157 {strides = array<i32>} : memref<16x512xf32, #tpu.memory_space<vmem>>, vector<1x128xf32>,
    %159 = vector.extract_strided_slice %104 {offsets = [27, 0], sizes = [1, 128], strides = [1, 1]} : vector<64x128xf32> to vector<1x128xf32>
    %c5_235 = arith.constant 5 : index
    %c384_236 = arith.constant 384 : index
    %160 = vector.load %arg14[%c5_235, %c384_236] : memref<16x512xf32, #tpu.memory_space<vmem>>, vector<1x128xf32>
    tpu.vector_store %arg14[%c5_235, %c384_236], %159 {strides = array<i32>} : memref<16x512xf32, #tpu.memory_space<vmem>>, vector<1x128xf32>,
    %161 = vector.extract_strided_slice %104 {offsets = [28, 0], sizes = [1, 128], strides = [1, 1]} : vector<64x128xf32> to vector<1x128xf32>
    %c6_237 = arith.constant 6 : index
    %c256_238 = arith.constant 256 : index
    %162 = vector.load %arg14[%c6_237, %c256_238] : memref<16x512xf32, #tpu.memory_space<vmem>>, vector<1x128xf32>
    tpu.vector_store %arg14[%c6_237, %c256_238], %161 {strides = array<i32>} : memref<16x512xf32, #tpu.memory_space<vmem>>, vector<1x128xf32>,
    %163 = vector.extract_strided_slice %104 {offsets = [29, 0], sizes = [1, 128], strides = [1, 1]} : vector<64x128xf32> to vector<1x128xf32>
    %c6_239 = arith.constant 6 : index
    %c384_240 = arith.constant 384 : index
    %164 = vector.load %arg14[%c6_239, %c384_240] : memref<16x512xf32, #tpu.memory_space<vmem>>, vector<1x128xf32>
    tpu.vector_store %arg14[%c6_239, %c384_240], %163 {strides = array<i32>} : memref<16x512xf32, #tpu.memory_space<vmem>>, vector<1x128xf32>,
    %165 = vector.extract_strided_slice %104 {offsets = [30, 0], sizes = [1, 128], strides = [1, 1]} : vector<64x128xf32> to vector<1x128xf32>
    %c7_241 = arith.constant 7 : index
    %c256_242 = arith.constant 256 : index
    %166 = vector.load %arg14[%c7_241, %c256_242] : memref<16x512xf32, #tpu.memory_space<vmem>>, vector<1x128xf32>
    tpu.vector_store %arg14[%c7_241, %c256_242], %165 {strides = array<i32>} : memref<16x512xf32, #tpu.memory_space<vmem>>, vector<1x128xf32>,
    %167 = vector.extract_strided_slice %104 {offsets = [31, 0], sizes = [1, 128], strides = [1, 1]} : vector<64x128xf32> to vector<1x128xf32>
    %c7_243 = arith.constant 7 : index
    %c384_244 = arith.constant 384 : index
    %168 = vector.load %arg14[%c7_243, %c384_244] : memref<16x512xf32, #tpu.memory_space<vmem>>, vector<1x128xf32>
    tpu.vector_store %arg14[%c7_243, %c384_244], %167 {strides = array<i32>} : memref<16x512xf32, #tpu.memory_space<vmem>>, vector<1x128xf32>,
    %169 = vector.extract_strided_slice %104 {offsets = [32, 0], sizes = [1, 128], strides = [1, 1]} : vector<64x128xf32> to vector<1x128xf32>
    %c8_245 = arith.constant 8 : index
    %c0_246 = arith.constant 0 : index
    %170 = vector.load %arg14[%c8_245, %c0_246] : memref<16x512xf32, #tpu.memory_space<vmem>>, vector<1x128xf32>
    tpu.vector_store %arg14[%c8_245, %c0_246], %169 {strides = array<i32>} : memref<16x512xf32, #tpu.memory_space<vmem>>, vector<1x128xf32>,
    %171 = vector.extract_strided_slice %104 {offsets = [33, 0], sizes = [1, 128], strides = [1, 1]} : vector<64x128xf32> to vector<1x128xf32>
    %c8_247 = arith.constant 8 : index
    %c128_248 = arith.constant 128 : index
    %172 = vector.load %arg14[%c8_247, %c128_248] : memref<16x512xf32, #tpu.memory_space<vmem>>, vector<1x128xf32>
    tpu.vector_store %arg14[%c8_247, %c128_248], %171 {strides = array<i32>} : memref<16x512xf32, #tpu.memory_space<vmem>>, vector<1x128xf32>,
    %173 = vector.extract_strided_slice %104 {offsets = [34, 0], sizes = [1, 128], strides = [1, 1]} : vector<64x128xf32> to vector<1x128xf32>
    %c9 = arith.constant 9 : index
    %c0_249 = arith.constant 0 : index
    %174 = vector.load %arg14[%c9, %c0_249] : memref<16x512xf32, #tpu.memory_space<vmem>>, vector<1x128xf32>
    tpu.vector_store %arg14[%c9, %c0_249], %173 {strides = array<i32>} : memref<16x512xf32, #tpu.memory_space<vmem>>, vector<1x128xf32>,
    %175 = vector.extract_strided_slice %104 {offsets = [35, 0], sizes = [1, 128], strides = [1, 1]} : vector<64x128xf32> to vector<1x128xf32>
    %c9_250 = arith.constant 9 : index
    %c128_251 = arith.constant 128 : index
    %176 = vector.load %arg14[%c9_250, %c128_251] : memref<16x512xf32, #tpu.memory_space<vmem>>, vector<1x128xf32>
    tpu.vector_store %arg14[%c9_250, %c128_251], %175 {strides = array<i32>} : memref<16x512xf32, #tpu.memory_space<vmem>>, vector<1x128xf32>,
    %177 = vector.extract_strided_slice %104 {offsets = [36, 0], sizes = [1, 128], strides = [1, 1]} : vector<64x128xf32> to vector<1x128xf32>
    %c10 = arith.constant 10 : index
    %c0_252 = arith.constant 0 : index
    %178 = vector.load %arg14[%c10, %c0_252] : memref<16x512xf32, #tpu.memory_space<vmem>>, vector<1x128xf32>
    tpu.vector_store %arg14[%c10, %c0_252], %177 {strides = array<i32>} : memref<16x512xf32, #tpu.memory_space<vmem>>, vector<1x128xf32>,
    %179 = vector.extract_strided_slice %104 {offsets = [37, 0], sizes = [1, 128], strides = [1, 1]} : vector<64x128xf32> to vector<1x128xf32>
    %c10_253 = arith.constant 10 : index
    %c128_254 = arith.constant 128 : index
    %180 = vector.load %arg14[%c10_253, %c128_254] : memref<16x512xf32, #tpu.memory_space<vmem>>, vector<1x128xf32>
    tpu.vector_store %arg14[%c10_253, %c128_254], %179 {strides = array<i32>} : memref<16x512xf32, #tpu.memory_space<vmem>>, vector<1x128xf32>,
    %181 = vector.extract_strided_slice %104 {offsets = [38, 0], sizes = [1, 128], strides = [1, 1]} : vector<64x128xf32> to vector<1x128xf32>
    %c11 = arith.constant 11 : index
    %c0_255 = arith.constant 0 : index
    %182 = vector.load %arg14[%c11, %c0_255] : memref<16x512xf32, #tpu.memory_space<vmem>>, vector<1x128xf32>
    tpu.vector_store %arg14[%c11, %c0_255], %181 {strides = array<i32>} : memref<16x512xf32, #tpu.memory_space<vmem>>, vector<1x128xf32>,
    %183 = vector.extract_strided_slice %104 {offsets = [39, 0], sizes = [1, 128], strides = [1, 1]} : vector<64x128xf32> to vector<1x128xf32>
    %c11_256 = arith.constant 11 : index
    %c128_257 = arith.constant 128 : index
    %184 = vector.load %arg14[%c11_256, %c128_257] : memref<16x512xf32, #tpu.memory_space<vmem>>, vector<1x128xf32>
    tpu.vector_store %arg14[%c11_256, %c128_257], %183 {strides = array<i32>} : memref<16x512xf32, #tpu.memory_space<vmem>>, vector<1x128xf32>,
    %185 = vector.extract_strided_slice %104 {offsets = [40, 0], sizes = [1, 128], strides = [1, 1]} : vector<64x128xf32> to vector<1x128xf32>
    %c8_258 = arith.constant 8 : index
    %c256_259 = arith.constant 256 : index
    %186 = vector.load %arg14[%c8_258, %c256_259] : memref<16x512xf32, #tpu.memory_space<vmem>>, vector<1x128xf32>
    tpu.vector_store %arg14[%c8_258, %c256_259], %185 {strides = array<i32>} : memref<16x512xf32, #tpu.memory_space<vmem>>, vector<1x128xf32>,
    %187 = vector.extract_strided_slice %104 {offsets = [41, 0], sizes = [1, 128], strides = [1, 1]} : vector<64x128xf32> to vector<1x128xf32>
    %c8_260 = arith.constant 8 : index
    %c384_261 = arith.constant 384 : index
    %188 = vector.load %arg14[%c8_260, %c384_261] : memref<16x512xf32, #tpu.memory_space<vmem>>, vector<1x128xf32>
    tpu.vector_store %arg14[%c8_260, %c384_261], %187 {strides = array<i32>} : memref<16x512xf32, #tpu.memory_space<vmem>>, vector<1x128xf32>,
    %189 = vector.extract_strided_slice %104 {offsets = [42, 0], sizes = [1, 128], strides = [1, 1]} : vector<64x128xf32> to vector<1x128xf32>
    %c9_262 = arith.constant 9 : index
    %c256_263 = arith.constant 256 : index
    %190 = vector.load %arg14[%c9_262, %c256_263] : memref<16x512xf32, #tpu.memory_space<vmem>>, vector<1x128xf32>
    tpu.vector_store %arg14[%c9_262, %c256_263], %189 {strides = array<i32>} : memref<16x512xf32, #tpu.memory_space<vmem>>, vector<1x128xf32>,
    %191 = vector.extract_strided_slice %104 {offsets = [43, 0], sizes = [1, 128], strides = [1, 1]} : vector<64x128xf32> to vector<1x128xf32>
    %c9_264 = arith.constant 9 : index
    %c384_265 = arith.constant 384 : index
    %192 = vector.load %arg14[%c9_264, %c384_265] : memref<16x512xf32, #tpu.memory_space<vmem>>, vector<1x128xf32>
    tpu.vector_store %arg14[%c9_264, %c384_265], %191 {strides = array<i32>} : memref<16x512xf32, #tpu.memory_space<vmem>>, vector<1x128xf32>,
    %193 = vector.extract_strided_slice %104 {offsets = [44, 0], sizes = [1, 128], strides = [1, 1]} : vector<64x128xf32> to vector<1x128xf32>
    %c10_266 = arith.constant 10 : index
    %c256_267 = arith.constant 256 : index
    %194 = vector.load %arg14[%c10_266, %c256_267] : memref<16x512xf32, #tpu.memory_space<vmem>>, vector<1x128xf32>
    tpu.vector_store %arg14[%c10_266, %c256_267], %193 {strides = array<i32>} : memref<16x512xf32, #tpu.memory_space<vmem>>, vector<1x128xf32>,
    %195 = vector.extract_strided_slice %104 {offsets = [45, 0], sizes = [1, 128], strides = [1, 1]} : vector<64x128xf32> to vector<1x128xf32>
    %c10_268 = arith.constant 10 : index
    %c384_269 = arith.constant 384 : index
    %196 = vector.load %arg14[%c10_268, %c384_269] : memref<16x512xf32, #tpu.memory_space<vmem>>, vector<1x128xf32>
    tpu.vector_store %arg14[%c10_268, %c384_269], %195 {strides = array<i32>} : memref<16x512xf32, #tpu.memory_space<vmem>>, vector<1x128xf32>,
    %197 = vector.extract_strided_slice %104 {offsets = [46, 0], sizes = [1, 128], strides = [1, 1]} : vector<64x128xf32> to vector<1x128xf32>
    %c11_270 = arith.constant 11 : index
    %c256_271 = arith.constant 256 : index
    %198 = vector.load %arg14[%c11_270, %c256_271] : memref<16x512xf32, #tpu.memory_space<vmem>>, vector<1x128xf32>
    tpu.vector_store %arg14[%c11_270, %c256_271], %197 {strides = array<i32>} : memref<16x512xf32, #tpu.memory_space<vmem>>, vector<1x128xf32>,
    %199 = vector.extract_strided_slice %104 {offsets = [47, 0], sizes = [1, 128], strides = [1, 1]} : vector<64x128xf32> to vector<1x128xf32>
    %c11_272 = arith.constant 11 : index
    %c384_273 = arith.constant 384 : index
    %200 = vector.load %arg14[%c11_272, %c384_273] : memref<16x512xf32, #tpu.memory_space<vmem>>, vector<1x128xf32>
    tpu.vector_store %arg14[%c11_272, %c384_273], %199 {strides = array<i32>} : memref<16x512xf32, #tpu.memory_space<vmem>>, vector<1x128xf32>,
    %201 = vector.extract_strided_slice %104 {offsets = [48, 0], sizes = [1, 128], strides = [1, 1]} : vector<64x128xf32> to vector<1x128xf32>
    %c12 = arith.constant 12 : index
    %c0_274 = arith.constant 0 : index
    %202 = vector.load %arg14[%c12, %c0_274] : memref<16x512xf32, #tpu.memory_space<vmem>>, vector<1x128xf32>
    tpu.vector_store %arg14[%c12, %c0_274], %201 {strides = array<i32>} : memref<16x512xf32, #tpu.memory_space<vmem>>, vector<1x128xf32>,
    %203 = vector.extract_strided_slice %104 {offsets = [49, 0], sizes = [1, 128], strides = [1, 1]} : vector<64x128xf32> to vector<1x128xf32>
    %c12_275 = arith.constant 12 : index
    %c128_276 = arith.constant 128 : index
    %204 = vector.load %arg14[%c12_275, %c128_276] : memref<16x512xf32, #tpu.memory_space<vmem>>, vector<1x128xf32>
    tpu.vector_store %arg14[%c12_275, %c128_276], %203 {strides = array<i32>} : memref<16x512xf32, #tpu.memory_space<vmem>>, vector<1x128xf32>,
    %205 = vector.extract_strided_slice %104 {offsets = [50, 0], sizes = [1, 128], strides = [1, 1]} : vector<64x128xf32> to vector<1x128xf32>
    %c13 = arith.constant 13 : index
    %c0_277 = arith.constant 0 : index
    %206 = vector.load %arg14[%c13, %c0_277] : memref<16x512xf32, #tpu.memory_space<vmem>>, vector<1x128xf32>
    tpu.vector_store %arg14[%c13, %c0_277], %205 {strides = array<i32>} : memref<16x512xf32, #tpu.memory_space<vmem>>, vector<1x128xf32>,
    %207 = vector.extract_strided_slice %104 {offsets = [51, 0], sizes = [1, 128], strides = [1, 1]} : vector<64x128xf32> to vector<1x128xf32>
    %c13_278 = arith.constant 13 : index
    %c128_279 = arith.constant 128 : index
    %208 = vector.load %arg14[%c13_278, %c128_279] : memref<16x512xf32, #tpu.memory_space<vmem>>, vector<1x128xf32>
    tpu.vector_store %arg14[%c13_278, %c128_279], %207 {strides = array<i32>} : memref<16x512xf32, #tpu.memory_space<vmem>>, vector<1x128xf32>,
    %209 = vector.extract_strided_slice %104 {offsets = [52, 0], sizes = [1, 128], strides = [1, 1]} : vector<64x128xf32> to vector<1x128xf32>
    %c14 = arith.constant 14 : index
    %c0_280 = arith.constant 0 : index
    %210 = vector.load %arg14[%c14, %c0_280] : memref<16x512xf32, #tpu.memory_space<vmem>>, vector<1x128xf32>
    tpu.vector_store %arg14[%c14, %c0_280], %209 {strides = array<i32>} : memref<16x512xf32, #tpu.memory_space<vmem>>, vector<1x128xf32>,
    %211 = vector.extract_strided_slice %104 {offsets = [53, 0], sizes = [1, 128], strides = [1, 1]} : vector<64x128xf32> to vector<1x128xf32>
    %c14_281 = arith.constant 14 : index
    %c128_282 = arith.constant 128 : index
    %212 = vector.load %arg14[%c14_281, %c128_282] : memref<16x512xf32, #tpu.memory_space<vmem>>, vector<1x128xf32>
    tpu.vector_store %arg14[%c14_281, %c128_282], %211 {strides = array<i32>} : memref<16x512xf32, #tpu.memory_space<vmem>>, vector<1x128xf32>,
    %213 = vector.extract_strided_slice %104 {offsets = [54, 0], sizes = [1, 128], strides = [1, 1]} : vector<64x128xf32> to vector<1x128xf32>
    %c15 = arith.constant 15 : index
    %c0_283 = arith.constant 0 : index
    %214 = vector.load %arg14[%c15, %c0_283] : memref<16x512xf32, #tpu.memory_space<vmem>>, vector<1x128xf32>
    tpu.vector_store %arg14[%c15, %c0_283], %213 {strides = array<i32>} : memref<16x512xf32, #tpu.memory_space<vmem>>, vector<1x128xf32>,
    %215 = vector.extract_strided_slice %104 {offsets = [55, 0], sizes = [1, 128], strides = [1, 1]} : vector<64x128xf32> to vector<1x128xf32>
    %c15_284 = arith.constant 15 : index
    %c128_285 = arith.constant 128 : index
    %216 = vector.load %arg14[%c15_284, %c128_285] : memref<16x512xf32, #tpu.memory_space<vmem>>, vector<1x128xf32>
    tpu.vector_store %arg14[%c15_284, %c128_285], %215 {strides = array<i32>} : memref<16x512xf32, #tpu.memory_space<vmem>>, vector<1x128xf32>,
    %217 = vector.extract_strided_slice %104 {offsets = [56, 0], sizes = [1, 128], strides = [1, 1]} : vector<64x128xf32> to vector<1x128xf32>
    %c12_286 = arith.constant 12 : index
    %c256_287 = arith.constant 256 : index
    %218 = vector.load %arg14[%c12_286, %c256_287] : memref<16x512xf32, #tpu.memory_space<vmem>>, vector<1x128xf32>
    tpu.vector_store %arg14[%c12_286, %c256_287], %217 {strides = array<i32>} : memref<16x512xf32, #tpu.memory_space<vmem>>, vector<1x128xf32>,
    %219 = vector.extract_strided_slice %104 {offsets = [57, 0], sizes = [1, 128], strides = [1, 1]} : vector<64x128xf32> to vector<1x128xf32>
    %c12_288 = arith.constant 12 : index
    %c384_289 = arith.constant 384 : index
    %220 = vector.load %arg14[%c12_288, %c384_289] : memref<16x512xf32, #tpu.memory_space<vmem>>, vector<1x128xf32>
    tpu.vector_store %arg14[%c12_288, %c384_289], %219 {strides = array<i32>} : memref<16x512xf32, #tpu.memory_space<vmem>>, vector<1x128xf32>,
    %221 = vector.extract_strided_slice %104 {offsets = [58, 0], sizes = [1, 128], strides = [1, 1]} : vector<64x128xf32> to vector<1x128xf32>
    %c13_290 = arith.constant 13 : index
    %c256_291 = arith.constant 256 : index
    %222 = vector.load %arg14[%c13_290, %c256_291] : memref<16x512xf32, #tpu.memory_space<vmem>>, vector<1x128xf32>
    tpu.vector_store %arg14[%c13_290, %c256_291], %221 {strides = array<i32>} : memref<16x512xf32, #tpu.memory_space<vmem>>, vector<1x128xf32>,
    %223 = vector.extract_strided_slice %104 {offsets = [59, 0], sizes = [1, 128], strides = [1, 1]} : vector<64x128xf32> to vector<1x128xf32>
    %c13_292 = arith.constant 13 : index
    %c384_293 = arith.constant 384 : index
    %224 = vector.load %arg14[%c13_292, %c384_293] : memref<16x512xf32, #tpu.memory_space<vmem>>, vector<1x128xf32>
    tpu.vector_store %arg14[%c13_292, %c384_293], %223 {strides = array<i32>} : memref<16x512xf32, #tpu.memory_space<vmem>>, vector<1x128xf32>,
    %225 = vector.extract_strided_slice %104 {offsets = [60, 0], sizes = [1, 128], strides = [1, 1]} : vector<64x128xf32> to vector<1x128xf32>
    %c14_294 = arith.constant 14 : index
    %c256_295 = arith.constant 256 : index
    %226 = vector.load %arg14[%c14_294, %c256_295] : memref<16x512xf32, #tpu.memory_space<vmem>>, vector<1x128xf32>
    tpu.vector_store %arg14[%c14_294, %c256_295], %225 {strides = array<i32>} : memref<16x512xf32, #tpu.memory_space<vmem>>, vector<1x128xf32>,
    %227 = vector.extract_strided_slice %104 {offsets = [61, 0], sizes = [1, 128], strides = [1, 1]} : vector<64x128xf32> to vector<1x128xf32>
    %c14_296 = arith.constant 14 : index
    %c384_297 = arith.constant 384 : index
    %228 = vector.load %arg14[%c14_296, %c384_297] : memref<16x512xf32, #tpu.memory_space<vmem>>, vector<1x128xf32>
    tpu.vector_store %arg14[%c14_296, %c384_297], %227 {strides = array<i32>} : memref<16x512xf32, #tpu.memory_space<vmem>>, vector<1x128xf32>,
    %229 = vector.extract_strided_slice %104 {offsets = [62, 0], sizes = [1, 128], strides = [1, 1]} : vector<64x128xf32> to vector<1x128xf32>
    %c15_298 = arith.constant 15 : index
    %c256_299 = arith.constant 256 : index
    %230 = vector.load %arg14[%c15_298, %c256_299] : memref<16x512xf32, #tpu.memory_space<vmem>>, vector<1x128xf32>
    tpu.vector_store %arg14[%c15_298, %c256_299], %229 {strides = array<i32>} : memref<16x512xf32, #tpu.memory_space<vmem>>, vector<1x128xf32>,
    %231 = vector.extract_strided_slice %104 {offsets = [63, 0], sizes = [1, 128], strides = [1, 1]} : vector<64x128xf32> to vector<1x128xf32>
    %c15_300 = arith.constant 15 : index
    %c384_301 = arith.constant 384 : index
    %232 = vector.load %arg14[%c15_300, %c384_301] : memref<16x512xf32, #tpu.memory_space<vmem>>, vector<1x128xf32>
    tpu.vector_store %arg14[%c15_300, %c384_301], %231 {strides = array<i32>} : memref<16x512xf32, #tpu.memory_space<vmem>>, vector<1x128xf32>,
    %c0_302 = arith.constant 0 : index
    %c0_303 = arith.constant 0 : index
    %233 = vector.load %arg14[%c0_302, %c0_303] : memref<16x512xf32, #tpu.memory_space<vmem>>, vector<3x512xf32>
    %c0_304 = arith.constant 0 : index
    %c0_305 = arith.constant 0 : index
    %234 = vector.load %arg15[%c0_304, %c0_305] : memref<9x2048xf32, #tpu.memory_space<vmem>>, vector<3x512xf32>
    tpu.vector_store %arg15[%c0_304, %c0_305], %233 {strides = array<i32>} : memref<9x2048xf32, #tpu.memory_space<vmem>>, vector<3x512xf32>,
    %c4_306 = arith.constant 4 : index
    %c0_307 = arith.constant 0 : index
    %235 = vector.load %arg14[%c4_306, %c0_307] : memref<16x512xf32, #tpu.memory_space<vmem>>, vector<3x512xf32>
    %c3_308 = arith.constant 3 : index
    %c0_309 = arith.constant 0 : index
    %236 = vector.load %arg15[%c3_308, %c0_309] : memref<9x2048xf32, #tpu.memory_space<vmem>>, vector<3x512xf32>
    tpu.vector_store %arg15[%c3_308, %c0_309], %235 {strides = array<i32>} : memref<9x2048xf32, #tpu.memory_space<vmem>>, vector<3x512xf32>,
    %c8_310 = arith.constant 8 : index
    %c0_311 = arith.constant 0 : index
    %237 = vector.load %arg14[%c8_310, %c0_311] : memref<16x512xf32, #tpu.memory_space<vmem>>, vector<3x512xf32>
    %c6_312 = arith.constant 6 : index
    %c0_313 = arith.constant 0 : index
    %238 = vector.load %arg15[%c6_312, %c0_313] : memref<9x2048xf32, #tpu.memory_space<vmem>>, vector<3x512xf32>
    tpu.vector_store %arg15[%c6_312, %c0_313], %237 {strides = array<i32>} : memref<9x2048xf32, #tpu.memory_space<vmem>>, vector<3x512xf32>,
    %c1_314 = arith.constant 1 : index
    %c0_315 = arith.constant 0 : index
    %239 = vector.load %arg14[%c1_314, %c0_315] : memref<16x512xf32, #tpu.memory_space<vmem>>, vector<3x512xf32>
    %c0_316 = arith.constant 0 : index
    %c512 = arith.constant 512 : index
    %240 = vector.load %arg15[%c0_316, %c512] : memref<9x2048xf32, #tpu.memory_space<vmem>>, vector<3x512xf32>
    tpu.vector_store %arg15[%c0_316, %c512], %239 {strides = array<i32>} : memref<9x2048xf32, #tpu.memory_space<vmem>>, vector<3x512xf32>,
    %c5_317 = arith.constant 5 : index
    %c0_318 = arith.constant 0 : index
    %241 = vector.load %arg14[%c5_317, %c0_318] : memref<16x512xf32, #tpu.memory_space<vmem>>, vector<3x512xf32>
    %c3_319 = arith.constant 3 : index
    %c512_320 = arith.constant 512 : index
    %242 = vector.load %arg15[%c3_319, %c512_320] : memref<9x2048xf32, #tpu.memory_space<vmem>>, vector<3x512xf32>
    tpu.vector_store %arg15[%c3_319, %c512_320], %241 {strides = array<i32>} : memref<9x2048xf32, #tpu.memory_space<vmem>>, vector<3x512xf32>,
    %c9_321 = arith.constant 9 : index
    %c0_322 = arith.constant 0 : index
    %243 = vector.load %arg14[%c9_321, %c0_322] : memref<16x512xf32, #tpu.memory_space<vmem>>, vector<3x512xf32>
    %c6_323 = arith.constant 6 : index
    %c512_324 = arith.constant 512 : index
    %244 = vector.load %arg15[%c6_323, %c512_324] : memref<9x2048xf32, #tpu.memory_space<vmem>>, vector<3x512xf32>
    tpu.vector_store %arg15[%c6_323, %c512_324], %243 {strides = array<i32>} : memref<9x2048xf32, #tpu.memory_space<vmem>>, vector<3x512xf32>,
    %c4_325 = arith.constant 4 : index
    %c0_326 = arith.constant 0 : index
    %245 = vector.load %arg14[%c4_325, %c0_326] : memref<16x512xf32, #tpu.memory_space<vmem>>, vector<3x512xf32>
    %c0_327 = arith.constant 0 : index
    %c1024 = arith.constant 1024 : index
    %246 = vector.load %arg15[%c0_327, %c1024] : memref<9x2048xf32, #tpu.memory_space<vmem>>, vector<3x512xf32>
    tpu.vector_store %arg15[%c0_327, %c1024], %245 {strides = array<i32>} : memref<9x2048xf32, #tpu.memory_space<vmem>>, vector<3x512xf32>,
    %c8_328 = arith.constant 8 : index
    %c0_329 = arith.constant 0 : index
    %247 = vector.load %arg14[%c8_328, %c0_329] : memref<16x512xf32, #tpu.memory_space<vmem>>, vector<3x512xf32>
    %c3_330 = arith.constant 3 : index
    %c1024_331 = arith.constant 1024 : index
    %248 = vector.load %arg15[%c3_330, %c1024_331] : memref<9x2048xf32, #tpu.memory_space<vmem>>, vector<3x512xf32>
    tpu.vector_store %arg15[%c3_330, %c1024_331], %247 {strides = array<i32>} : memref<9x2048xf32, #tpu.memory_space<vmem>>, vector<3x512xf32>,
    %c12_332 = arith.constant 12 : index
    %c0_333 = arith.constant 0 : index
    %249 = vector.load %arg14[%c12_332, %c0_333] : memref<16x512xf32, #tpu.memory_space<vmem>>, vector<3x512xf32>
    %c6_334 = arith.constant 6 : index
    %c1024_335 = arith.constant 1024 : index
    %250 = vector.load %arg15[%c6_334, %c1024_335] : memref<9x2048xf32, #tpu.memory_space<vmem>>, vector<3x512xf32>
    tpu.vector_store %arg15[%c6_334, %c1024_335], %249 {strides = array<i32>} : memref<9x2048xf32, #tpu.memory_space<vmem>>, vector<3x512xf32>,
    %c5_336 = arith.constant 5 : index
    %c0_337 = arith.constant 0 : index
    %251 = vector.load %arg14[%c5_336, %c0_337] : memref<16x512xf32, #tpu.memory_space<vmem>>, vector<3x512xf32>
    %c0_338 = arith.constant 0 : index
    %c1536 = arith.constant 1536 : index
    %252 = vector.load %arg15[%c0_338, %c1536] : memref<9x2048xf32, #tpu.memory_space<vmem>>, vector<3x512xf32>
    tpu.vector_store %arg15[%c0_338, %c1536], %251 {strides = array<i32>} : memref<9x2048xf32, #tpu.memory_space<vmem>>, vector<3x512xf32>,
    %c9_339 = arith.constant 9 : index
    %c0_340 = arith.constant 0 : index
    %253 = vector.load %arg14[%c9_339, %c0_340] : memref<16x512xf32, #tpu.memory_space<vmem>>, vector<3x512xf32>
    %c3_341 = arith.constant 3 : index
    %c1536_342 = arith.constant 1536 : index
    %254 = vector.load %arg15[%c3_341, %c1536_342] : memref<9x2048xf32, #tpu.memory_space<vmem>>, vector<3x512xf32>
    tpu.vector_store %arg15[%c3_341, %c1536_342], %253 {strides = array<i32>} : memref<9x2048xf32, #tpu.memory_space<vmem>>, vector<3x512xf32>,
    %c13_343 = arith.constant 13 : index
    %c0_344 = arith.constant 0 : index
    %255 = vector.load %arg14[%c13_343, %c0_344] : memref<16x512xf32, #tpu.memory_space<vmem>>, vector<3x512xf32>
    %c6_345 = arith.constant 6 : index
    %c1536_346 = arith.constant 1536 : index
    %256 = vector.load %arg15[%c6_345, %c1536_346] : memref<9x2048xf32, #tpu.memory_space<vmem>>, vector<3x512xf32>
    tpu.vector_store %arg15[%c6_345, %c1536_346], %255 {strides = array<i32>} : memref<9x2048xf32, #tpu.memory_space<vmem>>, vector<3x512xf32>,
    %c0_347 = arith.constant 0 : index
    %c0_348 = arith.constant 0 : index
    %257 = vector.load %arg15[%c0_347, %c0_348] : memref<9x2048xf32, #tpu.memory_space<vmem>>, vector<9x2048xf32>
    %258 = arith.truncf %257 : vector<9x2048xf32> to vector<9x2048xbf16>
    %c0_349 = arith.constant 0 : index
    %c0_350 = arith.constant 0 : index
    %259 = vector.load %arg4[%c0_349, %c0_350] : memref<2048x128xbf16, #tpu.memory_space<vmem>>, vector<2048x128xbf16>
    %cst_351 = arith.constant dense<0.000000e+00> : vector<9x128xf32>
    %260 = tpu.matmul %258, %259, %cst_351 {dimension_numbers = #tpu.dot_dimension_numbers<[1], [0], [0], [1], [0, 0, 1, 1], [], []>} : vector<9x2048xbf16>, vector<2048x128xbf16>, vector<9x128xf32> -> vector<9x128xf32>
    %c0_352 = arith.constant 0 : index
    %c0_353 = arith.constant 0 : index
    %261 = vector.load %arg5[%c0_352, %c0_353] : memref<1x128xf32, #tpu.memory_space<vmem>>, vector<1x128xf32>
    %262 = vector.broadcast %261 : vector<1x128xf32> to vector<9x128xf32>
    %263 = arith.addf %260, %262 : vector<9x128xf32>
    %cst_354 = arith.constant 0.000000e+00 : f32
    %264 = vector.broadcast %cst_354 : f32 to vector<9x128xf32>
    %265 = arith.maximumf %263, %264 : vector<9x128xf32>
    %c0_355 = arith.constant 0 : index
    %c0_356 = arith.constant 0 : index
    %266 = vector.load %arg16[%c0_355, %c0_356] : memref<9x128xf32, #tpu.memory_space<vmem>>, vector<9x128xf32>
    tpu.vector_store %arg16[%c0_355, %c0_356], %265 {strides = array<i32>} : memref<9x128xf32, #tpu.memory_space<vmem>>, vector<9x128xf32>,
    %c0_357 = arith.constant 0 : index
    %c0_358 = arith.constant 0 : index
    %267 = vector.load %arg16[%c0_357, %c0_358] : memref<9x128xf32, #tpu.memory_space<vmem>>, vector<1x128xf32>
    %c0_359 = arith.constant 0 : index
    %c0_360 = arith.constant 0 : index
    %268 = vector.load %arg17[%c0_359, %c0_360] : memref<1x1152xf32, #tpu.memory_space<vmem>>, vector<1x128xf32>
    tpu.vector_store %arg17[%c0_359, %c0_360], %267 {strides = array<i32>} : memref<1x1152xf32, #tpu.memory_space<vmem>>, vector<1x128xf32>,
    %c1_361 = arith.constant 1 : index
    %c0_362 = arith.constant 0 : index
    %269 = vector.load %arg16[%c1_361, %c0_362] : memref<9x128xf32, #tpu.memory_space<vmem>>, vector<1x128xf32>
    %c0_363 = arith.constant 0 : index
    %c128_364 = arith.constant 128 : index
    %270 = vector.load %arg17[%c0_363, %c128_364] : memref<1x1152xf32, #tpu.memory_space<vmem>>, vector<1x128xf32>
    tpu.vector_store %arg17[%c0_363, %c128_364], %269 {strides = array<i32>} : memref<1x1152xf32, #tpu.memory_space<vmem>>, vector<1x128xf32>,
    %c2_365 = arith.constant 2 : index
    %c0_366 = arith.constant 0 : index
    %271 = vector.load %arg16[%c2_365, %c0_366] : memref<9x128xf32, #tpu.memory_space<vmem>>, vector<1x128xf32>
    %c0_367 = arith.constant 0 : index
    %c256_368 = arith.constant 256 : index
    %272 = vector.load %arg17[%c0_367, %c256_368] : memref<1x1152xf32, #tpu.memory_space<vmem>>, vector<1x128xf32>
    tpu.vector_store %arg17[%c0_367, %c256_368], %271 {strides = array<i32>} : memref<1x1152xf32, #tpu.memory_space<vmem>>, vector<1x128xf32>,
    %c3_369 = arith.constant 3 : index
    %c0_370 = arith.constant 0 : index
    %273 = vector.load %arg16[%c3_369, %c0_370] : memref<9x128xf32, #tpu.memory_space<vmem>>, vector<1x128xf32>
    %c0_371 = arith.constant 0 : index
    %c384_372 = arith.constant 384 : index
    %274 = vector.load %arg17[%c0_371, %c384_372] : memref<1x1152xf32, #tpu.memory_space<vmem>>, vector<1x128xf32>
    tpu.vector_store %arg17[%c0_371, %c384_372], %273 {strides = array<i32>} : memref<1x1152xf32, #tpu.memory_space<vmem>>, vector<1x128xf32>,
    %c4_373 = arith.constant 4 : index
    %c0_374 = arith.constant 0 : index
    %275 = vector.load %arg16[%c4_373, %c0_374] : memref<9x128xf32, #tpu.memory_space<vmem>>, vector<1x128xf32>
    %c0_375 = arith.constant 0 : index
    %c512_376 = arith.constant 512 : index
    %276 = vector.load %arg17[%c0_375, %c512_376] : memref<1x1152xf32, #tpu.memory_space<vmem>>, vector<1x128xf32>
    tpu.vector_store %arg17[%c0_375, %c512_376], %275 {strides = array<i32>} : memref<1x1152xf32, #tpu.memory_space<vmem>>, vector<1x128xf32>,
    %c5_377 = arith.constant 5 : index
    %c0_378 = arith.constant 0 : index
    %277 = vector.load %arg16[%c5_377, %c0_378] : memref<9x128xf32, #tpu.memory_space<vmem>>, vector<1x128xf32>
    %c0_379 = arith.constant 0 : index
    %c640 = arith.constant 640 : index
    %278 = vector.load %arg17[%c0_379, %c640] : memref<1x1152xf32, #tpu.memory_space<vmem>>, vector<1x128xf32>
    tpu.vector_store %arg17[%c0_379, %c640], %277 {strides = array<i32>} : memref<1x1152xf32, #tpu.memory_space<vmem>>, vector<1x128xf32>,
    %c6_380 = arith.constant 6 : index
    %c0_381 = arith.constant 0 : index
    %279 = vector.load %arg16[%c6_380, %c0_381] : memref<9x128xf32, #tpu.memory_space<vmem>>, vector<1x128xf32>
    %c0_382 = arith.constant 0 : index
    %c768 = arith.constant 768 : index
    %280 = vector.load %arg17[%c0_382, %c768] : memref<1x1152xf32, #tpu.memory_space<vmem>>, vector<1x128xf32>
    tpu.vector_store %arg17[%c0_382, %c768], %279 {strides = array<i32>} : memref<1x1152xf32, #tpu.memory_space<vmem>>, vector<1x128xf32>,
    %c7_383 = arith.constant 7 : index
    %c0_384 = arith.constant 0 : index
    %281 = vector.load %arg16[%c7_383, %c0_384] : memref<9x128xf32, #tpu.memory_space<vmem>>, vector<1x128xf32>
    %c0_385 = arith.constant 0 : index
    %c896 = arith.constant 896 : index
    %282 = vector.load %arg17[%c0_385, %c896] : memref<1x1152xf32, #tpu.memory_space<vmem>>, vector<1x128xf32>
    tpu.vector_store %arg17[%c0_385, %c896], %281 {strides = array<i32>} : memref<1x1152xf32, #tpu.memory_space<vmem>>, vector<1x128xf32>,
    %c8_386 = arith.constant 8 : index
    %c0_387 = arith.constant 0 : index
    %283 = vector.load %arg16[%c8_386, %c0_387] : memref<9x128xf32, #tpu.memory_space<vmem>>, vector<1x128xf32>
    %c0_388 = arith.constant 0 : index
    %c1024_389 = arith.constant 1024 : index
    %284 = vector.load %arg17[%c0_388, %c1024_389] : memref<1x1152xf32, #tpu.memory_space<vmem>>, vector<1x128xf32>
    tpu.vector_store %arg17[%c0_388, %c1024_389], %283 {strides = array<i32>} : memref<1x1152xf32, #tpu.memory_space<vmem>>, vector<1x128xf32>,
    %c0_390 = arith.constant 0 : index
    %c0_391 = arith.constant 0 : index
    %285 = vector.load %arg17[%c0_390, %c0_391] : memref<1x1152xf32, #tpu.memory_space<vmem>>, vector<1x1152xf32>
    %286 = arith.truncf %285 : vector<1x1152xf32> to vector<1x1152xbf16>
    %c0_392 = arith.constant 0 : index
    %c0_393 = arith.constant 0 : index
    %287 = vector.load %arg6[%c0_392, %c0_393] : memref<1152x128xbf16, #tpu.memory_space<vmem>>, vector<1152x128xbf16>
    %cst_394 = arith.constant dense<0.000000e+00> : vector<1x128xf32>
    %288 = tpu.matmul %286, %287, %cst_394 {dimension_numbers = #tpu.dot_dimension_numbers<[1], [0], [0], [1], [0, 0, 1, 1], [], []>} : vector<1x1152xbf16>, vector<1152x128xbf16>, vector<1x128xf32> -> vector<1x128xf32>
    %c0_395 = arith.constant 0 : index
    %c0_396 = arith.constant 0 : index
    %289 = vector.load %arg7[%c0_395, %c0_396] : memref<1x128xf32, #tpu.memory_space<vmem>>, vector<1x128xf32>
    %290 = arith.addf %288, %289 : vector<1x128xf32>
    %cst_397 = arith.constant 0.000000e+00 : f32
    %291 = vector.broadcast %cst_397 : f32 to vector<1x128xf32>
    %292 = arith.maximumf %290, %291 : vector<1x128xf32>
    %c0_398 = arith.constant 0 : index
    %c0_399 = arith.constant 0 : index
    %293 = vector.load %arg18[%c0_398, %c0_399] : memref<1x128xf32, #tpu.memory_space<vmem>>, vector<1x128xf32>
    tpu.vector_store %arg18[%c0_398, %c0_399], %292 {strides = array<i32>} : memref<1x128xf32, #tpu.memory_space<vmem>>, vector<1x128xf32>,
    %c0_400 = arith.constant 0 : index
    %c0_401 = arith.constant 0 : index
    %294 = vector.load %arg18[%c0_400, %c0_401] : memref<1x128xf32, #tpu.memory_space<vmem>>, vector<1x128xf32>
    %295 = arith.truncf %294 : vector<1x128xf32> to vector<1x128xbf16>
    %c0_402 = arith.constant 0 : index
    %c0_403 = arith.constant 0 : index
    %296 = vector.load %arg8[%c0_402, %c0_403] : memref<128x512xbf16, #tpu.memory_space<vmem>>, vector<128x512xbf16>
    %cst_404 = arith.constant dense<0.000000e+00> : vector<1x512xf32>
    %297 = tpu.matmul %295, %296, %cst_404 {dimension_numbers = #tpu.dot_dimension_numbers<[1], [0], [0], [1], [0, 0, 1, 1], [], []>} : vector<1x128xbf16>, vector<128x512xbf16>, vector<1x512xf32> -> vector<1x512xf32>
    %c0_405 = arith.constant 0 : index
    %c0_406 = arith.constant 0 : index
    %298 = vector.load %arg9[%c0_405, %c0_406] : memref<1x512xf32, #tpu.memory_space<vmem>>, vector<1x512xf32>
    %299 = arith.addf %297, %298 : vector<1x512xf32>
    %cst_407 = arith.constant 0.000000e+00 : f32
    %300 = vector.broadcast %cst_407 : f32 to vector<1x512xf32>
    %301 = arith.maximumf %299, %300 : vector<1x512xf32>
    %302 = arith.truncf %301 : vector<1x512xf32> to vector<1x512xbf16>
    %c0_408 = arith.constant 0 : index
    %c0_409 = arith.constant 0 : index
    %303 = vector.load %arg10[%c0_408, %c0_409] : memref<512x128xbf16, #tpu.memory_space<vmem>>, vector<512x128xbf16>
    %cst_410 = arith.constant dense<0.000000e+00> : vector<1x128xf32>
    %304 = tpu.matmul %302, %303, %cst_410 {dimension_numbers = #tpu.dot_dimension_numbers<[1], [0], [0], [1], [0, 0, 1, 1], [], []>} : vector<1x512xbf16>, vector<512x128xbf16>, vector<1x128xf32> -> vector<1x128xf32>
    %c0_411 = arith.constant 0 : index
    %c0_412 = arith.constant 0 : index
    %305 = vector.load %arg11[%c0_411, %c0_412] : memref<1x128xf32, #tpu.memory_space<vmem>>, vector<1x128xf32>
    %306 = arith.addf %304, %305 : vector<1x128xf32>
    %307 = vector.extract_strided_slice %306 {offsets = [0, 6], sizes = [1, 1], strides = [1, 1]} : vector<1x128xf32> to vector<1x1xf32>
    %cst_413 = arith.constant dense<0.000000e+00> : vector<1xf32>
    %308 = vector.multi_reduction <add>, %306, %cst_413 [1] : vector<1x128xf32> to vector<1xf32>
    %309 = vector.shape_cast %308 : vector<1xf32> to vector<1x1xf32>
    %310 = arith.subf %309, %307 : vector<1x1xf32>
    %311 = vector.broadcast %307 : vector<1x1xf32> to vector<1x128xf32>
    %312 = arith.addf %311, %306 : vector<1x128xf32>
    %cst_414 = arith.constant 0.166666672 : f32
    %313 = vector.broadcast %cst_414 : f32 to vector<1x1xf32>
    %314 = arith.mulf %310, %313 : vector<1x1xf32>
    %315 = vector.broadcast %314 : vector<1x1xf32> to vector<1x128xf32>
    %316 = arith.subf %312, %315 : vector<1x128xf32>
    %317 = vector.shape_cast %316 : vector<1x128xf32> to vector<1x1x128xf32>
    %318 = vector.broadcast %317 : vector<1x1x128xf32> to vector<1x8x128xf32>
    %c0_415 = arith.constant 0 : index
    %c0_416 = arith.constant 0 : index
    %c0_417 = arith.constant 0 : index
    %319 = vector.load %arg12[%c0_415, %c0_416, %c0_417] : memref<1x8x128xf32, #tpu.memory_space<vmem>>, vector<1x8x128xf32>
    tpu.vector_store %arg12[%c0_415, %c0_416, %c0_417], %318 {strides = array<i32>} : memref<1x8x128xf32, #tpu.memory_space<vmem>>, vector<1x8x128xf32>,
    return
  }
  func.func @transform_0(%arg0: i32) -> (i32, i32, i32, i32) {
    %c0_i32 = arith.constant 0 : i32
    %c0_i32_0 = arith.constant 0 : i32
    %c0_i32_1 = arith.constant 0 : i32
    %c0_i32_2 = arith.constant 0 : i32
    return %arg0, %c0_i32, %c0_i32_0, %c0_i32_1 : i32, i32, i32, i32
  }
  func.func @transform_1(%arg0: i32) -> (i32, i32) {
    %c0_i32 = arith.constant 0 : i32
    %c0_i32_0 = arith.constant 0 : i32
    %c0_i32_1 = arith.constant 0 : i32
    return %c0_i32, %c0_i32_0 : i32, i32
  }
  func.func @transform_2(%arg0: i32) -> (i32, i32) {
    %c0_i32 = arith.constant 0 : i32
    %c0_i32_0 = arith.constant 0 : i32
    %c0_i32_1 = arith.constant 0 : i32
    return %c0_i32, %c0_i32_0 : i32, i32
  }
  func.func @transform_3(%arg0: i32) -> (i32, i32) {
    %c0_i32 = arith.constant 0 : i32
    %c0_i32_0 = arith.constant 0 : i32
    %c0_i32_1 = arith.constant 0 : i32
    return %c0_i32, %c0_i32_0 : i32, i32
  }
  func.func @transform_4(%arg0: i32) -> (i32, i32) {
    %c0_i32 = arith.constant 0 : i32
    %c0_i32_0 = arith.constant 0 : i32
    %c0_i32_1 = arith.constant 0 : i32
    return %c0_i32, %c0_i32_0 : i32, i32
  }
  func.func @transform_5(%arg0: i32) -> (i32, i32) {
    %c0_i32 = arith.constant 0 : i32
    %c0_i32_0 = arith.constant 0 : i32
    %c0_i32_1 = arith.constant 0 : i32
    return %c0_i32, %c0_i32_0 : i32, i32
  }
  func.func @transform_6(%arg0: i32) -> (i32, i32) {
    %c0_i32 = arith.constant 0 : i32
    %c0_i32_0 = arith.constant 0 : i32
    %c0_i32_1 = arith.constant 0 : i32
    return %c0_i32, %c0_i32_0 : i32, i32
  }
  func.func @transform_7(%arg0: i32) -> (i32, i32) {
    %c0_i32 = arith.constant 0 : i32
    %c0_i32_0 = arith.constant 0 : i32
    %c0_i32_1 = arith.constant 0 : i32
    return %c0_i32, %c0_i32_0 : i32, i32
  }
  func.func @transform_8(%arg0: i32) -> (i32, i32) {
    %c0_i32 = arith.constant 0 : i32
    %c0_i32_0 = arith.constant 0 : i32
    %c0_i32_1 = arith.constant 0 : i32
    return %c0_i32, %c0_i32_0 : i32, i32
  }
  func.func @transform_9(%arg0: i32) -> (i32, i32) {
    %c0_i32 = arith.constant 0 : i32
    %c0_i32_0 = arith.constant 0 : i32
    %c0_i32_1 = arith.constant 0 : i32
    return %c0_i32, %c0_i32_0 : i32, i32
  }
  func.func @transform_10(%arg0: i32) -> (i32, i32) {
    %c0_i32 = arith.constant 0 : i32
    %c0_i32_0 = arith.constant 0 : i32
    %c0_i32_1 = arith.constant 0 : i32
    return %c0_i32, %c0_i32_0 : i32, i32
  }
  func.func @transform_11(%arg0: i32) -> (i32, i32, i32) {
    %c0_i32 = arith.constant 0 : i32
    %c0_i32_0 = arith.constant 0 : i32
    %c0_i32_1 = arith.constant 0 : i32
    return %arg0, %c0_i32, %c0_i32_0 : i32, i32, i32
  }
}

</mosaic_0001>

<bundles_post_ra>
// kernel: rainbow_forward.1
= control target key start
LH: loop header
LB: loop body
LE: loop exit
PB: predicated region body
PF: predicated region fallthrough
CT: control target
= control target key end

     0   :  { %s5478_s17 = smov 0   ;;  %s6495_s0 = inlined_call_operand.vmem [shape: f32[2,9,9,128], index: 0, kind: input, shape index: {}]   ;;  %s6496_s1 = inlined_call_operand.vmem [shape: bf16[512,128], index: 1, kind: input, shape index: {}]   ;;  %s6497_s2 = inlined_call_operand.vmem [shape: f32[1,128], index: 2, kind: input, shape index: {}]   ;;  %s6498_s3 = inlined_call_operand.vmem [shape: bf16[2048,128], index: 3, kind: input, shape index: {}]   ;;  %s6499_s4 = inlined_call_operand.vmem [shape: f32[1,128], index: 4, kind: input, shape index: {}]   ;;  %s6500_s5 = inlined_call_operand.vmem [shape: bf16[1152,128], index: 5, kind: input, shape index: {}]   ;;  %s6501_s6 = inlined_call_operand.vmem [shape: f32[1,128], index: 6, kind: input, shape index: {}]   ;;  %s6502_s7 = inlined_call_operand.vmem [shape: bf16[128,512], index: 7, kind: input, shape index: {}]   ;;  %s6503_s8 = inlined_call_operand.vmem [shape: f32[1,512], index: 8, kind: input, shape index: {}]   ;;  %s6504_s9 = inlined_call_operand.vmem [shape: bf16[512,128], index: 9, kind: input, shape index: {}]   ;;  %s6505_s10 = inlined_call_operand.vmem [shape: f32[1,128], index: 10, kind: input, shape index: {}]   ;;  %s6506_s11 = inlined_call_operand.vmem [shape: f32[2,8,128], index: 11, kind: output, shape index: {}]  }
   0x1 LB: > { %s4324_s18 = sadd.s32 4294967295, %s5412_s17   ;;  %p4328_p0 = scmp.ge.s32.totalorder %s5412_s17, 1  ;;  %s5412_s17 = sphi %s5478_s17, %s21_s17  }
   0x2   : > { %p337_p1 = scmp.lt.s32.totalorder %s5412_s17, 3 }
   0x4   : > { %p338_p2 = pnand %p4328_p0, %p337_p1 }
   0x5   : > { %v5094_v0 = vld [vmem:[%s6496_s1 + $0x40] sm:$0xff] (!%p338_p2)   ;;  %v5098_v4 = vld [vmem:[%s6496_s1 + $0x48] sm:$0xff] (!%p338_p2)   ;;  %v5102_v8 = vld [vmem:[%s6496_s1 + $0x50] sm:$0xff] (!%p338_p2)   ;;  %p376_p3 = scmp.lt.s32.totalorder (!%p338_p2), %s4324_s18, 1  ;;  %vm5415_vm1 = vmmov (!%p338_p2), 0   ;;  %vm4248_vm2 = vcmask (!%p338_p2), 1040384  }
   0x6   : > { %341 = sbr.rel (%p338_p2) target bundleno = 1684 (0x694), region = 64  ;;  %v5095_v1 = vld [vmem:[%s6496_s1 + $0xc0] sm:$0xff] (!%p338_p2)   ;;  %4662 = vmatprep.subr.bf16.mxu0 (!%p338_p2), %v5094_v0  ;;  %v5099_v5 = vld [vmem:[%s6496_s1 + $0xc8] sm:$0xff] (!%p338_p2)   ;;  %v5103_v9 = vld [vmem:[%s6496_s1 + $0xd0] sm:$0xff] (!%p338_p2)  }
   0x7   : > { %v5096_v2 = vld [vmem:[%s6496_s1] sm:$0xff] (!%p338_p2)   ;;  %4702 = vmatprep.subr.bf16.mxu1 (!%p338_p2), %v5095_v1  ;;  %v5100_v6 = vld [vmem:[%s6496_s1 + $0x8] sm:$0xff] (!%p338_p2)   ;;  %v5104_v10 = vld [vmem:[%s6496_s1 + $0x10] sm:$0xff] (!%p338_p2)  }
   0x8   : > { %v5097_v3 = vld [vmem:[%s6496_s1 + $0x80] sm:$0xff] (!%p338_p2)   ;;  %4663 = vmatpush3.bf16.msra.mxu0 (!%p338_p2), %v5096_v2  ;;  %v5101_v7 = vld [vmem:[%s6496_s1 + $0x88] sm:$0xff] (!%p338_p2)   ;;  %v5105_v11 = vld [vmem:[%s6496_s1 + $0x90] sm:$0xff] (!%p338_p2)  }
   0x9   : > { %4703 = vmatpush3.bf16.msra.mxu1 (!%p338_p2), %v5097_v3  ;;  %4664 = vmatprep.subr.bf16.mxu0 (!%p338_p2), %v5098_v4  ;;  %v5106_v12 = vld [vmem:[%s6496_s1 + $0x58] sm:$0xff] (!%p338_p2)   ;;  %v5110_v16 = vld [vmem:[%s6496_s1 + $0x60] sm:$0xff] (!%p338_p2)   ;;  %v5114_v20 = vld [vmem:[%s6496_s1 + $0x68] sm:$0xff] (!%p338_p2)  }
   0xa   : > { %4704 = vmatprep.subr.bf16.mxu1 (!%p338_p2), %v5099_v5  ;;  %v5107_v13 = vld [vmem:[%s6496_s1 + $0xd8] sm:$0xff] (!%p338_p2)   ;;  %v5111_v17 = vld [vmem:[%s6496_s1 + $0xe0] sm:$0xff] (!%p338_p2)   ;;  %v5115_v21 = vld [vmem:[%s6496_s1 + $0xe8] sm:$0xff] (!%p338_p2)  }
   0xb   : > { %v5108_v14 = vld [vmem:[%s6496_s1 + $0x18] sm:$0xff] (!%p338_p2)   ;;  %v5112_v18 = vld [vmem:[%s6496_s1 + $0x20] sm:$0xff] (!%p338_p2)   ;;  %v5116_v22 = vld [vmem:[%s6496_s1 + $0x28] sm:$0xff] (!%p338_p2)  }
   0xc   : > { %4665 = vmatpush3.bf16.msra.mxu0 (!%p338_p2), %v5100_v6  ;;  %v5109_v15 = vld [vmem:[%s6496_s1 + $0x98] sm:$0xff] (!%p338_p2)   ;;  %v5113_v19 = vld [vmem:[%s6496_s1 + $0xa0] sm:$0xff] (!%p338_p2)   ;;  %v5117_v23 = vld [vmem:[%s6496_s1 + $0xa8] sm:$0xff] (!%p338_p2)  }
   0xd   : > { %4705 = vmatpush3.bf16.msra.mxu1 %v5101_v7  ;;  %4666 = vmatprep.subr.bf16.mxu0 %v5102_v8  ;;  %s6510_s18 = smov (!%p376_p3, %s4324_s18), 1  ;;  %v5118_v24 = vld [vmem:[%s6496_s1 + $0x70] sm:$0xff]   ;;  %v5122_v28 = vld [vmem:[%s6496_s1 + $0x78] sm:$0xff]   ;;  %v5126_v2 = vld [vmem:[%s6498_s3 + $0x40] sm:$0xff]  }
   0xe   : > { %4706 = vmatprep.subr.bf16.mxu1 %v5103_v9  ;;  %v5119_v25 = vld [vmem:[%s6496_s1 + $0xf0] sm:$0xff]   ;;  %s5079_s20 = smul.u32 144, %s6510_s18  ;;  %v5123_v29 = vld [vmem:[%s6496_s1 + $0xf8] sm:$0xff]   ;;  %v5127_v3 = vld [vmem:[%s6498_s3] sm:$0xff]   ;;  %s4330_s30 = sshll.u32 %s6510_s18, 3 }
   0xf   : > { %v5120_v26 = vld [vmem:[%s6496_s1 + $0x30] sm:$0xff]   ;;  %v5124_v30 = vld [vmem:[%s6496_s1 + $0x38] sm:$0xff]   ;;  %v5128_v4 = vld [vmem:[%s6498_s3 + $0xc0] sm:$0xff]   ;;  %s384_s14 = scalar_lea.vmem %s6506_s11, %s4330_s30 }
  0x10   : > { %4667 = vmatpush3.bf16.msra.mxu0 %v5104_v10  ;;  %v5121_v27 = vld [vmem:[%s6496_s1 + $0xb0] sm:$0xff]   ;;  %s5586_s12 = scalar_lea.vmem %s6495_s0, %s5079_s20  ;;  %v5125_v31 = vld [vmem:[%s6496_s1 + $0xb8] sm:$0xff]   ;;  %v5129_v5 = vld [vmem:[%s6498_s3 + $0x80] sm:$0xff]  }
  0x11   : > { %4707 = vmatpush3.bf16.msra.mxu1 %v5105_v11  ;;  %4668 = vmatprep.subr.bf16.mxu0 %v5106_v12  ;;  %v409_v32 = vld [vmem:[%s5586_s12 + $0x1] sm:$0xff]  ;;  %v4338_v33 = vld [vmem:[%s5586_s12 + $0x11] sm:$0xff] }
  0x12   : > { %4708 = vmatprep.subr.bf16.mxu1 %v5107_v13  ;;  %v4354_v34 = vld [vmem:[%s5586_s12 + $0x21] sm:$0xff]  ;;  %v491_v35 = vpack.c.bf16 %v4338_v33, %v409_v32  ;;  %v4331_v38 = vld [vmem:[%s5586_s12 + $0x10] sm:$0xff]  ;;  %v5156_v32 = vld [vmem:[%s6498_s3 + $0xf8] sm:$0xff]  }
  0x13   : > { %v493_v36 = vpack.c.bf16 %v4354_v34, %v4338_v33  ;;  %v386_v37 = vld [vmem:[%s5586_s12] sm:$0xff]  ;;  %v4340_v42 = vld [vmem:[%s5586_s12 + $0x31] sm:$0xff]  ;;  %v5130_v6 = vld [vmem:[%s6498_s3 + $0x48] sm:$0xff]  }
  0x14   : > { %4669 = vmatpush3.bf16.msra.mxu0 %v5108_v14  ;;  %v4346_v39 = vld [vmem:[%s5586_s12 + $0x20] sm:$0xff]  ;;  %v490_v40 = vpack.c.bf16 %v4331_v38, %v386_v37  ;;  %801 = vmatprep.mubr.bf16.mxu0 %v491_v35  ;;  %v495_v44 = vpack.c.bf16 %v4340_v42, %v4354_v34  ;;  %v4333_v46 = vld [vmem:[%s5586_s12 + $0x30] sm:$0xff]  ;;  %v5131_v7 = vld [vmem:[%s6498_s3 + $0x8] sm:$0xff]  }
  0x15   : > { %4709 = vmatpush3.bf16.msra.mxu1 %v5109_v15  ;;  %4670 = vmatprep.subr.bf16.mxu0 %v5110_v16  ;;  %v492_v41 = vpack.c.bf16 %v4346_v39, %v4331_v38  ;;  %v4356_v43 = vld [vmem:[%s5586_s12 + $0x41] sm:$0xff]  ;;  %v4342_v48 = vld [vmem:[%s5586_s12 + $0x51] sm:$0xff]  ;;  %v494_v50 = vpack.c.bf16 %v4333_v46, %v4346_v39  ;;  %v5717_v38 = vld [vmem:[%s6497_s2] ss:$0 sm:$0xff] }
  0x16   : > { %4710 = vmatprep.subr.bf16.mxu1 %v5111_v17  ;;  %866 = vmatprep.mubr.bf16.mxu1 %v493_v36  ;;  %v497_v45 = vpack.c.bf16 %v4356_v43, %v4340_v42  ;;  %v4348_v47 = vld [vmem:[%s5586_s12 + $0x40] sm:$0xff]  ;;  %v499_v52 = vpack.c.bf16 %v4342_v48, %v4356_v43  ;;  %v4335_v54 = vld [vmem:[%s5586_s12 + $0x50] sm:$0xff]  ;;  %v5132_v8 = vld [vmem:[%s6498_s3 + $0xc8] sm:$0xff]  }
  0x17   : > { %v4358_v49 = vld [vmem:[%s5586_s12 + $0x61] sm:$0xff]  ;;  %v496_v51 = vpack.c.bf16 %v4348_v47, %v4333_v46  ;;  %v4344_v56 = vld [vmem:[%s5586_s12 + $0x71] sm:$0xff]  ;;  %v498_v58 = vpack.c.bf16 %v4335_v54, %v4348_v47 }
  0x18   : > { %4671 = vmatpush3.bf16.msra.mxu0 %v5112_v18  ;;  %v501_v53 = vpack.c.bf16 %v4358_v49, %v4342_v48  ;;  %v4350_v55 = vld [vmem:[%s5586_s12 + $0x60] sm:$0xff]  ;;  %v503_v60 = vpack.c.bf16 %v4344_v56, %v4358_v49  ;;  %v4337_v62 = vld [vmem:[%s5586_s12 + $0x70] sm:$0xff]  ;;  %v5133_v9 = vld [vmem:[%s6498_s3 + $0x88] sm:$0xff]  }
  0x19   : > { %4711 = vmatpush3.bf16.msra.mxu1 %v5113_v19  ;;  %4672 = vmatprep.subr.bf16.mxu0 %v5114_v20  ;;  %v4360_v57 = vld [vmem:[%s5586_s12 + $0x81] sm:$0xff]  ;;  %v500_v59 = vpack.c.bf16 %v4350_v55, %v4335_v54  ;;  %v502_v0 = vpack.c.bf16 %v4337_v62, %v4350_v55  ;;  %v5134_v10 = vld [vmem:[%s6498_s3 + $0x50] sm:$0xff]   ;;  %v5138_v14 = vld [vmem:[%s6498_s3 + $0x58] sm:$0xff]  }
  0x1a   : > { %4712 = vmatprep.subr.bf16.mxu1 %v5115_v21  ;;  %v505_v61 = vpack.c.bf16 %v4360_v57, %v4344_v56  ;;  %v4352_v63 = vld [vmem:[%s5586_s12 + $0x80] sm:$0xff]  ;;  %v5135_v11 = vld [vmem:[%s6498_s3 + $0x10] sm:$0xff]   ;;  %v5139_v15 = vld [vmem:[%s6498_s3 + $0x18] sm:$0xff]  }
  0x1b   : > { %v504_v1 = vpack.c.bf16 %v4352_v63, %v4337_v62  ;;  %v5136_v12 = vld [vmem:[%s6498_s3 + $0xd0] sm:$0xff]   ;;  %v5140_v16 = vld [vmem:[%s6498_s3 + $0xd8] sm:$0xff]   ;;  %v5142_v18 = vld [vmem:[%s6498_s3 + $0x60] sm:$0xff]  }
  0x1c   : > { %4673 = vmatpush3.bf16.msra.mxu0 %v5116_v22  ;;  %v5137_v13 = vld [vmem:[%s6498_s3 + $0x90] sm:$0xff]   ;;  %v5141_v17 = vld [vmem:[%s6498_s3 + $0x98] sm:$0xff]   ;;  %v5143_v19 = vld [vmem:[%s6498_s3 + $0x20] sm:$0xff]  }
  0x1d   : > { %4713 = vmatpush3.bf16.msra.mxu1 %v5117_v23  ;;  %4674 = vmatprep.subr.bf16.mxu0 %v5118_v24  ;;  %v5144_v20 = vld [vmem:[%s6498_s3 + $0xe0] sm:$0xff]   ;;  %v5146_v22 = vld [vmem:[%s6498_s3 + $0x68] sm:$0xff]   ;;  %v5157_v33 = vld [vmem:[%s6498_s3 + $0xb8] sm:$0xff]  }
  0x1e   : > { %4714 = vmatprep.subr.bf16.mxu1 %v5119_v25  ;;  %v5145_v21 = vld [vmem:[%s6498_s3 + $0xa0] sm:$0xff]   ;;  %v5147_v23 = vld [vmem:[%s6498_s3 + $0x28] sm:$0xff]  }
  0x1f   : > { %v5148_v24 = vld [vmem:[%s6498_s3 + $0xe8] sm:$0xff]   ;;  %v5158_v34 = vld [vmem:[%s6498_s3 + $0x140] sm:$0xff]  }
  0x20   : > { %4675 = vmatpush3.bf16.msra.mxu0 %v5120_v26  ;;  %v5149_v25 = vld [vmem:[%s6498_s3 + $0xa8] sm:$0xff]   ;;  %v5150_v26 = vld [vmem:[%s6498_s3 + $0x70] sm:$0xff]   ;;  %v5160_v35 = vld [vmem:[%s6498_s3 + $0x1c0] sm:$0xff]  }
  0x21   : > { %4715 = vmatpush3.bf16.msra.mxu1 %v5121_v27  ;;  %4676 = vmatprep.subr.bf16.mxu0 %v5122_v28  ;;  %v5151_v27 = vld [vmem:[%s6498_s3 + $0x30] sm:$0xff]  }
  0x22   : > { %4716 = vmatprep.subr.bf16.mxu1 %v5123_v29  ;;  %v5152_v28 = vld [vmem:[%s6498_s3 + $0xf0] sm:$0xff]  }
  0x23   : > { %v5153_v29 = vld [vmem:[%s6498_s3 + $0xb0] sm:$0xff]  }
  0x24   : > { %4677 = vmatpush3.bf16.msra.mxu0 %v5124_v30  ;;  %v5154_v30 = vld [vmem:[%s6498_s3 + $0x78] sm:$0xff]  }
  0x25   : > { %4717 = vmatpush3.bf16.msra.mxu1 %v5125_v31  ;;  %4742 = vmatprep.subr.bf16.mxu0 %v5126_v2  ;;  %v5155_v31 = vld [vmem:[%s6498_s3 + $0x38] sm:$0xff]  }
  0x26   : > { %4764 = vmatprep.subr.bf16.mxu1 %v5128_v4 }
  0x27   : > { %802 = vmatmul.mubr.bf16.vlgmr.msra.gmra.mrb[0].mxu0 %v490_v40 }
  0x28   : > { %867 = vmatmul.mubr.bf16.vlgmr.msra.gmra.mrb[0].mxu1 %v492_v41  ;;  %809 = vmatprep.mubr.bf16.mxu0 %v495_v44 }
  0x29   : > { %874 = vmatprep.mubr.bf16.mxu1 %v497_v45  ;;  %4743 = vmatpush3.bf16.msra.mxu0 %v5127_v3 }
  0x2a   : > { %4765 = vmatpush3.bf16.msra.mxu1 %v5129_v5  ;;  %4744 = vmatprep.subr.bf16.mxu0 %v5130_v6 }
  0x2b   : > { %4766 = vmatprep.subr.bf16.mxu1 %v5132_v8 }
  0x2d   : > { %4745 = vmatpush3.bf16.msra.mxu0 %v5131_v7 }
  0x2e   : > { %4767 = vmatpush3.bf16.msra.mxu1 %v5133_v9  ;;  %4746 = vmatprep.subr.bf16.mxu0 %v5134_v10 }
  0x2f   : > { %810 = vmatmul.mubr.bf16.gmra.mrb[4].mxu0 %v494_v50  ;;  %4768 = vmatprep.subr.bf16.mxu1 %v5136_v12 }
  0x30   : > { %875 = vmatmul.mubr.bf16.gmra.mrb[4].mxu1 %v496_v51  ;;  %817 = vmatprep.mubr.bf16.mxu0 %v499_v52 }
  0x31   : > { %882 = vmatprep.mubr.bf16.mxu1 %v501_v53  ;;  %4747 = vmatpush3.bf16.msra.mxu0 %v5135_v11 }
  0x32   : > { %4769 = vmatpush3.bf16.msra.mxu1 %v5137_v13  ;;  %4748 = vmatprep.subr.bf16.mxu0 %v5138_v14 }
  0x33   : > { %4770 = vmatprep.subr.bf16.mxu1 %v5140_v16 }
  0x35   : > { %4749 = vmatpush3.bf16.msra.mxu0 %v5139_v15 }
  0x36   : > { %4771 = vmatpush3.bf16.msra.mxu1 %v5141_v17  ;;  %4750 = vmatprep.subr.bf16.mxu0 %v5142_v18 }
  0x37   : > { %818 = vmatmul.mubr.bf16.gmra.mrb[8].mxu0 %v498_v58  ;;  %4772 = vmatprep.subr.bf16.mxu1 %v5144_v20 }
  0x38   : > { %883 = vmatmul.mubr.bf16.gmra.mrb[8].mxu1 %v500_v59  ;;  %825 = vmatprep.mubr.bf16.mxu0 %v503_v60 }
  0x39   : > { %890 = vmatprep.mubr.bf16.mxu1 %v505_v61  ;;  %4751 = vmatpush3.bf16.msra.mxu0 %v5143_v19 }
  0x3a   : > { %4773 = vmatpush3.bf16.msra.mxu1 %v5145_v21  ;;  %4752 = vmatprep.subr.bf16.mxu0 %v5146_v22 }
  0x3b   : > { %4774 = vmatprep.subr.bf16.mxu1 %v5148_v24 }
  0x3d   : > { %4753 = vmatpush3.bf16.msra.mxu0 %v5147_v23 }
  0x3e   : > { %4754 = vmatprep.subr.bf16.mxu0 %v5150_v26  ;;  %4775 = vmatpush3.bf16.msra.mxu1 %v5149_v25 }
  0x3f   : > { %826 = vmatmul.mubr.bf16.gmra.mrb[12].mxu0 %v502_v0  ;;  %4776 = vmatprep.subr.bf16.mxu1 %v5152_v28 }
  0x40   : > { %891 = vmatmul.mubr.bf16.gmra.mrb[12].mxu1 %v504_v1 }
  0x41   : > { %4755 = vmatpush3.bf16.msra.mxu0 %v5151_v27 }
  0x42   : > { %4756 = vmatprep.subr.bf16.mxu0 %v5154_v30  ;;  %4777 = vmatpush3.bf16.msra.mxu1 %v5153_v29 }
  0x43   : > { %4778 = vmatprep.subr.bf16.mxu1 %v5156_v32 }
  0x45   : > { %4757 = vmatpush3.bf16.msra.mxu0 %v5155_v31 }
  0x46   : > { %4779 = vmatpush3.bf16.msra.mxu1 %v5157_v33  ;;  %4786 = vmatprep.subr.bf16.mxu0 %v5158_v34 }
  0x47   : > { %4808 = vmatprep.subr.bf16.mxu1 %v5160_v35 }
  0xfa   : > { %v4678_v36 = vpop.f32.mrb[0].mxu0 }
  0xfb   : > { %v4718_v37 = vpop.f32.mrb[0].mxu1  ;;  %v4679_v39 = vpop.f32.mrb[1].mxu0 }
  0xfc   : > { %v4719_v40 = vpop.f32.mrb[1].mxu1  ;;  %v4680_v41 = vadd.f32 %v4679_v39, %v4678_v36  ;;  %v4681_v43 = vpop.f32.mrb[2].mxu0 }
  0xfd   : > { %v4720_v42 = vadd.f32 %v4719_v40, %v4718_v37  ;;  %v4721_v44 = vpop.f32.mrb[2].mxu1  ;;  %v4682_v45 = vpop.f32.mrb[3].mxu0 }
  0xfe   : > { %v4722_v46 = vpop.f32.mrb[3].mxu1  ;;  %v804_v47 = vadd.f32 %v4680_v41, %v5717_v38  ;;  %v4683_v48 = vadd.f32 %v4682_v45, %v4681_v43 }
  0xff   : > { %v4723_v49 = vadd.f32 %v4722_v46, %v4721_v44 }
 0x100   : > { %v869_v50 = vadd.f32 %v4720_v42, %v804_v47  ;;  %v807_v51 = vadd.f32 %v4683_v48, %v5717_v38 }
 0x102   : > { %v899_v52 = vmax.f32 %v869_v50, 0.0  ;;  %v872_v53 = vadd.f32 %v4723_v49, %v807_v51  ;;  %v4684_v54 = vpop.f32.mrb[4].mxu0 }
 0x103   : > { %v4724_v55 = vpop.f32.mrb[4].mxu1  ;;  %v4685_v56 = vpop.f32.mrb[5].mxu0 }
 0x104   : > { %v4725_v57 = vpop.f32.mrb[5].mxu1  ;;  %907 = vst [vmem:[#allocation3] sm:$0x1] %v899_v52  ;;  %v909_v58 = vrot.slane %v899_v52, 1  ;;  %v912_v59 = vrot.slane %v899_v52, 2  ;;  %v915_v60 = vrot.slane %v899_v52, 3  ;;  %v4686_v6 = vadd.f32 %v4685_v56, %v4684_v54 }
 0x105   : > { %v918_v61 = vrot.slane %v899_v52, 4  ;;  %v4687_v62 = vpop.f32.mrb[6].mxu0  ;;  %v4727_v63 = vpop.f32.mrb[6].mxu1  ;;  %v921_v0 = vrot.slane %v899_v52, 5  ;;  %v924_v1 = vrot.slane %v899_v52, 6  ;;  %v927_v2 = vrot.slane %v899_v52, 7 }
 0x106   : > { %v900_v3 = vmax.f32 %v872_v53, 0.0  ;;  %v4688_v4 = vpop.f32.mrb[7].mxu0  ;;  %v4728_v5 = vpop.f32.mrb[7].mxu1  ;;  %911 = vst [vmem:[#allocation3 + $0x8] sm:$0x1] %v909_v58  ;;  %v4726_v7 = vadd.f32 %v4725_v57, %v4724_v55  ;;  %v812_v17 = vadd.f32 %v4686_v6, %v5717_v38 }
 0x107   : > { %914 = vst [vmem:[#allocation3 + $0x1] sm:$0x1] %v912_v59  ;;  %917 = vst [vmem:[#allocation3 + $0x9] sm:$0x1] %v915_v60  ;;  %v4689_v8 = vadd.f32 %v4688_v4, %v4687_v62  ;;  %v4729_v9 = vadd.f32 %v4728_v5, %v4727_v63 }
 0x108   : > { %920 = vst [vmem:[#allocation3 + $0x2] sm:$0x1] %v918_v61  ;;  %923 = vst [vmem:[#allocation3 + $0xa] sm:$0x1] %v921_v0  ;;  %v932_v10 = vrot.slane %v900_v3, 1  ;;  %v935_v11 = vrot.slane %v900_v3, 2  ;;  %v877_v19 = vadd.f32 %v4726_v7, %v812_v17 }
 0x109   : > { %926 = vst [vmem:[#allocation3 + $0x3] sm:$0x1] %v924_v1  ;;  %929 = vst [vmem:[#allocation3 + $0xb] sm:$0x1] %v927_v2  ;;  %v938_v12 = vrot.slane %v900_v3, 3  ;;  %v941_v13 = vrot.slane %v900_v3, 4  ;;  %v815_v18 = vadd.f32 %v4689_v8, %v5717_v38 }
 0x10a   : > { %930 = vst [vmem:[#allocation3 + $0x10] sm:$0x1] %v900_v3  ;;  %v944_v14 = vrot.slane %v900_v3, 5  ;;  %v947_v15 = vrot.slane %v900_v3, 6  ;;  %v950_v16 = vrot.slane %v900_v3, 7  ;;  %v4690_v20 = vpop.f32.mrb[8].mxu0 }
 0x10b   : > { %934 = vst [vmem:[#allocation3 + $0x18] sm:$0x1] %v932_v10  ;;  %937 = vst [vmem:[#allocation3 + $0x11] sm:$0x1] %v935_v11  ;;  %v4730_v21 = vpop.f32.mrb[8].mxu1  ;;  %v880_v22 = vadd.f32 %v4729_v9, %v815_v18  ;;  %v4691_v23 = vpop.f32.mrb[9].mxu0 }
 0x10c   : > { %940 = vst [vmem:[#allocation3 + $0x19] sm:$0x1] %v938_v12  ;;  %943 = vst [vmem:[#allocation3 + $0x12] sm:$0x1] %v941_v13  ;;  %v4731_v24 = vpop.f32.mrb[9].mxu1  ;;  %v901_v25 = vmax.f32 %v877_v19, 0.0  ;;  %v4692_v26 = vadd.f32 %v4691_v23, %v4690_v20 }
 0x10d   : > { %946 = vst [vmem:[#allocation3 + $0x1a] sm:$0x1] %v944_v14  ;;  %949 = vst [vmem:[#allocation3 + $0x13] sm:$0x1] %v947_v15  ;;  %v4732_v27 = vadd.f32 %v4731_v24, %v4730_v21  ;;  %v4693_v28 = vpop.f32.mrb[10].mxu0  ;;  %v4733_v29 = vpop.f32.mrb[10].mxu1 }
 0x10e   : > { %952 = vst [vmem:[#allocation3 + $0x1b] sm:$0x1] %v950_v16  ;;  %v902_v30 = vmax.f32 %v880_v22, 0.0  ;;  %v4694_v31 = vpop.f32.mrb[11].mxu0  ;;  %v4734_v32 = vpop.f32.mrb[11].mxu1  ;;  %v955_v34 = vrot.slane %v901_v25, 1  ;;  %v820_v52 = vadd.f32 %v4692_v26, %v5717_v38 }
 0x10f   : > { %v1091_v33 = vld [vmem:[#allocation3] sm:$0x7]  ;;  %953 = vst [vmem:[#allocation3 + $0x4] sm:$0x1] %v901_v25  ;;  %v958_v35 = vrot.slane %v901_v25, 2  ;;  %v961_v36 = vrot.slane %v901_v25, 3  ;;  %v4695_v53 = vadd.f32 %v4694_v31, %v4693_v28  ;;  %v4735_v56 = vadd.f32 %v4734_v32, %v4733_v29 }
 0x110   : > { %v964_v37 = vrot.slane %v901_v25, 4  ;;  %v1092_v39 = vld [vmem:[#allocation3 + $0x8] sm:$0x7]  ;;  %1095 = vst [vmem:[#allocation4] sm:$0x7] %v1091_v33  ;;  %v967_v40 = vrot.slane %v901_v25, 5  ;;  %v885_v62 = vadd.f32 %v4732_v27, %v820_v52 }
 0x111   : > { %v970_v41 = vrot.slane %v901_v25, 6  ;;  %v973_v42 = vrot.slane %v901_v25, 7  ;;  %976 = vst [vmem:[#allocation3 + $0x14] sm:$0x1] %v902_v30  ;;  %v978_v43 = vrot.slane %v902_v30, 1  ;;  %v981_v45 = vrot.slane %v902_v30, 2 }
 0x112   : > { %1096 = vst [vmem:[#allocation4 + $0x8] sm:$0x7] %v1092_v39  ;;  %v1144_v44 = vld [vmem:[#allocation3 + $0x8] sm:$0xe]  ;;  %957 = vst [vmem:[#allocation3 + $0xc] sm:$0x1] %v955_v34  ;;  %v823_v63 = vadd.f32 %v4695_v53, %v5717_v38 }
 0x113   : > { %960 = vst [vmem:[#allocation3 + $0x5] sm:$0x1] %v958_v35  ;;  %963 = vst [vmem:[#allocation3 + $0xd] sm:$0x1] %v961_v36  ;;  %v984_v46 = vrot.slane %v902_v30, 3  ;;  %v987_v47 = vrot.slane %v902_v30, 4 }
 0x114   : > { %966 = vst [vmem:[#allocation3 + $0x6] sm:$0x1] %v964_v37  ;;  %v990_v48 = vrot.slane %v902_v30, 5  ;;  %v1093_v49 = vld [vmem:[#allocation3 + $0x10] sm:$0x7]  ;;  %v993_v50 = vrot.slane %v902_v30, 6  ;;  %v888_v10 = vadd.f32 %v4735_v56, %v823_v63 }
 0x115   : > { %969 = vst [vmem:[#allocation3 + $0xe] sm:$0x1] %v967_v40  ;;  %972 = vst [vmem:[#allocation3 + $0x7] sm:$0x1] %v970_v41  ;;  %v996_v51 = vrot.slane %v902_v30, 7  ;;  %v4696_v57 = vpop.f32.mrb[12].mxu0 }
 0x116   : > { %975 = vst [vmem:[#allocation3 + $0xf] sm:$0x1] %v973_v42  ;;  %980 = vst [vmem:[#allocation3 + $0x1c] sm:$0x1] %v978_v43  ;;  %v1094_v54 = vld [vmem:[#allocation3 + $0x18] sm:$0x7] }
 0x117   : > { %1097 = vst [vmem:[#allocation4 + $0x10] sm:$0x7] %v1093_v49  ;;  %v1146_v55 = vld [vmem:[#allocation3 + $0x18] sm:$0xe]  ;;  %983 = vst [vmem:[#allocation3 + $0x15] sm:$0x1] %v981_v45 }
 0x118   : > { %986 = vst [vmem:[#allocation3 + $0x1d] sm:$0x1] %v984_v46  ;;  %989 = vst [vmem:[#allocation3 + $0x16] sm:$0x1] %v987_v47  ;;  %v4736_v58 = vpop.f32.mrb[12].mxu1  ;;  %v1152_v59 = vrot.slane %v1144_v44, 1 }
 0x119   : > { %992 = vst [vmem:[#allocation3 + $0x1e] sm:$0x1] %v990_v48  ;;  %1098 = vst [vmem:[#allocation4 + $0x18] sm:$0x7] %v1094_v54  ;;  %v1154_v60 = vrot.slane %v1146_v55, 1  ;;  %v4697_v0 = vpop.f32.mrb[13].mxu0 }
 0x11a   : > { %v1143_v61 = vld [vmem:[#allocation3] sm:$0xe]  ;;  %995 = vst [vmem:[#allocation3 + $0x17] sm:$0x1] %v993_v50  ;;  %998 = vst [vmem:[#allocation3 + $0x1f] sm:$0x1] %v996_v51  ;;  %v4698_v4 = vadd.f32 %v4697_v0, %v4696_v57 }
 0x11b   : > { %v4737_v1 = vpop.f32.mrb[13].mxu1  ;;  %v1151_v2 = vrot.slane %v1143_v61, 1  ;;  %v1145_v3 = vld [vmem:[#allocation3 + $0x10] sm:$0xe]  ;;  %v4699_v5 = vpop.f32.mrb[14].mxu0  ;;  %v903_v9 = vmax.f32 %v885_v62, 0.0 }
 0x11c   : > { %v4738_v6 = vadd.f32 %v4737_v1, %v4736_v58  ;;  %v4739_v7 = vpop.f32.mrb[14].mxu1  ;;  %1160 = vst [vmem:[#allocation4 + $0x28] sm:$0x7] %v1152_v59  ;;  %1162 = vst [vmem:[#allocation4 + $0x38] sm:$0x7] %v1154_v60  ;;  %v1153_v8 = vrot.slane %v1145_v3, 1  ;;  %v828_v13 = vadd.f32 %v4698_v4, %v5717_v38 }
 0x11d   : > { %v4700_v11 = vpop.f32.mrb[15].mxu0  ;;  %v4740_v12 = vpop.f32.mrb[15].mxu1  ;;  %1159 = vst [vmem:[#allocation4 + $0x20] sm:$0x7] %v1151_v2  ;;  %999 = vst [vmem:[#allocation3 + $0x20] sm:$0x1] %v903_v9 }
 0x11e   : > { %v4701_v14 = vadd.f32 %v4700_v11, %v4699_v5  ;;  %v4741_v15 = vadd.f32 %v4740_v12, %v4739_v7  ;;  %1161 = vst [vmem:[#allocation4 + $0x30] sm:$0x7] %v1153_v8  ;;  %v1001_v16 = vrot.slane %v903_v9, 1  ;;  %v1004_v17 = vrot.slane %v903_v9, 2  ;;  %v1099_v20 = vld [vmem:[#allocation3] sm:$0x70] }
 0x11f   : > { %v1007_v18 = vrot.slane %v903_v9, 3  ;;  %v1010_v19 = vrot.slane %v903_v9, 4  ;;  %v1013_v21 = vrot.slane %v903_v9, 5  ;;  %v1016_v22 = vrot.slane %v903_v9, 6  ;;  %v1100_v25 = vld [vmem:[#allocation3 + $0x8] sm:$0x70] }
 0x120   : > { %v1019_v23 = vrot.slane %v903_v9, 7  ;;  %v904_v24 = vmax.f32 %v888_v10, 0.0  ;;  %1003 = vst [vmem:[#allocation3 + $0x28] sm:$0x1] %v1001_v16  ;;  %1006 = vst [vmem:[#allocation3 + $0x21] sm:$0x1] %v1004_v17  ;;  %v831_v26 = vadd.f32 %v4701_v14, %v5717_v38  ;;  %v893_v27 = vadd.f32 %v4738_v6, %v828_v13 }
 0x121   : > { %1009 = vst [vmem:[#allocation3 + $0x29] sm:$0x1] %v1007_v18  ;;  %1012 = vst [vmem:[#allocation3 + $0x22] sm:$0x1] %v1010_v19  ;;  %v1108_v28 = vrot.slane %v1100_v25, 1  ;;  %v1107_v29 = vrot.slane %v1099_v20, 1 }
 0x122   : > { %v1102_v30 = vld [vmem:[#allocation3 + $0x18] sm:$0x70]  ;;  %v1164_v31 = vld [vmem:[#allocation3 + $0x8] sm:$0xe0]  ;;  %1015 = vst [vmem:[#allocation3 + $0x2a] sm:$0x1] %v1013_v21  ;;  %v896_v42 = vadd.f32 %v4741_v15, %v831_v26 }
 0x123   : > { %1018 = vst [vmem:[#allocation3 + $0x23] sm:$0x1] %v1016_v22  ;;  %1021 = vst [vmem:[#allocation3 + $0x2b] sm:$0x1] %v1019_v23  ;;  %v1024_v32 = vrot.slane %v904_v24, 1  ;;  %v1027_v33 = vrot.slane %v904_v24, 2 }
 0x124   : > { %1022 = vst [vmem:[#allocation3 + $0x30] sm:$0x1] %v904_v24  ;;  %v1030_v34 = vrot.slane %v904_v24, 3  ;;  %v1033_v35 = vrot.slane %v904_v24, 4  ;;  %v1101_v36 = vld [vmem:[#allocation3 + $0x10] sm:$0x70] }
 0x125   : > { %v1036_v37 = vrot.slane %v904_v24, 5  ;;  %v1039_v39 = vrot.slane %v904_v24, 6  ;;  %v1042_v40 = vrot.slane %v904_v24, 7  ;;  %v905_v41 = vmax.f32 %v893_v27, 0.0  ;;  %1116 = vst [vmem:[#allocation4 + $0x8] sm:$0x38] %v1108_v28 }
 0x126   : > { %1115 = vst [vmem:[#allocation4] sm:$0x38] %v1107_v29  ;;  %v1166_v38 = vld [vmem:[#allocation3 + $0x18] sm:$0xe0]  ;;  %1026 = vst [vmem:[#allocation3 + $0x38] sm:$0x1] %v1024_v32 }
 0x127   : > { %1029 = vst [vmem:[#allocation3 + $0x31] sm:$0x1] %v1027_v33  ;;  %1032 = vst [vmem:[#allocation3 + $0x39] sm:$0x1] %v1030_v34  ;;  %v1110_v43 = vrot.slane %v1102_v30, 1  ;;  %v1172_v44 = vrot.slane %v1164_v31, 2 }
 0x128   : > { %1035 = vst [vmem:[#allocation3 + $0x32] sm:$0x1] %v1033_v35  ;;  %v1109_v45 = vrot.slane %v1101_v36, 1  ;;  %v1163_v46 = vld [vmem:[#allocation3] sm:$0xe0]  ;;  %v1047_v47 = vrot.slane %v905_v41, 1 }
 0x129   : > { %1038 = vst [vmem:[#allocation3 + $0x3a] sm:$0x1] %v1036_v37  ;;  %1041 = vst [vmem:[#allocation3 + $0x33] sm:$0x1] %v1039_v39  ;;  %v1050_v48 = vrot.slane %v905_v41, 2  ;;  %v1053_v49 = vrot.slane %v905_v41, 3 }
 0x12a   : > { %1044 = vst [vmem:[#allocation3 + $0x3b] sm:$0x1] %v1042_v40  ;;  %1045 = vst [vmem:[#allocation3 + $0x24] sm:$0x1] %v905_v41  ;;  %v1056_v50 = vrot.slane %v905_v41, 4  ;;  %v1059_v52 = vrot.slane %v905_v41, 5 }
 0x12b   : > { %v1208_v51 = vld [vmem:[#allocation3 + $0x8] sm:$0x70]  ;;  %v1062_v53 = vrot.slane %v905_v41, 6  ;;  %v1065_v54 = vrot.slane %v905_v41, 7  ;;  %v906_v55 = vmax.f32 %v896_v42, 0.0  ;;  %v1174_v57 = vrot.slane %v1166_v38, 2 }
 0x12c   : > { %1118 = vst [vmem:[#allocation4 + $0x18] sm:$0x38] %v1110_v43  ;;  %1180 = vst [vmem:[#allocation4 + $0x28] sm:$0x38] %v1172_v44  ;;  %v1165_v56 = vld [vmem:[#allocation3 + $0x10] sm:$0xe0] }
 0x12d   : > { %1117 = vst [vmem:[#allocation4 + $0x10] sm:$0x38] %v1109_v45  ;;  %1049 = vst [vmem:[#allocation3 + $0x2c] sm:$0x1] %v1047_v47  ;;  %v1171_v58 = vrot.slane %v1163_v46, 2  ;;  %v1216_v59 = vrot.slane %v1208_v51, 4 }
 0x12e   : > { %1052 = vst [vmem:[#allocation3 + $0x25] sm:$0x1] %v1050_v48  ;;  %1055 = vst [vmem:[#allocation3 + $0x2d] sm:$0x1] %v1053_v49  ;;  %v1173_v60 = vrot.slane %v1165_v56, 2  ;;  %v1070_v62 = vrot.slane %v906_v55, 1 }
 0x12f   : > { %1058 = vst [vmem:[#allocation3 + $0x26] sm:$0x1] %v1056_v50  ;;  %v1210_v61 = vld [vmem:[#allocation3 + $0x18] sm:$0x70]  ;;  %1061 = vst [vmem:[#allocation3 + $0x2e] sm:$0x1] %v1059_v52 }
 0x130   : > { %1064 = vst [vmem:[#allocation3 + $0x27] sm:$0x1] %v1062_v53  ;;  %1067 = vst [vmem:[#allocation3 + $0x2f] sm:$0x1] %v1065_v54  ;;  %v1073_v63 = vrot.slane %v906_v55, 2  ;;  %v1076_v0 = vrot.slane %v906_v55, 3 }
 0x131   : > { %1068 = vst [vmem:[#allocation3 + $0x34] sm:$0x1] %v906_v55  ;;  %v1079_v1 = vrot.slane %v906_v55, 4  ;;  %v1119_v2 = vld [vmem:[#allocation3 + $0x20] sm:$0x7]  ;;  %v1082_v3 = vrot.slane %v906_v55, 5 }
 0x132   : > { %v1085_v4 = vrot.slane %v906_v55, 6  ;;  %v1088_v5 = vrot.slane %v906_v55, 7  ;;  %v1120_v6 = vld [vmem:[#allocation3 + $0x28] sm:$0x7]  ;;  %v1127_v7 = vrot.slane %v1119_v2, 2  ;;  %v1218_v11 = vrot.slane %v1210_v61, 4 }
 0x133   : > { %1182 = vst [vmem:[#allocation4 + $0x38] sm:$0x38] %v1174_v57  ;;  %1179 = vst [vmem:[#allocation4 + $0x20] sm:$0x38] %v1171_v58  ;;  %v1128_v8 = vrot.slane %v1120_v6, 2  ;;  %v5159_v50 = vld [vmem:[%s6498_s3 + $0x100] sm:$0xff]  }
 0x134   : > { %1224 = vst [vmem:[#allocation4 + $0x48] sm:$0x7] %v1216_v59  ;;  %1181 = vst [vmem:[#allocation4 + $0x30] sm:$0x38] %v1173_v60  ;;  %v1184_v9 = vld [vmem:[#allocation3 + $0x28] sm:$0xe] }
 0x135   : > { %1072 = vst [vmem:[#allocation3 + $0x3c] sm:$0x1] %v1070_v62  ;;  %1075 = vst [vmem:[#allocation3 + $0x35] sm:$0x1] %v1073_v63  ;;  %v1183_v10 = vld [vmem:[#allocation3 + $0x20] sm:$0xe] }
 0x136   : > { %1078 = vst [vmem:[#allocation3 + $0x3d] sm:$0x1] %v1076_v0  ;;  %1081 = vst [vmem:[#allocation3 + $0x36] sm:$0x1] %v1079_v1  ;;  %v1192_v12 = vrot.slane %v1184_v9, 3  ;;  %v1191_v14 = vrot.slane %v1183_v10, 3 }
 0x137   : > { %1084 = vst [vmem:[#allocation3 + $0x3e] sm:$0x1] %v1082_v3  ;;  %1087 = vst [vmem:[#allocation3 + $0x37] sm:$0x1] %v1085_v4  ;;  %v1121_v13 = vld [vmem:[#allocation3 + $0x30] sm:$0x7] }
 0x138   : > { %1090 = vst [vmem:[#allocation3 + $0x3f] sm:$0x1] %v1088_v5  ;;  %1135 = vst [vmem:[#allocation4 + $0x80] ss:$-124 sps:$4 sm:$0xc1] %v1127_v7   ;;  %v1129_v17 = vrot.slane %v1121_v13, 2 }
 0x139   : > { %v1228_v15 = vld [vmem:[#allocation3 + $0x28] sm:$0x7]  ;;  %1136 = vst [vmem:[#allocation4 + $0x88] ss:$-124 sps:$4 sm:$0xc1] %v1128_v8   ;;  %v5161_v55 = vld [vmem:[%s6498_s3 + $0x180] sm:$0xff]  }
 0x13a   : > { %v1122_v16 = vld [vmem:[#allocation3 + $0x38] sm:$0x7]  ;;  %v1236_v19 = vrot.slane %v1228_v15, 5  ;;  %1226 = vst [vmem:[#allocation4 + $0x58] sm:$0x7] %v1218_v11  ;;  %v5162_v56 = vld [vmem:[%s6498_s3 + $0x148] sm:$0xff]  }
 0x13b   : > { %v1186_v18 = vld [vmem:[#allocation3 + $0x38] sm:$0xe]  ;;  %v1130_v20 = vrot.slane %v1122_v16, 2  ;;  %1200 = vst [vmem:[#allocation4 + $0xa8] ss:$-124 sps:$4 sm:$0xc1] %v1192_v12  }
 0x13c   : > { %v1194_v21 = vrot.slane %v1186_v18, 3  ;;  %1199 = vst [vmem:[#allocation4 + $0xa0] ss:$-124 sps:$4 sm:$0xc1] %v1191_v14   ;;  %v1185_v22 = vld [vmem:[#allocation3 + $0x30] sm:$0xe] }
 0x13d   : > { %v1230_v23 = vld [vmem:[#allocation3 + $0x38] sm:$0x7]  ;;  %1137 = vst [vmem:[#allocation4 + $0x90] ss:$-124 sps:$4 sm:$0xc1] %v1129_v17   ;;  %v1193_v24 = vrot.slane %v1185_v22, 3 }
 0x13e   : > { %1244 = vst [vmem:[#allocation4 + $0x48] sm:$0x38] %v1236_v19  ;;  %v1238_v25 = vrot.slane %v1230_v23, 5  ;;  %v1207_v26 = vld [vmem:[#allocation3] sm:$0x70]  ;;  %v5163_v0 = vld [vmem:[%s6498_s3 + $0x108] sm:$0xff]  }
 0x13f   : > { %v1227_v27 = vld [vmem:[#allocation3 + $0x20] sm:$0x7]  ;;  %1138 = vst [vmem:[#allocation4 + $0x98] ss:$-124 sps:$4 sm:$0xc1] %v1130_v20   ;;  %v1215_v29 = vrot.slane %v1207_v26, 4 }
 0x140   : > { %1202 = vst [vmem:[#allocation4 + $0xb8] ss:$-124 sps:$4 sm:$0xc1] %v1194_v21   ;;  %v1248_v28 = vld [vmem:[#allocation3 + $0x28] sm:$0x70]  ;;  %v1235_v30 = vrot.slane %v1227_v27, 5 }
 0x141   : > { %v1247_v31 = vld [vmem:[#allocation3 + $0x20] sm:$0x70]  ;;  %v1256_v32 = vrot.slane %v1248_v28, 6  ;;  %1201 = vst [vmem:[#allocation4 + $0xb0] ss:$-124 sps:$4 sm:$0xc1] %v1193_v24  }
 0x142   : > { %1246 = vst [vmem:[#allocation4 + $0x58] sm:$0x38] %v1238_v25  ;;  %v1255_v33 = vrot.slane %v1247_v31, 6  ;;  %v1272_v34 = vld [vmem:[#allocation3 + $0x8] sm:$0xe0]  ;;  %v1335_v41 = vld [vmem:[#allocation4] sm:$0xff] }
 0x143   : > { %v1292_v35 = vld [vmem:[#allocation3 + $0x28] sm:$0xe]  ;;  %1223 = vst [vmem:[#allocation4 + $0x40] sm:$0x7] %v1215_v29  ;;  %1243 = vst [vmem:[#allocation4 + $0x40] sm:$0x38] %v1235_v30 }
 0x144   : > { %v1280_v36 = vrot.slane %v1272_v34, 5  ;;  %v1300_v37 = vrot.slane %v1292_v35, 6  ;;  %v1312_v39 = vld [vmem:[#allocation3 + $0x28] sm:$0xe0]  ;;  %v1209_v40 = vld [vmem:[#allocation3 + $0x10] sm:$0x70] }
 0x145   : > { %v1351_v38 = vld [vmem:[#allocation4 + $0x80] sm:$0x1]  ;;  %1264 = vst [vmem:[#allocation4 + $0xc8] ss:$-124 sps:$4 sm:$0xc1] %v1256_v32   ;;  %v1320_v43 = vrot.slane %v1312_v39, 7 }
 0x146   : > { %v1250_v42 = vld [vmem:[#allocation3 + $0x38] sm:$0x70]  ;;  %1263 = vst [vmem:[#allocation4 + $0xc0] ss:$-124 sps:$4 sm:$0xc1] %v1255_v33   ;;  %v1336_v44 = vld [vmem:[#allocation4 + $0x8] sm:$0xff]  ;;  %v1367_v46 = vpack.c.bf16 %v1351_v38, %v1335_v41 }
 0x147   : > { %v1352_v45 = vld [vmem:[#allocation4 + $0x88] sm:$0x1]  ;;  %v1258_v47 = vrot.slane %v1250_v42, 6  ;;  %1288 = vst [vmem:[#allocation4 + $0x68] sm:$0x7] %v1280_v36  ;;  %v1217_v48 = vrot.slane %v1209_v40, 4 }
 0x148   : > { %1308 = vst [vmem:[#allocation4 + $0x68] sm:$0x38] %v1300_v37  ;;  %v1368_v49 = vpack.c.bf16 %v1352_v45, %v1336_v44  ;;  %v1340_v51 = vld [vmem:[#allocation4 + $0x28] sm:$0xff]  ;;  %1328 = vst [vmem:[#allocation4 + $0xe8] ss:$-124 sps:$4 sm:$0xc1] %v1320_v43  }
 0x149   : > { %v1356_v52 = vld [vmem:[#allocation4 + $0xa8] sm:$0x1]  ;;  %v1337_v53 = vld [vmem:[#allocation4 + $0x10] sm:$0xff]  ;;  %1266 = vst [vmem:[#allocation4 + $0xd8] ss:$-124 sps:$4 sm:$0xc1] %v1258_v47  }
 0x14a   : > { %v1353_v54 = vld [vmem:[#allocation4 + $0x90] sm:$0x1]  ;;  %1225 = vst [vmem:[#allocation4 + $0x50] sm:$0x7] %v1217_v48  ;;  %2446 = vmatprep.mubr.bf16.mxu0 %v1368_v49  ;;  %v1338_v57 = vld [vmem:[#allocation4 + $0x18] sm:$0xff]  ;;  %v1372_v59 = vpack.c.bf16 %v1356_v52, %v1340_v51  ;;  %v5164_v1 = vld [vmem:[%s6498_s3 + $0x1c8] sm:$0xff]  }
 0x14b   : > { %v1354_v58 = vld [vmem:[#allocation4 + $0x98] sm:$0x1]  ;;  %v1369_v60 = vpack.c.bf16 %v1353_v54, %v1337_v53  ;;  %2447 = vmatmul.mubr.bf16.vlgmr.msra.gmra.mrb[16].mxu0 %v1367_v46  ;;  %v1229_v2 = vld [vmem:[#allocation3 + $0x30] sm:$0x7]  ;;  %v1249_v3 = vld [vmem:[#allocation3 + $0x30] sm:$0x70] }
 0x14c   : > { %v1342_v61 = vld [vmem:[#allocation4 + $0x38] sm:$0xff]  ;;  %v1370_v62 = vpack.c.bf16 %v1354_v58, %v1338_v57  ;;  %4787 = vmatpush3.bf16.msra.mxu0 %v5159_v50  ;;  %2528 = vmatprep.mubr.bf16.mxu0 %v1372_v59  ;;  %v5166_v6 = vld [vmem:[%s6498_s3 + $0x150] sm:$0xff]   ;;  %v1237_v7 = vrot.slane %v1229_v2, 5  ;;  %v1257_v8 = vrot.slane %v1249_v3, 6  ;;  %v5165_v11 = vld [vmem:[%s6498_s3 + $0x188] sm:$0xff]  }
 0x14d   : > { %v1358_v63 = vld [vmem:[#allocation4 + $0xb8] sm:$0x1]  ;;  %v1274_v4 = vld [vmem:[#allocation3 + $0x18] sm:$0xe0]  ;;  %4788 = vmatprep.subr.bf16.mxu0 %v5162_v56  ;;  %v1294_v10 = vld [vmem:[#allocation3 + $0x38] sm:$0xe] }
 0x14e   : > { %2487 = vmatprep.mubr.bf16.mxu1 %v1370_v62  ;;  %v1374_v5 = vpack.c.bf16 %v1358_v63, %v1342_v61  ;;  %v1282_v9 = vrot.slane %v1274_v4, 5  ;;  %1245 = vst [vmem:[#allocation4 + $0x50] sm:$0x38] %v1237_v7  ;;  %1265 = vst [vmem:[#allocation4 + $0xd0] ss:$-124 sps:$4 sm:$0xc1] %v1257_v8  }
 0x14f   : > { %2488 = vmatmul.mubr.bf16.vlgmr.msra.gmra.mrb[16].mxu1 %v1369_v60  ;;  %v1302_v12 = vrot.slane %v1294_v10, 6  ;;  %v1314_v13 = vld [vmem:[#allocation3 + $0x38] sm:$0xe0]  ;;  %v5167_v14 = vld [vmem:[%s6498_s3 + $0x110] sm:$0xff]   ;;  %v1271_v17 = vld [vmem:[#allocation3] sm:$0xe0] }
 0x150   : > { %4809 = vmatpush3.bf16.msra.mxu1 %v5161_v55  ;;  %2569 = vmatprep.mubr.bf16.mxu1 %v1374_v5  ;;  %v5168_v15 = vld [vmem:[%s6498_s3 + $0x1d0] sm:$0xff]   ;;  %1290 = vst [vmem:[#allocation4 + $0x78] sm:$0x7] %v1282_v9  ;;  %v1322_v16 = vrot.slane %v1314_v13, 7  ;;  %v5170_v18 = vld [vmem:[%s6498_s3 + $0x158] sm:$0xff]   ;;  %v1279_v19 = vrot.slane %v1271_v17, 5 }
 0x151   : > { %4789 = vmatpush3.bf16.msra.mxu0 %v5163_v0  ;;  %4810 = vmatprep.subr.bf16.mxu1 %v5164_v1  ;;  %1310 = vst [vmem:[#allocation4 + $0x78] sm:$0x38] %v1302_v12  ;;  %v1291_v20 = vld [vmem:[#allocation3 + $0x20] sm:$0xe]  ;;  %v1311_v21 = vld [vmem:[#allocation3 + $0x20] sm:$0xe0] }
 0x152   : > { %4790 = vmatprep.subr.bf16.mxu0 %v5166_v6  ;;  %1330 = vst [vmem:[#allocation4 + $0xf8] ss:$-124 sps:$4 sm:$0xc1] %v1322_v16   ;;  %v1299_v22 = vrot.slane %v1291_v20, 6  ;;  %v1319_v23 = vrot.slane %v1311_v21, 7  ;;  %v5169_v26 = vld [vmem:[%s6498_s3 + $0x190] sm:$0xff]  }
 0x153   : > { %v1273_v24 = vld [vmem:[#allocation3 + $0x10] sm:$0xe0]  ;;  %v1293_v25 = vld [vmem:[#allocation3 + $0x30] sm:$0xe]  ;;  %1287 = vst [vmem:[#allocation4 + $0x60] sm:$0x7] %v1279_v19 }
 0x154   : > { %4811 = vmatpush3.bf16.msra.mxu1 %v5165_v11  ;;  %v1281_v27 = vrot.slane %v1273_v24, 5  ;;  %v1301_v28 = vrot.slane %v1293_v25, 6  ;;  %v1313_v29 = vld [vmem:[#allocation3 + $0x30] sm:$0xe0]  ;;  %v5171_v30 = vld [vmem:[%s6498_s3 + $0x118] sm:$0xff]   ;;  %v5174_v33 = vld [vmem:[%s6498_s3 + $0x160] sm:$0xff]  }
 0x155   : > { %4791 = vmatpush3.bf16.msra.mxu0 %v5167_v14  ;;  %4812 = vmatprep.subr.bf16.mxu1 %v5168_v15  ;;  %v5172_v31 = vld [vmem:[%s6498_s3 + $0x1d8] sm:$0xff]   ;;  %1307 = vst [vmem:[#allocation4 + $0x60] sm:$0x38] %v1299_v22  ;;  %1327 = vst [vmem:[#allocation4 + $0xe0] ss:$-124 sps:$4 sm:$0xc1] %v1319_v23  }
 0x156   : > { %v1321_v32 = vrot.slane %v1313_v29, 7  ;;  %4792 = vmatprep.subr.bf16.mxu0 %v5170_v18  ;;  %1289 = vst [vmem:[#allocation4 + $0x70] sm:$0x7] %v1281_v27  ;;  %1309 = vst [vmem:[#allocation4 + $0x70] sm:$0x38] %v1301_v28  ;;  %v5173_v34 = vld [vmem:[%s6498_s3 + $0x198] sm:$0xff]  }
 0x157   : > { %v5175_v35 = vld [vmem:[%s6498_s3 + $0x120] sm:$0xff]   ;;  %v5178_v37 = vld [vmem:[%s6498_s3 + $0x168] sm:$0xff]   ;;  %v5182_v38 = vld [vmem:[%s6498_s3 + $0x170] sm:$0xff]  }
 0x158   : > { %1329 = vst [vmem:[#allocation4 + $0xf0] ss:$-124 sps:$4 sm:$0xc1] %v1321_v32   ;;  %4813 = vmatpush3.bf16.msra.mxu1 %v5169_v26  ;;  %v5176_v36 = vld [vmem:[%s6498_s3 + $0x1e0] sm:$0xff]   ;;  %v5179_v40 = vld [vmem:[%s6498_s3 + $0x128] sm:$0xff]   ;;  %v5183_v43 = vld [vmem:[%s6498_s3 + $0x130] sm:$0xff]  }
 0x159   : > { %4793 = vmatpush3.bf16.msra.mxu0 %v5171_v30  ;;  %4814 = vmatprep.subr.bf16.mxu1 %v5172_v31  ;;  %v5177_v39 = vld [vmem:[%s6498_s3 + $0x1a0] sm:$0xff]   ;;  %v5180_v41 = vld [vmem:[%s6498_s3 + $0x1e8] sm:$0xff]   ;;  %v5184_v44 = vld [vmem:[%s6498_s3 + $0x1f0] sm:$0xff]  }
 0x15a   : > { %4794 = vmatprep.subr.bf16.mxu0 %v5174_v33  ;;  %v5181_v42 = vld [vmem:[%s6498_s3 + $0x1a8] sm:$0xff]   ;;  %v5186_v45 = vld [vmem:[%s6498_s3 + $0x178] sm:$0xff]   ;;  %v5185_v46 = vld [vmem:[%s6498_s3 + $0x1b0] sm:$0xff]  }
 0x15b   : > { %v5187_v47 = vld [vmem:[%s6498_s3 + $0x138] sm:$0xff]   ;;  %v5190_v49 = vld [vmem:[%s6498_s3 + $0x240] sm:$0xff]   ;;  %v1344_v53 = vld [vmem:[#allocation4 + $0x48] sm:$0xff] }
 0x15c   : > { %4815 = vmatpush3.bf16.msra.mxu1 %v5173_v34  ;;  %v5188_v48 = vld [vmem:[%s6498_s3 + $0x1f8] sm:$0xff]   ;;  %v1339_v50 = vld [vmem:[#allocation4 + $0x20] sm:$0xff]  ;;  %v1360_v54 = vld [vmem:[#allocation4 + $0xc8] sm:$0x1] }
 0x15d   : > { %4795 = vmatpush3.bf16.msra.mxu0 %v5175_v35  ;;  %4816 = vmatprep.subr.bf16.mxu1 %v5176_v36  ;;  %v1355_v51 = vld [vmem:[#allocation4 + $0xa0] sm:$0x1]  ;;  %v5189_v52 = vld [vmem:[%s6498_s3 + $0x1b8] sm:$0xff]   ;;  %v1341_v58 = vld [vmem:[#allocation4 + $0x30] sm:$0xff]  ;;  %v1376_v61 = vpack.c.bf16 %v1360_v54, %v1344_v53 }
 0x15e   : > { %4796 = vmatprep.subr.bf16.mxu0 %v5178_v37  ;;  %v5191_v55 = vld [vmem:[%s6498_s3 + $0x200] sm:$0xff]   ;;  %v1371_v57 = vpack.c.bf16 %v1355_v51, %v1339_v50  ;;  %v1357_v59 = vld [vmem:[#allocation4 + $0xb0] sm:$0x1]  ;;  %v5194_v60 = vld [vmem:[%s6498_s3 + $0x248] sm:$0xff]  }
 0x15f   : > { %v5192_v56 = vld [vmem:[%s6498_s3 + $0x2c0] sm:$0xff]   ;;  %v1346_v62 = vld [vmem:[#allocation4 + $0x58] sm:$0xff]  ;;  %v1373_v1 = vpack.c.bf16 %v1357_v59, %v1341_v58  ;;  %v5195_v2 = vld [vmem:[%s6498_s3 + $0x208] sm:$0xff]  }
 0x160   : > { %4817 = vmatpush3.bf16.msra.mxu1 %v5177_v39  ;;  %v1362_v63 = vld [vmem:[#allocation4 + $0xd8] sm:$0x1]  ;;  %v5193_v0 = vld [vmem:[%s6498_s3 + $0x280] sm:$0xff]   ;;  %v5196_v3 = vld [vmem:[%s6498_s3 + $0x2c8] sm:$0xff]  }
 0x161   : > { %4797 = vmatpush3.bf16.msra.mxu0 %v5179_v40  ;;  %4818 = vmatprep.subr.bf16.mxu1 %v5180_v41  ;;  %v1378_v4 = vpack.c.bf16 %v1362_v63, %v1346_v62  ;;  %v5198_v5 = vld [vmem:[%s6498_s3 + $0x250] sm:$0xff]   ;;  %v5197_v6 = vld [vmem:[%s6498_s3 + $0x288] sm:$0xff]   ;;  %v5202_v9 = vld [vmem:[%s6498_s3 + $0x258] sm:$0xff]  }
 0x162   : > { %4798 = vmatprep.subr.bf16.mxu0 %v5182_v38  ;;  %v5199_v7 = vld [vmem:[%s6498_s3 + $0x210] sm:$0xff]   ;;  %v5203_v11 = vld [vmem:[%s6498_s3 + $0x218] sm:$0xff]   ;;  %v5206_v13 = vld [vmem:[%s6498_s3 + $0x260] sm:$0xff]  }
 0x163   : > { %v5200_v8 = vld [vmem:[%s6498_s3 + $0x2d0] sm:$0xff]   ;;  %v5204_v12 = vld [vmem:[%s6498_s3 + $0x2d8] sm:$0xff]   ;;  %v5207_v15 = vld [vmem:[%s6498_s3 + $0x220] sm:$0xff]  }
 0x164   : > { %4819 = vmatpush3.bf16.msra.mxu1 %v5181_v42  ;;  %v5201_v10 = vld [vmem:[%s6498_s3 + $0x290] sm:$0xff]   ;;  %v5205_v14 = vld [vmem:[%s6498_s3 + $0x298] sm:$0xff]   ;;  %v5208_v16 = vld [vmem:[%s6498_s3 + $0x2e0] sm:$0xff]  }
 0x165   : > { %4799 = vmatpush3.bf16.msra.mxu0 %v5183_v43  ;;  %4820 = vmatprep.subr.bf16.mxu1 %v5184_v44  ;;  %v5210_v17 = vld [vmem:[%s6498_s3 + $0x268] sm:$0xff]   ;;  %v5209_v18 = vld [vmem:[%s6498_s3 + $0x2a0] sm:$0xff]   ;;  %v5214_v21 = vld [vmem:[%s6498_s3 + $0x270] sm:$0xff]  }
 0x166   : > { %4800 = vmatprep.subr.bf16.mxu0 %v5186_v45  ;;  %v5211_v19 = vld [vmem:[%s6498_s3 + $0x228] sm:$0xff]   ;;  %v5215_v23 = vld [vmem:[%s6498_s3 + $0x230] sm:$0xff]   ;;  %v5218_v25 = vld [vmem:[%s6498_s3 + $0x278] sm:$0xff]  }
 0x167   : > { %v5212_v20 = vld [vmem:[%s6498_s3 + $0x2e8] sm:$0xff]   ;;  %v5216_v24 = vld [vmem:[%s6498_s3 + $0x2f0] sm:$0xff]   ;;  %v5219_v27 = vld [vmem:[%s6498_s3 + $0x238] sm:$0xff]  }
 0x168   : > { %4821 = vmatpush3.bf16.msra.mxu1 %v5185_v46  ;;  %v5213_v22 = vld [vmem:[%s6498_s3 + $0x2a8] sm:$0xff]   ;;  %v5217_v26 = vld [vmem:[%s6498_s3 + $0x2b0] sm:$0xff]   ;;  %v5220_v28 = vld [vmem:[%s6498_s3 + $0x2f8] sm:$0xff]  }
 0x169   : > { %4801 = vmatpush3.bf16.msra.mxu0 %v5187_v47  ;;  %4822 = vmatprep.subr.bf16.mxu1 %v5188_v48  ;;  %v5222_v29 = vld [vmem:[%s6498_s3 + $0x340] sm:$0xff]   ;;  %v5221_v32 = vld [vmem:[%s6498_s3 + $0x2b8] sm:$0xff]   ;;  %v1348_v33 = vld [vmem:[#allocation4 + $0x68] sm:$0xff] }
 0x16a   : > { %4830 = vmatprep.subr.bf16.mxu0 %v5190_v49  ;;  %v1343_v30 = vld [vmem:[#allocation4 + $0x40] sm:$0xff]  ;;  %v1364_v34 = vld [vmem:[#allocation4 + $0xe8] sm:$0x1]  ;;  %v1345_v39 = vld [vmem:[#allocation4 + $0x50] sm:$0xff] }
 0x16b   : > { %v1359_v31 = vld [vmem:[#allocation4 + $0xc0] sm:$0x1]  ;;  %v1361_v40 = vld [vmem:[#allocation4 + $0xd0] sm:$0x1]  ;;  %v5226_v41 = vld [vmem:[%s6498_s3 + $0x348] sm:$0xff]   ;;  %v1380_v38 = vpack.c.bf16 %v1364_v34, %v1348_v33 }
 0x16c   : > { %4823 = vmatpush3.bf16.msra.mxu1 %v5189_v52  ;;  %2529 = vmatmul.mubr.bf16.vlgmr.msra.gmra.mrb[20].mxu0 %v1371_v57  ;;  %v5223_v35 = vld [vmem:[%s6498_s3 + $0x300] sm:$0xff]   ;;  %v1375_v37 = vpack.c.bf16 %v1359_v31, %v1343_v30  ;;  %v1350_v42 = vld [vmem:[#allocation4 + $0x78] sm:$0xff]  ;;  %v1377_v45 = vpack.c.bf16 %v1361_v40, %v1345_v39  ;;  %v5227_v46 = vld [vmem:[%s6498_s3 + $0x308] sm:$0xff]  }
 0x16d   : > { %4831 = vmatpush3.bf16.msra.mxu0 %v5191_v55  ;;  %2610 = vmatprep.mubr.bf16.mxu0 %v1376_v61  ;;  %v5224_v36 = vld [vmem:[%s6498_s3 + $0x3c0] sm:$0xff]   ;;  %v1366_v43 = vld [vmem:[#allocation4 + $0xf8] sm:$0x1]  ;;  %v5228_v47 = vld [vmem:[%s6498_s3 + $0x3c8] sm:$0xff]  }
 0x16e   : > { %4852 = vmatprep.subr.bf16.mxu1 %v5192_v56  ;;  %4832 = vmatprep.subr.bf16.mxu0 %v5194_v60  ;;  %v5225_v44 = vld [vmem:[%s6498_s3 + $0x380] sm:$0xff]   ;;  %v1382_v48 = vpack.c.bf16 %v1366_v43, %v1350_v42  ;;  %v5230_v49 = vld [vmem:[%s6498_s3 + $0x350] sm:$0xff]   ;;  %v5229_v50 = vld [vmem:[%s6498_s3 + $0x388] sm:$0xff]  }
 0x16f   : > { %2570 = vmatmul.mubr.bf16.vlgmr.msra.gmra.mrb[20].mxu1 %v1373_v1  ;;  %v5231_v51 = vld [vmem:[%s6498_s3 + $0x310] sm:$0xff]   ;;  %v5234_v53 = vld [vmem:[%s6498_s3 + $0x358] sm:$0xff]   ;;  %v5238_v57 = vld [vmem:[%s6498_s3 + $0x360] sm:$0xff]  }
 0x170   : > { %4853 = vmatpush3.bf16.msra.mxu1 %v5193_v0  ;;  %2651 = vmatprep.mubr.bf16.mxu1 %v1378_v4  ;;  %v5232_v52 = vld [vmem:[%s6498_s3 + $0x3d0] sm:$0xff]   ;;  %v5235_v55 = vld [vmem:[%s6498_s3 + $0x318] sm:$0xff]   ;;  %v5239_v59 = vld [vmem:[%s6498_s3 + $0x320] sm:$0xff]  }
 0x171   : > { %4833 = vmatpush3.bf16.msra.mxu0 %v5195_v2  ;;  %4854 = vmatprep.subr.bf16.mxu1 %v5196_v3  ;;  %v5233_v54 = vld [vmem:[%s6498_s3 + $0x390] sm:$0xff]   ;;  %v5236_v56 = vld [vmem:[%s6498_s3 + $0x3d8] sm:$0xff]   ;;  %v5240_v60 = vld [vmem:[%s6498_s3 + $0x3e0] sm:$0xff]  }
 0x172   : > { %4834 = vmatprep.subr.bf16.mxu0 %v5198_v5  ;;  %v5237_v58 = vld [vmem:[%s6498_s3 + $0x398] sm:$0xff]   ;;  %v5242_v61 = vld [vmem:[%s6498_s3 + $0x368] sm:$0xff]   ;;  %v5241_v62 = vld [vmem:[%s6498_s3 + $0x3a0] sm:$0xff]  }
 0x173   : > { %v5243_v63 = vld [vmem:[%s6498_s3 + $0x328] sm:$0xff]   ;;  %v5246_v1 = vld [vmem:[%s6498_s3 + $0x370] sm:$0xff]   ;;  %v5250_v5 = vld [vmem:[%s6498_s3 + $0x378] sm:$0xff]  }
 0x174   : > { %4855 = vmatpush3.bf16.msra.mxu1 %v5197_v6  ;;  %v5244_v0 = vld [vmem:[%s6498_s3 + $0x3e8] sm:$0xff]   ;;  %v5247_v3 = vld [vmem:[%s6498_s3 + $0x330] sm:$0xff]   ;;  %v5268_v30 = vld [vmem:[%s6500_s5 + $0x18] sm:$0xff]  }
 0x175   : > { %4835 = vmatpush3.bf16.msra.mxu0 %v5199_v7  ;;  %4856 = vmatprep.subr.bf16.mxu1 %v5200_v8  ;;  %v5245_v2 = vld [vmem:[%s6498_s3 + $0x3a8] sm:$0xff]   ;;  %v5248_v4 = vld [vmem:[%s6498_s3 + $0x3f0] sm:$0xff]   ;;  %v5251_v7 = vld [vmem:[%s6498_s3 + $0x338] sm:$0xff]  }
 0x176   : > { %4836 = vmatprep.subr.bf16.mxu0 %v5202_v9  ;;  %v5249_v6 = vld [vmem:[%s6498_s3 + $0x3b0] sm:$0xff]   ;;  %v5252_v8 = vld [vmem:[%s6498_s3 + $0x3f8] sm:$0xff]   ;;  %v1347_v9 = vld [vmem:[#allocation4 + $0x60] sm:$0xff] }
 0x177   : > { %v5269_v31 = vld [vmem:[%s6500_s5 + $0x98] sm:$0xff]   ;;  %v5271_v33 = vld [vmem:[%s6500_s5 + $0xe0] sm:$0xff]   ;;  %v5275_v39 = vld [vmem:[%s6500_s5 + $0xe8] sm:$0xff]  }
 0x178   : > { %4857 = vmatpush3.bf16.msra.mxu1 %v5201_v10  ;;  %v1363_v10 = vld [vmem:[#allocation4 + $0xe0] sm:$0x1] }
 0x179   : > { %4837 = vmatpush3.bf16.msra.mxu0 %v5203_v11  ;;  %4858 = vmatprep.subr.bf16.mxu1 %v5204_v12  ;;  %v5253_v11 = vld [vmem:[%s6498_s3 + $0x3b8] sm:$0xff]   ;;  %v1379_v12 = vpack.c.bf16 %v1363_v10, %v1347_v9  ;;  %v5272_v34 = vld [vmem:[%s6500_s5 + $0x20] sm:$0xff]  }
 0x17a   : > { %4838 = vmatprep.subr.bf16.mxu0 %v5206_v13  ;;  %v1349_v13 = vld [vmem:[#allocation4 + $0x70] sm:$0xff]  ;;  %v4394_v40 = vld [vmem:[%s6499_s4] ss:$0 sm:$0xff] }
 0x17c   : > { %4859 = vmatpush3.bf16.msra.mxu1 %v5205_v14  ;;  %v1365_v14 = vld [vmem:[#allocation4 + $0xf0] sm:$0x1] }
 0x17d   : > { %4839 = vmatpush3.bf16.msra.mxu0 %v5207_v15  ;;  %4860 = vmatprep.subr.bf16.mxu1 %v5208_v16  ;;  %v1381_v15 = vpack.c.bf16 %v1365_v14, %v1349_v13  ;;  %v5254_v16 = vld [vmem:[%s6500_s5 + $0x40] sm:$0xff]  }
 0x17e   : > { %4840 = vmatprep.subr.bf16.mxu0 %v5210_v17  ;;  %v5255_v17 = vld [vmem:[%s6500_s5 + $0xc0] sm:$0xff]  }
 0x180   : > { %4861 = vmatpush3.bf16.msra.mxu1 %v5209_v18  ;;  %v5256_v18 = vld [vmem:[%s6500_s5] sm:$0xff]  }
 0x181   : > { %4841 = vmatpush3.bf16.msra.mxu0 %v5211_v19  ;;  %4862 = vmatprep.subr.bf16.mxu1 %v5212_v20  ;;  %v5257_v19 = vld [vmem:[%s6500_s5 + $0x80] sm:$0xff]   ;;  %v5258_v20 = vld [vmem:[%s6500_s5 + $0x48] sm:$0xff]  }
 0x182   : > { %4842 = vmatprep.subr.bf16.mxu0 %v5214_v21  ;;  %v5259_v21 = vld [vmem:[%s6500_s5 + $0xc8] sm:$0xff]  }
 0x184   : > { %4863 = vmatpush3.bf16.msra.mxu1 %v5213_v22  ;;  %v5260_v22 = vld [vmem:[%s6500_s5 + $0x8] sm:$0xff]  }
 0x185   : > { %4843 = vmatpush3.bf16.msra.mxu0 %v5215_v23  ;;  %4864 = vmatprep.subr.bf16.mxu1 %v5216_v24  ;;  %v5261_v23 = vld [vmem:[%s6500_s5 + $0x88] sm:$0xff]   ;;  %v5262_v24 = vld [vmem:[%s6500_s5 + $0x50] sm:$0xff]  }
 0x186   : > { %4844 = vmatprep.subr.bf16.mxu0 %v5218_v25  ;;  %v5263_v25 = vld [vmem:[%s6500_s5 + $0xd0] sm:$0xff]  }
 0x188   : > { %4865 = vmatpush3.bf16.msra.mxu1 %v5217_v26  ;;  %v5264_v26 = vld [vmem:[%s6500_s5 + $0x10] sm:$0xff]  }
 0x189   : > { %4845 = vmatpush3.bf16.msra.mxu0 %v5219_v27  ;;  %4866 = vmatprep.subr.bf16.mxu1 %v5220_v28  ;;  %v5265_v27 = vld [vmem:[%s6500_s5 + $0x90] sm:$0xff]   ;;  %v5266_v28 = vld [vmem:[%s6500_s5 + $0x58] sm:$0xff]  }
 0x18a   : > { %4874 = vmatprep.subr.bf16.mxu0 %v5222_v29  ;;  %v5267_v29 = vld [vmem:[%s6500_s5 + $0xd8] sm:$0xff]  }
 0x18c   : > { %4867 = vmatpush3.bf16.msra.mxu1 %v5221_v32  ;;  %2611 = vmatmul.mubr.bf16.vlgmr.msra.gmra.mrb[24].mxu0 %v1375_v37  ;;  %v5270_v32 = vld [vmem:[%s6500_s5 + $0x60] sm:$0xff]   ;;  %v5274_v37 = vld [vmem:[%s6500_s5 + $0x68] sm:$0xff]  }
 0x18d   : > { %4875 = vmatpush3.bf16.msra.mxu0 %v5223_v35  ;;  %2692 = vmatprep.mubr.bf16.mxu0 %v1380_v38  ;;  %v5273_v35 = vld [vmem:[%s6500_s5 + $0xa0] sm:$0xff]  }
 0x18e   : > { %4896 = vmatprep.subr.bf16.mxu1 %v5224_v36  ;;  %4876 = vmatprep.subr.bf16.mxu0 %v5226_v41 }
 0x18f   : > { %2652 = vmatmul.mubr.bf16.vlgmr.msra.gmra.mrb[24].mxu1 %v1377_v45  ;;  %v5276_v45 = vld [vmem:[%s6500_s5 + $0x28] sm:$0xff]  }
 0x190   : > { %4897 = vmatpush3.bf16.msra.mxu1 %v5225_v44  ;;  %2733 = vmatprep.mubr.bf16.mxu1 %v1382_v48 }
 0x191   : > { %4877 = vmatpush3.bf16.msra.mxu0 %v5227_v46  ;;  %4898 = vmatprep.subr.bf16.mxu1 %v5228_v47  ;;  %v5277_v46 = vld [vmem:[%s6500_s5 + $0xa8] sm:$0xff]  }
 0x192   : > { %4878 = vmatprep.subr.bf16.mxu0 %v5230_v49 }
 0x194   : > { %4899 = vmatpush3.bf16.msra.mxu1 %v5229_v50  ;;  %v5278_v50 = vld [vmem:[%s6500_s5 + $0x70] sm:$0xff]  }
 0x195   : > { %4879 = vmatpush3.bf16.msra.mxu0 %v5231_v51  ;;  %4900 = vmatprep.subr.bf16.mxu1 %v5232_v52  ;;  %v5279_v51 = vld [vmem:[%s6500_s5 + $0xf0] sm:$0xff]  }
 0x196   : > { %4880 = vmatprep.subr.bf16.mxu0 %v5234_v53 }
 0x198   : > { %4901 = vmatpush3.bf16.msra.mxu1 %v5233_v54 }
 0x199   : > { %4881 = vmatpush3.bf16.msra.mxu0 %v5235_v55  ;;  %4902 = vmatprep.subr.bf16.mxu1 %v5236_v56 }
 0x19a   : > { %4882 = vmatprep.subr.bf16.mxu0 %v5238_v57 }
 0x19c   : > { %4903 = vmatpush3.bf16.msra.mxu1 %v5237_v58  ;;  %v5280_v58 = vld [vmem:[%s6500_s5 + $0x30] sm:$0xff]  }
 0x19d   : > { %4883 = vmatpush3.bf16.msra.mxu0 %v5239_v59  ;;  %4904 = vmatprep.subr.bf16.mxu1 %v5240_v60  ;;  %v5281_v59 = vld [vmem:[%s6500_s5 + $0xb0] sm:$0xff]   ;;  %v5282_v60 = vld [vmem:[%s6500_s5 + $0x78] sm:$0xff]  }
 0x19e   : > { %4884 = vmatprep.subr.bf16.mxu0 %v5242_v61  ;;  %v5283_v61 = vld [vmem:[%s6500_s5 + $0xf8] sm:$0xff]  }
 0x1a0   : > { %4905 = vmatpush3.bf16.msra.mxu1 %v5241_v62 }
 0x1a1   : > { %4885 = vmatpush3.bf16.msra.mxu0 %v5243_v63  ;;  %4906 = vmatprep.subr.bf16.mxu1 %v5244_v0  ;;  %v5284_v63 = vld [vmem:[%s6500_s5 + $0x38] sm:$0xff]  }
 0x1a2   : > { %4886 = vmatprep.subr.bf16.mxu0 %v5246_v1  ;;  %v5285_v0 = vld [vmem:[%s6500_s5 + $0xb8] sm:$0xff]   ;;  %v5286_v1 = vld [vmem:[%s6500_s5 + $0x140] sm:$0xff]  }
 0x1a4   : > { %4907 = vmatpush3.bf16.msra.mxu1 %v5245_v2  ;;  %v5287_v2 = vld [vmem:[%s6500_s5 + $0x1c0] sm:$0xff]  }
 0x1a5   : > { %4887 = vmatpush3.bf16.msra.mxu0 %v5247_v3  ;;  %4908 = vmatprep.subr.bf16.mxu1 %v5248_v4 }
 0x1a6   : > { %4888 = vmatprep.subr.bf16.mxu0 %v5250_v5 }
 0x1a8   : > { %4909 = vmatpush3.bf16.msra.mxu1 %v5249_v6 }
 0x1a9   : > { %4889 = vmatpush3.bf16.msra.mxu0 %v5251_v7  ;;  %4910 = vmatprep.subr.bf16.mxu1 %v5252_v8 }
 0x1aa   : > { %4918 = vmatprep.subr.bf16.mxu0 %v5254_v16 }
 0x1ac   : > { %4911 = vmatpush3.bf16.msra.mxu1 %v5253_v11  ;;  %2693 = vmatmul.mubr.bf16.vlgmr.msra.gmra.mrb[28].mxu0 %v1379_v12 }
 0x1ad   : > { %4940 = vmatprep.subr.bf16.mxu1 %v5255_v17  ;;  %4919 = vmatpush3.bf16.msra.mxu0 %v5256_v18 }
 0x1ae   : > { %4920 = vmatprep.subr.bf16.mxu0 %v5258_v20 }
 0x1af   : > { %2734 = vmatmul.mubr.bf16.vlgmr.msra.gmra.mrb[28].mxu1 %v1381_v15 }
 0x1b0   : > { %4941 = vmatpush3.bf16.msra.mxu1 %v5257_v19 }
 0x1b1   : > { %4942 = vmatprep.subr.bf16.mxu1 %v5259_v21  ;;  %4921 = vmatpush3.bf16.msra.mxu0 %v5260_v22 }
 0x1b2   : > { %4922 = vmatprep.subr.bf16.mxu0 %v5262_v24 }
 0x1b4   : > { %4943 = vmatpush3.bf16.msra.mxu1 %v5261_v23 }
 0x1b5   : > { %4944 = vmatprep.subr.bf16.mxu1 %v5263_v25  ;;  %4923 = vmatpush3.bf16.msra.mxu0 %v5264_v26 }
 0x1b6   : > { %4924 = vmatprep.subr.bf16.mxu0 %v5266_v28 }
 0x1b8   : > { %4945 = vmatpush3.bf16.msra.mxu1 %v5265_v27 }
 0x1b9   : > { %4946 = vmatprep.subr.bf16.mxu1 %v5267_v29  ;;  %4925 = vmatpush3.bf16.msra.mxu0 %v5268_v30 }
 0x1ba   : > { %4926 = vmatprep.subr.bf16.mxu0 %v5270_v32 }
 0x1bc   : > { %4947 = vmatpush3.bf16.msra.mxu1 %v5269_v31 }
 0x1bd   : > { %4948 = vmatprep.subr.bf16.mxu1 %v5271_v33  ;;  %4927 = vmatpush3.bf16.msra.mxu0 %v5272_v34 }
 0x1be   : > { %4928 = vmatprep.subr.bf16.mxu0 %v5274_v37 }
 0x1c0   : > { %4949 = vmatpush3.bf16.msra.mxu1 %v5273_v35 }
 0x1c1   : > { %4950 = vmatprep.subr.bf16.mxu1 %v5275_v39  ;;  %4929 = vmatpush3.bf16.msra.mxu0 %v5276_v45 }
 0x1c2   : > { %4930 = vmatprep.subr.bf16.mxu0 %v5278_v50 }
 0x1c4   : > { %4951 = vmatpush3.bf16.msra.mxu1 %v5277_v46 }
 0x1c5   : > { %4952 = vmatprep.subr.bf16.mxu1 %v5279_v51  ;;  %4931 = vmatpush3.bf16.msra.mxu0 %v5280_v58 }
 0x1c6   : > { %4932 = vmatprep.subr.bf16.mxu0 %v5282_v60 }
 0x1c8   : > { %4953 = vmatpush3.bf16.msra.mxu1 %v5281_v59 }
 0x1c9   : > { %4954 = vmatprep.subr.bf16.mxu1 %v5283_v61  ;;  %4933 = vmatpush3.bf16.msra.mxu0 %v5284_v63 }
 0x1ca   : > { %4962 = vmatprep.subr.bf16.mxu0 %v5286_v1 }
 0x1cc   : > { %4955 = vmatpush3.bf16.msra.mxu1 %v5285_v0 }
 0x1cd   : > { %4984 = vmatprep.subr.bf16.mxu1 %v5287_v2 }
 0x21e   : > { %v4758_v36 = vpop.f32.mrb[16].mxu0 }
 0x21f   : > { %v4759_v41 = vpop.f32.mrb[17].mxu0 }
 0x220   : > { %v4760_v38 = vadd.f32 %v4759_v41, %v4758_v36  ;;  %v4761_v42 = vpop.f32.mrb[18].mxu0 }
 0x221   : > { %v4762_v44 = vpop.f32.mrb[19].mxu0 }
 0x222   : > { %v4780_v43 = vpop.f32.mrb[16].mxu1  ;;  %v2449_v47 = vadd.f32 %v4760_v38, %v4394_v40  ;;  %v4763_v48 = vadd.f32 %v4762_v44, %v4761_v42 }
 0x223   : > { %v4781_v49 = vpop.f32.mrb[17].mxu1 }
 0x224   : > { %v4782_v52 = vadd.f32 %v4781_v49, %v4780_v43  ;;  %v4783_v53 = vpop.f32.mrb[18].mxu1  ;;  %v2452_v54 = vadd.f32 %v4763_v48, %v4394_v40 }
 0x225   : > { %v4784_v55 = vpop.f32.mrb[19].mxu1 }
 0x226   : > { %v2490_v56 = vadd.f32 %v4782_v52, %v2449_v47  ;;  %v4785_v57 = vadd.f32 %v4784_v55, %v4783_v53  ;;  %v2747_v53 = vlaneseq }
 0x228   : > { %v2493_v62 = vadd.f32 %v4785_v57, %v2452_v54  ;;  %vm6114_vm0 = vcmp.lt.s32.totalorder %v2747_v53, 128  ;;  %v6136_v0 = vshrl.u32 %v2747_v53, 7  ;;  %v5318_v54 = vld [vmem:[%s6500_s5 + $0x200] sm:$0xff]  }
 0x22a   : > { %v2778_v1 = vsub.s32 1, %v6136_v0  ;;  %v2786_v2 = vsub.s32 3, %v6136_v0 }
 0x23f   : > { %v4802_v3 = vpop.f32.mrb[20].mxu0 }
 0x240   : > { %v4803_v4 = vpop.f32.mrb[21].mxu0 }
 0x241   : > { %v4804_v5 = vadd.f32 %v4803_v4, %v4802_v3  ;;  %v4805_v6 = vpop.f32.mrb[22].mxu0  ;;  %v6141_v3 = vsub.s32 0, %v6136_v0  ;;  %v2782_v4 = vsub.s32 2, %v6136_v0 }
 0x242   : > { %v4824_v7 = vpop.f32.mrb[20].mxu1  ;;  %v4806_v8 = vpop.f32.mrb[23].mxu0 }
 0x243   : > { %v2531_v9 = vadd.f32 %v4804_v5, %v2490_v56  ;;  %v4807_v10 = vadd.f32 %v4806_v8, %v4805_v6  ;;  %v4825_v11 = vpop.f32.mrb[21].mxu1  ;;  %v2794_v5 = vsub.s32 5, %v6136_v0  ;;  %v2802_v6 = vsub.s32 7, %v6136_v0 }
 0x244   : > { %v4826_v12 = vadd.f32 %v4825_v11, %v4824_v7  ;;  %v4827_v13 = vpop.f32.mrb[22].mxu1 }
 0x245   : > { %v2534_v14 = vadd.f32 %v4807_v10, %v2493_v62  ;;  %v4828_v15 = vpop.f32.mrb[23].mxu1 }
 0x246   : > { %v2572_v16 = vadd.f32 %v4826_v12, %v2531_v9  ;;  %v4829_v17 = vadd.f32 %v4828_v15, %v4827_v13 }
 0x248   : > { %v2575_v18 = vadd.f32 %v4829_v17, %v2534_v14 }
 0x25f   : > { %v4846_v19 = vpop.f32.mrb[24].mxu0 }
 0x260   : > { %v4847_v20 = vpop.f32.mrb[25].mxu0 }
 0x261   : > { %v4848_v21 = vadd.f32 %v4847_v20, %v4846_v19  ;;  %v4849_v22 = vpop.f32.mrb[26].mxu0  ;;  %v5289_v19 = vld [vmem:[%s6500_s5 + $0x180] sm:$0xff]   ;;  %v5290_v20 = vld [vmem:[%s6500_s5 + $0x148] sm:$0xff]  }
 0x262   : > { %v4868_v23 = vpop.f32.mrb[24].mxu1  ;;  %v4850_v24 = vpop.f32.mrb[27].mxu0 }
 0x263   : > { %v2613_v25 = vadd.f32 %v4848_v21, %v2572_v16  ;;  %v4851_v26 = vadd.f32 %v4850_v24, %v4849_v22  ;;  %v4869_v27 = vpop.f32.mrb[25].mxu1  ;;  %v5291_v21 = vld [vmem:[%s6500_s5 + $0x1c8] sm:$0xff]  }
 0x264   : > { %v4870_v28 = vadd.f32 %v4869_v27, %v4868_v23  ;;  %v4871_v29 = vpop.f32.mrb[26].mxu1  ;;  %v5292_v24 = vld [vmem:[%s6500_s5 + $0x108] sm:$0xff]   ;;  %v5295_v27 = vld [vmem:[%s6500_s5 + $0x1d0] sm:$0xff]  }
 0x265   : > { %v2616_v30 = vadd.f32 %v4851_v26, %v2575_v18  ;;  %v4872_v31 = vpop.f32.mrb[27].mxu1  ;;  %v5288_v18 = vld [vmem:[%s6500_s5 + $0x100] sm:$0xff]   ;;  %v5294_v26 = vld [vmem:[%s6500_s5 + $0x150] sm:$0xff]  }
 0x266   : > { %v2654_v32 = vadd.f32 %v4870_v28, %v2613_v25  ;;  %v4873_v33 = vadd.f32 %v4872_v31, %v4871_v29  ;;  %v5293_v25 = vld [vmem:[%s6500_s5 + $0x188] sm:$0xff]   ;;  %v5296_v28 = vld [vmem:[%s6500_s5 + $0x110] sm:$0xff]   ;;  %v5299_v31 = vld [vmem:[%s6500_s5 + $0x1d8] sm:$0xff]  }
 0x267   : > { %v5297_v29 = vld [vmem:[%s6500_s5 + $0x190] sm:$0xff]  }
 0x268   : > { %v2657_v34 = vadd.f32 %v4873_v33, %v2616_v30  ;;  %v5298_v30 = vld [vmem:[%s6500_s5 + $0x158] sm:$0xff]  }
 0x269   : > { %v5301_v33 = vld [vmem:[%s6500_s5 + $0x198] sm:$0xff]  }
 0x27f   : > { %v4890_v35 = vpop.f32.mrb[28].mxu0 }
 0x280   : > { %v4891_v36 = vpop.f32.mrb[29].mxu0 }
 0x281   : > { %v4892_v37 = vadd.f32 %v4891_v36, %v4890_v35  ;;  %v4893_v39 = vpop.f32.mrb[30].mxu0  ;;  %v5303_v35 = vld [vmem:[%s6500_s5 + $0x1e0] sm:$0xff]  }
 0x282   : > { %v4912_v40 = vpop.f32.mrb[28].mxu1  ;;  %v4894_v41 = vpop.f32.mrb[31].mxu0  ;;  %v5304_v36 = vld [vmem:[%s6500_s5 + $0x120] sm:$0xff]  }
 0x283   : > { %v2695_v38 = vadd.f32 %v4892_v37, %v2654_v32  ;;  %v4895_v42 = vadd.f32 %v4894_v41, %v4893_v39  ;;  %v4913_v43 = vpop.f32.mrb[29].mxu1  ;;  %v5300_v32 = vld [vmem:[%s6500_s5 + $0x118] sm:$0xff]   ;;  %v5305_v37 = vld [vmem:[%s6500_s5 + $0x1a0] sm:$0xff]   ;;  %v5306_v39 = vld [vmem:[%s6500_s5 + $0x168] sm:$0xff]  }
 0x284   : > { %v4914_v44 = vadd.f32 %v4913_v43, %v4912_v40  ;;  %v4915_v45 = vpop.f32.mrb[30].mxu1  ;;  %v5307_v40 = vld [vmem:[%s6500_s5 + $0x1e8] sm:$0xff]   ;;  %v5311_v43 = vld [vmem:[%s6500_s5 + $0x1f0] sm:$0xff]  }
 0x285   : > { %v2698_v46 = vadd.f32 %v4895_v42, %v2657_v34  ;;  %v4916_v47 = vpop.f32.mrb[31].mxu1  ;;  %v5302_v34 = vld [vmem:[%s6500_s5 + $0x160] sm:$0xff]   ;;  %v5308_v41 = vld [vmem:[%s6500_s5 + $0x128] sm:$0xff]   ;;  %v5310_v42 = vld [vmem:[%s6500_s5 + $0x170] sm:$0xff]  }
 0x286   : > { %v2736_v48 = vadd.f32 %v4914_v44, %v2695_v38  ;;  %v4917_v49 = vadd.f32 %v4916_v47, %v4915_v45  ;;  %v5309_v38 = vld [vmem:[%s6500_s5 + $0x1a8] sm:$0xff]   ;;  %v5312_v44 = vld [vmem:[%s6500_s5 + $0x130] sm:$0xff]   ;;  %v5315_v47 = vld [vmem:[%s6500_s5 + $0x1f8] sm:$0xff]  }
 0x287   : > { %v5313_v45 = vld [vmem:[%s6500_s5 + $0x1b0] sm:$0xff]  }
 0x288   : > { %v2742_v50 = vmax.f32 %v2736_v48, 0.0  ;;  %v2739_v51 = vadd.f32 %v4917_v49, %v2698_v46  ;;  %v5314_v46 = vld [vmem:[%s6500_s5 + $0x178] sm:$0xff]   ;;  %v2790_v48 = vsub.s32 4, %v6136_v0  ;;  %v2798_v49 = vsub.s32 6, %v6136_v0 }
 0x28a   : > { %2744 = vst [vmem:[#allocation5] sm:$0xff] %v2742_v50  ;;  %v2743_v52 = vmax.f32 %v2739_v51, 0.0  ;;  %v5316_v50 = vld [vmem:[%s6500_s5 + $0x138] sm:$0xff]  }
 0x28b   : > { %v5317_v51 = vld [vmem:[%s6500_s5 + $0x1b8] sm:$0xff]  }
 0x28c   : > { %2745 = vst [vmem:[#allocation5 + $0x8] sm:$0x1] %v2743_v52 }
 0x291   : > { %v2746_v55 = vld [vmem:[#allocation5] sm:$0x1]  ;;  %v2752_v56 = vld [vmem:[#allocation5 + $0x1] sm:$0x1]  ;;  %v2754_v57 = vld [vmem:[#allocation5 + $0x2] sm:$0x1] }
 0x292   : > { %2751 = vst.msk [vmem:[#allocation6] sm:$0x1] %vm6114_vm0, %v2746_v55  ;;  %2753 = vst.msk [vmem:[#allocation6 + $0x1] sm:$0x1] %vm6114_vm0, %v2752_v56  ;;  %v2756_v58 = vld [vmem:[#allocation5 + $0x3] sm:$0x1] }
 0x293   : > { %2755 = vst.msk [vmem:[#allocation6 + $0x2] sm:$0x1] %vm6114_vm0, %v2754_v57  ;;  %v2758_v59 = vld [vmem:[#allocation5 + $0x4] sm:$0x1]  ;;  %v2760_v60 = vld [vmem:[#allocation5 + $0x5] sm:$0x1] }
 0x294   : > { %2757 = vst.msk [vmem:[#allocation6 + $0x3] sm:$0x1] %vm6114_vm0, %v2756_v58  ;;  %2759 = vst.msk [vmem:[#allocation6 + $0x4] sm:$0x1] %vm6114_vm0, %v2758_v59  ;;  %v2762_v61 = vld [vmem:[#allocation5 + $0x6] sm:$0x1] }
 0x295   : > { %2761 = vst.msk [vmem:[#allocation6 + $0x5] sm:$0x1] %vm6114_vm0, %v2760_v60  ;;  %v2764_v62 = vld [vmem:[#allocation5 + $0x7] sm:$0x1]  ;;  %v2766_v63 = vld [vmem:[#allocation5 + $0x8] sm:$0x1] }
 0x296   : > { %2763 = vst.msk [vmem:[#allocation6 + $0x6] sm:$0x1] %vm6114_vm0, %v2762_v61  ;;  %2765 = vst.msk [vmem:[#allocation6 + $0x7] sm:$0x1] %vm6114_vm0, %v2764_v62  ;;  %v5414_v57 = vmov 0.0   ;;  %v5319_v58 = vld [vmem:[%s6500_s5 + $0x208] sm:$0xff]  }
 0x297   : > { %2767 = vst.msk [vmem:[#allocation6 + $0x8] sm:$0x1] %vm6114_vm0, %v2766_v63  ;;  %v5320_v59 = vld [vmem:[%s6500_s5 + $0x210] sm:$0xff]   ;;  %v5321_v60 = vld [vmem:[%s6500_s5 + $0x218] sm:$0xff]   ;;  %v5322_v61 = vld [vmem:[%s6500_s5 + $0x220] sm:$0xff]  }
 0x298   : > { %v5323_v62 = vld [vmem:[%s6500_s5 + $0x228] sm:$0xff]   ;;  %v5324_v63 = vld [vmem:[%s6500_s5 + $0x230] sm:$0xff]  }
 0x29d   : > { %v6146_v7 = vld [vmem:[#allocation6] sm:$0xff] }
 0x29e   : > { %v2779_v8 = vrot.slane %v6146_v7, %v2778_v1  ;;  %v2787_v9 = vrot.slane %v6146_v7, %v2786_v2  ;;  %v2775_v10 = vrot.slane %v6146_v7, %v6141_v3  ;;  %v2783_v11 = vrot.slane %v6146_v7, %v2782_v4 }
 0x29f   : > { %v2795_v12 = vrot.slane %v6146_v7, %v2794_v5  ;;  %v2803_v13 = vrot.slane %v6146_v7, %v2802_v6  ;;  %v2791_v52 = vrot.slane %v6146_v7, %v2790_v48  ;;  %v2799_v53 = vrot.slane %v6146_v7, %v2798_v49  ;;  %v5325_v5 = vld [vmem:[%s6500_s5 + $0x238] sm:$0xff]  }
 0x2a0   : > { %v2818_v14 = vpack.c.bf16 %v2779_v8, %v2779_v8  ;;  %v2820_v15 = vpack.c.bf16 %v2787_v9, %v2787_v9  ;;  %v2817_v16 = vpack.c.bf16 %v2775_v10, %v2775_v10  ;;  %v2819_v17 = vpack.c.bf16 %v2783_v11, %v2783_v11  ;;  %v4523_v6 = vld [vmem:[#allocation6 + $0x8] ss:$0 sm:$0xff]  ;;  %v5326_v8 = vld [vmem:[%s6502_s7] ss:$16 sps:$4 sm:$0xff]   ;;  %v5328_v9 = vld [vmem:[%s6502_s7 + $0x4] ss:$16 sps:$4 sm:$0xff]  }
 0x2a1   : > { %v2822_v22 = vpack.c.bf16 %v2795_v12, %v2795_v12  ;;  %v2824_v23 = vpack.c.bf16 %v2803_v13, %v2803_v13  ;;  %v2821_v55 = vpack.c.bf16 %v2791_v52, %v2791_v52  ;;  %v2823_v56 = vpack.c.bf16 %v2799_v53, %v2799_v53  ;;  %v5329_v10 = vld [vmem:[%s6502_s7 + $0x8] ss:$16 sps:$4 sm:$0xff]   ;;  %v5331_v11 = vld [vmem:[%s6502_s7 + $0xc] ss:$16 sps:$4 sm:$0xff]   ;;  %v5334_v12 = vld [vmem:[%s6502_s7 + $0x24] ss:$16 sps:$4 sm:$0xff]  }
 0x2a2   : > { %3435 = vmatprep.mubr.bf16.mxu0 %v2818_v14  ;;  %3475 = vmatprep.mubr.bf16.mxu1 %v2820_v15  ;;  %v2825_v7 = vpack.c.bf16 %v4523_v6, %v4523_v6  ;;  %v5337_v13 = vld [vmem:[%s6502_s7 + $0x2c] ss:$16 sps:$4 sm:$0xff]   ;;  %v5332_v14 = vld [vmem:[%s6502_s7 + $0x20] ss:$16 sps:$4 sm:$0xff]   ;;  %v5335_v15 = vld [vmem:[%s6502_s7 + $0x28] ss:$16 sps:$4 sm:$0xff]  }
 0x2a3   : > { %3436 = vmatmul.mubr.bf16.vlgmr.msra.gmra.mrb[32].mxu0 %v2817_v16  ;;  %3476 = vmatmul.mubr.bf16.vlgmr.msra.gmra.mrb[32].mxu1 %v2819_v17  ;;  %v5340_v16 = vld [vmem:[%s6502_s7 + $0x44] ss:$16 sps:$4 sm:$0xff]   ;;  %v5343_v17 = vld [vmem:[%s6502_s7 + $0x4c] ss:$16 sps:$4 sm:$0xff]  }
 0x2a4   : > { %4963 = vmatpush3.bf16.msra.mxu0 %v5288_v18  ;;  %4985 = vmatpush3.bf16.msra.mxu1 %v5289_v19  ;;  %v5338_v18 = vld [vmem:[%s6502_s7 + $0x40] ss:$16 sps:$4 sm:$0xff]   ;;  %v5341_v19 = vld [vmem:[%s6502_s7 + $0x48] ss:$16 sps:$4 sm:$0xff]  }
 0x2a5   : > { %3515 = vmatprep.mubr.bf16.mxu0 %v2822_v22  ;;  %3555 = vmatprep.mubr.bf16.mxu1 %v2824_v23  ;;  %v5344_v22 = vld [vmem:[%s6502_s7 + $0x60] ss:$16 sps:$4 sm:$0xff]   ;;  %v5347_v23 = vld [vmem:[%s6502_s7 + $0x68] ss:$16 sps:$4 sm:$0xff]  }
 0x2a6   : > { %4964 = vmatprep.subr.bf16.mxu0 %v5290_v20  ;;  %4986 = vmatprep.subr.bf16.mxu1 %v5291_v21  ;;  %v5346_v20 = vld [vmem:[%s6502_s7 + $0x64] ss:$16 sps:$4 sm:$0xff]   ;;  %v5349_v21 = vld [vmem:[%s6502_s7 + $0x6c] ss:$16 sps:$4 sm:$0xff]  }
 0x2a8   : > { %4965 = vmatpush3.bf16.msra.mxu0 %v5292_v24  ;;  %4987 = vmatpush3.bf16.msra.mxu1 %v5293_v25  ;;  %v5352_v24 = vld [vmem:[%s6502_s7 + $0x84] ss:$16 sps:$4 sm:$0xff]   ;;  %v5355_v25 = vld [vmem:[%s6502_s7 + $0x8c] ss:$16 sps:$4 sm:$0xff]  }
 0x2a9   : > { %4966 = vmatprep.subr.bf16.mxu0 %v5294_v26  ;;  %4988 = vmatprep.subr.bf16.mxu1 %v5295_v27  ;;  %v5350_v26 = vld [vmem:[%s6502_s7 + $0x80] ss:$16 sps:$4 sm:$0xff]   ;;  %v5353_v27 = vld [vmem:[%s6502_s7 + $0x88] ss:$16 sps:$4 sm:$0xff]  }
 0x2ac   : > { %4967 = vmatpush3.bf16.msra.mxu0 %v5296_v28  ;;  %4989 = vmatpush3.bf16.msra.mxu1 %v5297_v29  ;;  %v5356_v28 = vld [vmem:[%s6502_s7 + $0xa0] ss:$16 sps:$4 sm:$0xff]   ;;  %v5358_v29 = vld [vmem:[%s6502_s7 + $0xa4] ss:$16 sps:$4 sm:$0xff]  }
 0x2ad   : > { %4968 = vmatprep.subr.bf16.mxu0 %v5298_v30  ;;  %4990 = vmatprep.subr.bf16.mxu1 %v5299_v31  ;;  %v5359_v30 = vld [vmem:[%s6502_s7 + $0xa8] ss:$16 sps:$4 sm:$0xff]   ;;  %v5361_v31 = vld [vmem:[%s6502_s7 + $0xac] ss:$16 sps:$4 sm:$0xff]  }
 0x2b0   : > { %4969 = vmatpush3.bf16.msra.mxu0 %v5300_v32  ;;  %4991 = vmatpush3.bf16.msra.mxu1 %v5301_v33  ;;  %v5364_v32 = vld [vmem:[%s6502_s7 + $0xc4] ss:$16 sps:$4 sm:$0xff]   ;;  %v5367_v33 = vld [vmem:[%s6502_s7 + $0xcc] ss:$16 sps:$4 sm:$0xff]  }
 0x2b1   : > { %4970 = vmatprep.subr.bf16.mxu0 %v5302_v34  ;;  %4992 = vmatprep.subr.bf16.mxu1 %v5303_v35  ;;  %v5362_v34 = vld [vmem:[%s6502_s7 + $0xc0] ss:$16 sps:$4 sm:$0xff]   ;;  %v5365_v35 = vld [vmem:[%s6502_s7 + $0xc8] ss:$16 sps:$4 sm:$0xff]  }
 0x2b4   : > { %4971 = vmatpush3.bf16.msra.mxu0 %v5304_v36  ;;  %4993 = vmatpush3.bf16.msra.mxu1 %v5305_v37  ;;  %v5370_v36 = vld [vmem:[%s6502_s7 + $0xe4] ss:$16 sps:$4 sm:$0xff]   ;;  %v5373_v37 = vld [vmem:[%s6502_s7 + $0xec] ss:$16 sps:$4 sm:$0xff]  }
 0x2b5   : > { %4972 = vmatprep.subr.bf16.mxu0 %v5306_v39  ;;  %4994 = vmatprep.subr.bf16.mxu1 %v5307_v40  ;;  %v5416_v39 = vmov 0   ;;  %v5368_v40 = vld [vmem:[%s6502_s7 + $0xe0] ss:$16 sps:$4 sm:$0xff]  }
 0x2b8   : > { %4973 = vmatpush3.bf16.msra.mxu0 %v5308_v41  ;;  %4995 = vmatpush3.bf16.msra.mxu1 %v5309_v38  ;;  %v5371_v41 = vld [vmem:[%s6502_s7 + $0xe8] ss:$16 sps:$4 sm:$0xff]   ;;  %v5374_v38 = vld [vmem:[%s6504_s9 + $0x40] sm:$0xff]  }
 0x2b9   : > { %4974 = vmatprep.subr.bf16.mxu0 %v5310_v42  ;;  %4996 = vmatprep.subr.bf16.mxu1 %v5311_v43  ;;  %v5375_v42 = vld [vmem:[%s6504_s9 + $0xc0] sm:$0xff]  }
 0x2bc   : > { %4975 = vmatpush3.bf16.msra.mxu0 %v5312_v44  ;;  %4997 = vmatpush3.bf16.msra.mxu1 %v5313_v45  ;;  %v2970_v45 = vld [vmem:[%s6501_s6] sm:$0x1] }
 0x2bd   : > { %4976 = vmatprep.subr.bf16.mxu0 %v5314_v46  ;;  %4998 = vmatprep.subr.bf16.mxu1 %v5315_v47 }
 0x2c0   : > { %4977 = vmatpush3.bf16.msra.mxu0 %v5316_v50  ;;  %4999 = vmatpush3.bf16.msra.mxu1 %v5317_v51 }
 0x2c1   : > { %5059 = vmatprep.subr.bf16.mxu0 %v5414_v57  ;;  %3821 = vmatprep.subr.bf16.mxu1 %v5328_v9 }
 0x2c3   : > { %3516 = vmatmul.mubr.bf16.vlgmr.msra.gmra.mrb[36].mxu0 %v2821_v55  ;;  %3556 = vmatmul.mubr.bf16.vlgmr.msra.gmra.mrb[36].mxu1 %v2823_v56 }
 0x2c4   : > { %5060 = vmatpush3.bf16.msra.mxu0 %v5318_v54  ;;  %5075 = vmatprep.mubr.msk.bf16.mxu0 %vm5415_vm1, %v5414_v57 }
 0x2c5   : > { %5061 = vmatprep.subr.bf16.mxu0 %v5414_v57  ;;  %3822 = vmatpush1.bf16.msra.mxu1 %v5326_v8 }
 0x2c6   : > { %3823 = vmatprep.subr.bf16.mxu1 %v5334_v12  ;;  %3853 = vmatprep.mubr.bf16.mxu1 %v5416_v39 }
 0x2c8   : > { %5062 = vmatpush3.bf16.msra.mxu0 %v5319_v58 }
 0x2c9   : > { %5063 = vmatprep.subr.bf16.mxu0 %v5414_v57  ;;  %3824 = vmatpush1.bf16.msra.mxu1 %v5332_v14 }
 0x2ca   : > { %3825 = vmatprep.subr.bf16.mxu1 %v5340_v16  ;;  %v5376_v16 = vld [vmem:[%s6504_s9] sm:$0xff]  }
 0x2cc   : > { %5064 = vmatpush3.bf16.msra.mxu0 %v5320_v59 }
 0x2cd   : > { %5065 = vmatprep.subr.bf16.mxu0 %v5414_v57  ;;  %3826 = vmatpush1.bf16.msra.mxu1 %v5338_v18 }
 0x2ce   : > { %3827 = vmatprep.subr.bf16.mxu1 %v5346_v20  ;;  %v5379_v20 = vld [vmem:[%s6504_s9 + $0xc8] sm:$0xff]  }
 0x2d0   : > { %5066 = vmatpush3.bf16.msra.mxu0 %v5321_v60 }
 0x2d1   : > { %5067 = vmatprep.subr.bf16.mxu0 %v5414_v57  ;;  %3828 = vmatpush1.bf16.msra.mxu1 %v5344_v22  ;;  %v5381_v22 = vld [vmem:[%s6504_s9 + $0x88] sm:$0xff]  }
 0x2d2   : > { %3829 = vmatprep.subr.bf16.mxu1 %v5352_v24  ;;  %v5383_v24 = vld [vmem:[%s6504_s9 + $0xd0] sm:$0xff]  }
 0x2d4   : > { %5068 = vmatpush3.bf16.msra.mxu0 %v5322_v61 }
 0x2d5   : > { %5069 = vmatprep.subr.bf16.mxu0 %v5414_v57  ;;  %3830 = vmatpush1.bf16.msra.mxu1 %v5350_v26  ;;  %v5385_v26 = vld [vmem:[%s6504_s9 + $0x90] sm:$0xff]  }
 0x2d6   : > { %3831 = vmatprep.subr.bf16.mxu1 %v5358_v29  ;;  %v5388_v29 = vld [vmem:[%s6504_s9 + $0x18] sm:$0xff]  }
 0x2d8   : > { %5070 = vmatpush3.bf16.msra.mxu0 %v5323_v62 }
 0x2d9   : > { %5071 = vmatprep.subr.bf16.mxu0 %v5414_v57  ;;  %3832 = vmatpush1.bf16.msra.mxu1 %v5356_v28  ;;  %v5387_v28 = vld [vmem:[%s6504_s9 + $0xd8] sm:$0xff]  }
 0x2da   : > { %3833 = vmatprep.subr.bf16.mxu1 %v5364_v32  ;;  %v5391_v32 = vld [vmem:[%s6504_s9 + $0xe0] sm:$0xff]  }
 0x2dc   : > { %5072 = vmatpush3.bf16.msra.mxu0 %v5324_v63 }
 0x2dd   : > { %5073 = vmatprep.subr.bf16.mxu0 %v5414_v57  ;;  %3834 = vmatpush1.bf16.msra.mxu1 %v5362_v34  ;;  %v5393_v34 = vld [vmem:[%s6504_s9 + $0xa0] sm:$0xff]  }
 0x2de   : > { %3835 = vmatprep.subr.bf16.mxu1 %v5370_v36  ;;  %v5395_v36 = vld [vmem:[%s6504_s9 + $0xe8] sm:$0xff]  }
 0x2e0   : > { %5074 = vmatpush3.bf16.msra.mxu0 %v5325_v5 }
 0x2e1   : > { %3862 = vmatprep.subr.bf16.mxu0 %v5331_v11  ;;  %3836 = vmatpush1.bf16.msra.mxu1 %v5368_v40  ;;  %v5398_v40 = vld [vmem:[%s6504_s9 + $0x70] sm:$0xff]  }
 0x2e2   : > { %5015 = vmatprep.subr.bf16.mxu1 %v5374_v38  ;;  %v5400_v38 = vld [vmem:[%s6504_s9 + $0x30] sm:$0xff]  }
 0x2e3   : > { %5076 = vmatmul.mubr.bf16.vlgmr.msra.gmra.mrb[40].mxu0 %v2825_v7 }
 0x2e4   : > { %3863 = vmatpush1.bf16.msra.mxu0 %v5329_v10  ;;  %3894 = vmatprep.mubr.bf16.mxu0 %v5416_v39  ;;  %v5397_v39 = vld [vmem:[%s6504_s9 + $0xa8] sm:$0xff]  }
 0x2e5   : > { %3864 = vmatprep.subr.bf16.mxu0 %v5337_v13 }
 0x2e8   : > { %3865 = vmatpush1.bf16.msra.mxu0 %v5335_v15 }
 0x2e9   : > { %3866 = vmatprep.subr.bf16.mxu0 %v5343_v17  ;;  %v5377_v17 = vld [vmem:[%s6504_s9 + $0x80] sm:$0xff]  }
 0x2ec   : > { %3867 = vmatpush1.bf16.msra.mxu0 %v5341_v19  ;;  %v5378_v19 = vld [vmem:[%s6504_s9 + $0x48] sm:$0xff]  }
 0x2ed   : > { %3868 = vmatprep.subr.bf16.mxu0 %v5349_v21  ;;  %v5380_v21 = vld [vmem:[%s6504_s9 + $0x8] sm:$0xff]  }
 0x2f0   : > { %3869 = vmatpush1.bf16.msra.mxu0 %v5347_v23  ;;  %v5382_v23 = vld [vmem:[%s6504_s9 + $0x50] sm:$0xff]  }
 0x2f1   : > { %3870 = vmatprep.subr.bf16.mxu0 %v5355_v25  ;;  %v5384_v25 = vld [vmem:[%s6504_s9 + $0x10] sm:$0xff]  }
 0x2f4   : > { %3871 = vmatpush1.bf16.msra.mxu0 %v5353_v27  ;;  %v5386_v27 = vld [vmem:[%s6504_s9 + $0x58] sm:$0xff]  }
 0x2f5   : > { %3872 = vmatprep.subr.bf16.mxu0 %v5361_v31  ;;  %v5390_v31 = vld [vmem:[%s6504_s9 + $0x60] sm:$0xff]  }
 0x2f8   : > { %3873 = vmatpush1.bf16.msra.mxu0 %v5359_v30  ;;  %v5389_v30 = vld [vmem:[%s6504_s9 + $0x98] sm:$0xff]  }
 0x2f9   : > { %3874 = vmatprep.subr.bf16.mxu0 %v5367_v33  ;;  %v5392_v33 = vld [vmem:[%s6504_s9 + $0x20] sm:$0xff]  }
 0x2fc   : > { %3875 = vmatpush1.bf16.msra.mxu0 %v5365_v35  ;;  %v5394_v35 = vld [vmem:[%s6504_s9 + $0x68] sm:$0xff]  }
 0x2fd   : > { %3876 = vmatprep.subr.bf16.mxu0 %v5373_v37  ;;  %v5396_v37 = vld [vmem:[%s6504_s9 + $0x28] sm:$0xff]  }
 0x300   : > { %3877 = vmatpush1.bf16.msra.mxu0 %v5371_v41  ;;  %v5399_v41 = vld [vmem:[%s6504_s9 + $0xf0] sm:$0xff]  }
 0x301   : > { %5037 = vmatprep.subr.bf16.mxu0 %v5375_v42  ;;  %v5401_v42 = vld [vmem:[%s6504_s9 + $0xb0] sm:$0xff]  }
 0x376   : > { %v4934_v43 = vpop.f32.mrb[32].mxu0  ;;  %v4956_v44 = vpop.f32.mrb[32].mxu1 }
 0x377   : > { %v4935_v46 = vpop.f32.mrb[33].mxu0  ;;  %v4957_v47 = vpop.f32.mrb[33].mxu1 }
 0x378   : > { %v4936_v48 = vadd.f32 %v4935_v46, %v4934_v43  ;;  %v4958_v49 = vadd.f32 %v4957_v47, %v4956_v44  ;;  %v4937_v50 = vpop.f32.mrb[34].mxu0  ;;  %v4959_v51 = vpop.f32.mrb[34].mxu1  ;;  %v5402_v43 = vld [vmem:[%s6504_s9 + $0x78] sm:$0xff]   ;;  %v3639_v47 = vld [vmem:[%s6503_s8] sm:$0xf] }
 0x379   : > { %v4938_v52 = vpop.f32.mrb[35].mxu0  ;;  %v4960_v53 = vpop.f32.mrb[35].mxu1  ;;  %v5403_v44 = vld [vmem:[%s6504_s9 + $0xf8] sm:$0xff]   ;;  %v3808_v50 = vrot.slane %v3639_v47, %v2778_v1  ;;  %v3816_v51 = vrot.slane %v3639_v47, %v2786_v2 }
 0x37a   : > { %v3438_v54 = vadd.f32 %v4936_v48, %v2970_v45  ;;  %v5404_v45 = vld [vmem:[%s6504_s9 + $0x38] sm:$0xff]   ;;  %v3804_v48 = vrot.slane %v3639_v47, %v6141_v3 }
 0x37b   : > { %v5405_v46 = vld [vmem:[%s6504_s9 + $0xb8] sm:$0xff]  }
 0x37c   : > { %v3478_v55 = vadd.f32 %v4958_v49, %v3438_v54  ;;  %v3812_v49 = vrot.slane %v3639_v47, %v2782_v4 }
 0x396   : > { %v4978_v56 = vpop.f32.mrb[36].mxu0  ;;  %v5000_v57 = vpop.f32.mrb[36].mxu1 }
 0x397   : > { %v4979_v58 = vpop.f32.mrb[37].mxu0  ;;  %v5001_v59 = vpop.f32.mrb[37].mxu1 }
 0x398   : > { %v4980_v60 = vadd.f32 %v4979_v58, %v4978_v56  ;;  %v5002_v61 = vadd.f32 %v5001_v59, %v5000_v57  ;;  %v4981_v62 = vpop.f32.mrb[38].mxu0  ;;  %v5003_v63 = vpop.f32.mrb[38].mxu1 }
 0x399   : > { %v4982_v5 = vpop.f32.mrb[39].mxu0  ;;  %v5004_v6 = vpop.f32.mrb[39].mxu1 }
 0x39a   : > { %v3518_v7 = vadd.f32 %v4980_v60, %v3478_v55 }
 0x39c   : > { %v3558_v8 = vadd.f32 %v5002_v61, %v3518_v7 }
 0x3b6   : > { %v3597_v9 = vpop.f32.mrb[40].mxu0 }
 0x3b7   : > { %v3598_v10 = vadd.f32 %v3597_v9, %v3558_v8  ;;  %v5077_v11 = vpop.f32.mrb[41].mxu0  ;;  %v5417_v9 = vmov 6  }
 0x3b8   : > { %v3600_v12 = vpop.f32.mrb[42].mxu0  ;;  %5092 = vset.pattern.permute.xlu0 %v5417_v9  ;;  %5093 = vset.pattern.permute.xlu1 %v5417_v9 }
 0x3b9   : > { %v3603_v13 = vmax.f32 %v3598_v10, 0.0  ;;  %v5078_v14 = vpop.f32.mrb[43].mxu0  ;;  %v3975_v12 = vld [vmem:[%s6505_s10] sm:$0x1] }
 0x3bb   : > { %3604 = vst [vmem:[#allocation7] sm:$0x1] %v3603_v13 }
 0x3c2   : > { %v3605_v15 = vld [vmem:[#allocation7] sm:$0x1] }
 0x3c3   : > { %v3606_v18 = vpack.c.bf16 %v3605_v15, %v3605_v15 }
 0x3c5   : > { %3854 = vmatmul.mubr.bf16.vlgmr.msra.gmra.mrb[40].mxu1 %v3606_v18  ;;  %3895 = vmatmul.mubr.bf16.vlgmr.msra.gmra.mrb[44].mxu0 %v3606_v18 }
 0x3c6   : > { %5016 = vmatpush3.bf16.msra.mxu1 %v5376_v16  ;;  %5038 = vmatpush3.bf16.msra.mxu0 %v5377_v17 }
 0x3c7   : > { %5017 = vmatprep.subr.bf16.mxu1 %v5378_v19  ;;  %5039 = vmatprep.subr.bf16.mxu0 %v5379_v20 }
 0x3ca   : > { %5018 = vmatpush3.bf16.msra.mxu1 %v5380_v21  ;;  %5040 = vmatpush3.bf16.msra.mxu0 %v5381_v22 }
 0x3cb   : > { %5019 = vmatprep.subr.bf16.mxu1 %v5382_v23  ;;  %5041 = vmatprep.subr.bf16.mxu0 %v5383_v24 }
 0x3ce   : > { %5020 = vmatpush3.bf16.msra.mxu1 %v5384_v25  ;;  %5042 = vmatpush3.bf16.msra.mxu0 %v5385_v26 }
 0x3cf   : > { %5021 = vmatprep.subr.bf16.mxu1 %v5386_v27  ;;  %5043 = vmatprep.subr.bf16.mxu0 %v5387_v28 }
 0x3d2   : > { %5022 = vmatpush3.bf16.msra.mxu1 %v5388_v29  ;;  %5044 = vmatpush3.bf16.msra.mxu0 %v5389_v30 }
 0x3d3   : > { %5023 = vmatprep.subr.bf16.mxu1 %v5390_v31  ;;  %5045 = vmatprep.subr.bf16.mxu0 %v5391_v32 }
 0x3d6   : > { %5024 = vmatpush3.bf16.msra.mxu1 %v5392_v33  ;;  %5046 = vmatpush3.bf16.msra.mxu0 %v5393_v34 }
 0x3d7   : > { %5025 = vmatprep.subr.bf16.mxu1 %v5394_v35  ;;  %5047 = vmatprep.subr.bf16.mxu0 %v5395_v36 }
 0x3da   : > { %5026 = vmatpush3.bf16.msra.mxu1 %v5396_v37  ;;  %5048 = vmatpush3.bf16.msra.mxu0 %v5397_v39 }
 0x3db   : > { %5027 = vmatprep.subr.bf16.mxu1 %v5398_v40  ;;  %5049 = vmatprep.subr.bf16.mxu0 %v5399_v41 }
 0x3de   : > { %5028 = vmatpush3.bf16.msra.mxu1 %v5400_v38  ;;  %5050 = vmatpush3.bf16.msra.mxu0 %v5401_v42 }
 0x3df   : > { %5029 = vmatprep.subr.bf16.mxu1 %v5402_v43  ;;  %5051 = vmatprep.subr.bf16.mxu0 %v5403_v44 }
 0x3e2   : > { %5030 = vmatpush3.bf16.msra.mxu1 %v5404_v45  ;;  %5052 = vmatpush3.bf16.msra.mxu0 %v5405_v46 }
 0x498   : > { %v3855_v52 = vpop.f32.mrb[40].mxu1  ;;  %v3896_v53 = vpop.f32.mrb[44].mxu0 }
 0x499   : > { %v3856_v54 = vadd.f32 %v3855_v52, %v3804_v48  ;;  %v3897_v55 = vadd.f32 %v3896_v53, %v3812_v49  ;;  %v3857_v56 = vpop.f32.mrb[41].mxu1  ;;  %v3898_v57 = vpop.f32.mrb[45].mxu0 }
 0x49a   : > { %v3858_v58 = vadd.f32 %v3857_v56, %v3808_v50  ;;  %v3899_v59 = vadd.f32 %v3898_v57, %v3816_v51  ;;  %v3859_v60 = vpop.f32.mrb[42].mxu1  ;;  %v3900_v61 = vpop.f32.mrb[46].mxu0 }
 0x49b   : > { %v3903_v62 = vmax.f32 %v3856_v54, 0.0  ;;  %v3905_v63 = vmax.f32 %v3897_v55, 0.0  ;;  %v3860_v5 = vpop.f32.mrb[43].mxu1  ;;  %v3901_v4 = vpop.f32.mrb[47].mxu0 }
 0x49c   : > { %v3904_v6 = vmax.f32 %v3858_v58, 0.0  ;;  %v3906_v7 = vmax.f32 %v3899_v59, 0.0 }
 0x49d   : > { %v3907_v0 = vpack.c.bf16 %v3903_v62, %v3903_v62  ;;  %v3909_v2 = vpack.c.bf16 %v3905_v63, %v3905_v63 }
 0x49e   : > { %v3908_v1 = vpack.c.bf16 %v3904_v6, %v3904_v6  ;;  %v3910_v8 = vpack.c.bf16 %v3906_v7, %v3906_v7 }
 0x4a0   : > { %4200 = vmatprep.mubr.bf16.mxu1 %v3908_v1  ;;  %4240 = vmatprep.mubr.bf16.mxu0 %v3910_v8 }
 0x4a1   : > { %4201 = vmatmul.mubr.bf16.vlgmr.msra.gmra.mrb[44].mxu1 %v3907_v0  ;;  %4241 = vmatmul.mubr.bf16.vlgmr.msra.gmra.mrb[48].mxu0 %v3909_v2 }
 0x574   : > { %v5031_v10 = vpop.f32.mrb[44].mxu1  ;;  %v5053_v11 = vpop.f32.mrb[48].mxu0 }
 0x575   : > { %v5032_v13 = vpop.f32.mrb[45].mxu1  ;;  %v5054_v14 = vpop.f32.mrb[49].mxu0 }
 0x576   : > { %v5033_v15 = vadd.f32 %v5032_v13, %v5031_v10  ;;  %v5055_v16 = vadd.f32 %v5054_v14, %v5053_v11  ;;  %v5034_v17 = vpop.f32.mrb[46].mxu1  ;;  %v5056_v18 = vpop.f32.mrb[50].mxu0 }
 0x577   : > { %v5035_v19 = vpop.f32.mrb[47].mxu1  ;;  %v5057_v20 = vpop.f32.mrb[51].mxu0 }
 0x578   : > { %v4203_v21 = vadd.f32 %v5033_v15, %v3975_v12 }
 0x57a   : > { %v4243_v22 = vadd.f32 %v5055_v16, %v4203_v21 }
 0x57c   : > { %v4249_v23 = vsel %vm4248_vm2, %v4243_v22, 0.0 }
 0x57d   : > { %4250 = vadd.xlane.f32.xlu0 %v4249_v23 }
 0x593   : > { %4255 = vperm.xlu0 %5092, %v4243_v22  }
 0x60a   : > { %v4251_v24 = vpop.xlane.xlu0 %4250 }
 0x60b   : > { %v4252_v25 = vsub.f32 %v4251_v24, %v4243_v22 }
 0x60d   : > { %v4259_v26 = vmul.f32 0.16666667, %v4252_v25 }
 0x60f   : > { %4262 = vperm.xlu1 %5093, %v4259_v26  }
 0x612   : > { %v4256_v27 = vpop.permute.xlu0 %4255 }
 0x613   : > { %v4258_v28 = vadd.f32 %v4256_v27, %v4243_v22 }
 0x68e   : > { %v4263_v29 = vpop.permute.xlu1 %4262 }
 0x68f   : > { %v4265_v30 = vsub.f32 %v4258_v28, %v4263_v29 }
 0x691   : > { %v4269_v31 = vrot.slane %v4265_v30, %v6141_v3 }
 0x693   : > { %4270 = vst [vmem:[%s384_s14] sm:$0xff] %v4269_v31 }
 0x694 PF: > { %s21_s17 = sadd.s32 1, %s5412_s17  }
 0x695   : > { %p18_p4 = scmp.ge.s32.totalorder %s21_s17, 4  }
 0x697   :  { %20 = sbr.rel (!%p18_p4) target bundleno = 1 (0x1), region = 102 }

</bundles_post_ra>
